<compile_context>
chip_gen: v6e
topology: v6e:2x2x1
jax: 0.10.0
libtpu: 0.0.40
codegen_flags: <defaults>
</compile_context>

<pallas_src>
import functools

import jax
import jax.numpy as jnp
from jax.experimental import pallas as pl
from jax.experimental.pallas import tpu as pltpu


def _round_up(v, m):
    return ((v + m - 1) // m) * m


def _relu_conv_stats_kernel(offsets, x_ref, w_ref, mask_ref, o_ref, stats_ref):
    """One image per grid step.

    x_ref    : (Rin, Cin_p) f32   flattened zero-padded image (+ halo tail rows)
    w_ref    : (k*k, Cin_p, Cp) f32
    mask_ref : (Rout, 1) f32      1.0 at rows that are real conv output positions
    o_ref    : (Rout, Cp) bf16    conv value at every padded-grid position
    stats_ref: (8, Cp) f32        row0 = masked sum, row1 = masked sum of squares
    """
    rout, cp = o_ref.shape
    acc = jnp.zeros((rout, cp), jnp.float32)
    # Direct convolution: for each tap (kh, kw), a statically shifted window of
    # the flattened image feeds a (Rout, Cin_p) x (Cin_p, Cp) MXU matmul.
    for j, off in enumerate(offsets):
        a = jnp.maximum(x_ref[pl.ds(off, rout), :], 0.0)          # fused ReLU
        acc = acc + jnp.dot(a, w_ref[j], preferred_element_type=jnp.float32)
    o_ref[...] = acc.astype(o_ref.dtype)

    # Per-channel BatchNorm statistics over the *valid* output rows only.
    m = mask_ref[...]                                   # (Rout, 1) lane-bcast
    am = acc * m
    csum = jnp.sum(am, axis=0, keepdims=True)           # (1, Cp)
    csq = jnp.sum(am * acc, axis=0, keepdims=True)      # (1, Cp), m in {0,1}
    rows = jax.lax.broadcasted_iota(jnp.int32, (8, cp), 0)
    stats_ref[...] = jnp.where(rows == 0, csum, jnp.where(rows == 1, csq, 0.0))


@functools.partial(jax.jit, static_argnames=("stride", "padding", "eps"))
def relu_conv_bn(x, weight, gamma, beta, *, stride, padding, eps=1e-5):
    N, C_in, H, W = x.shape
    C_out, _, k, _ = weight.shape
    Hout = (H + 2 * padding - k) // stride + 1
    Wout = (W + 2 * padding - k) // stride + 1
    Hp, Wp = H + 2 * padding, W + 2 * padding
    M = N * Hout * Wout

    Cin_p = _round_up(C_in, 8)          # aligned contraction dim for the MXU
    Cp = _round_up(C_out, 128)          # lane-dense output channels
    Rimg = Hp * Wp                      # conv evaluated at every padded position
    Rout = _round_up(Rimg, 16)          # bf16-friendly sublane extent
    halo = (k - 1) * Wp + (k - 1)       # largest row shift among the k*k taps
    Rin = _round_up(Rout + halo, 8)
    offsets = [kh * Wp + kw for kh in range(k) for kw in range(k)]

    # ---- input-sized glue only (no 9x im2col expansion in HBM) -------------
    x_nhwc = jnp.transpose(x, (0, 2, 3, 1))
    xp = jnp.pad(x_nhwc, ((0, 0), (padding, padding), (padding, padding),
                          (0, Cin_p - C_in)))
    x_img = xp.reshape(N, Rimg, Cin_p)
    x_img = jnp.pad(x_img, ((0, 0), (0, Rin - Rimg), (0, 0)))

    # weight OIHW -> (kh, kw, cin, cout) -> (k*k, Cin_p, Cp)
    w_t = jnp.transpose(weight, (2, 3, 1, 0)).astype(jnp.float32)
    w_t = jnp.pad(w_t, ((0, 0), (0, 0), (0, Cin_p - C_in), (0, Cp - C_out)))
    w_mat = w_t.reshape(k * k, Cin_p, Cp)

    # padded-grid rows that correspond to real conv output positions
    m2 = jnp.zeros((Hp, Wp), jnp.float32)
    m2 = m2.at[0:(Hout - 1) * stride + 1:stride,
               0:(Wout - 1) * stride + 1:stride].set(1.0)
    mask = jnp.pad(m2.reshape(Rimg, 1), ((0, Rout - Rimg), (0, 0)))

    # ---- VMEM budget (generation-aware; working set is tiny) ---------------
    est = (2 * Rin * Cin_p * 4 + 2 * k * k * Cin_p * Cp * 4
           + 2 * Rout * Cp * 2 + 2 * 8 * Cp * 4 + Rout * 4 + Rout * Cp * 4)
    try:
        vmem_cap = int(pltpu.get_tpu_info().vmem_capacity_bytes)
    except Exception:
        vmem_cap = 64 << 20             # v7x per-TensorCore capacity (smallest)
    vmem_limit = int(min(vmem_cap // 2, max(8 << 20, 8 * est)))

    conv, stats = pl.pallas_call(
        functools.partial(_relu_conv_stats_kernel, offsets),
        out_shape=(jax.ShapeDtypeStruct((N, Rout, Cp), jnp.bfloat16),
                   jax.ShapeDtypeStruct((N, 8, Cp), jnp.float32)),
        grid_spec=pltpu.PrefetchScalarGridSpec(
            num_scalar_prefetch=0,
            grid=(N,),
            in_specs=[pl.BlockSpec((None, Rin, Cin_p), lambda n: (n, 0, 0)),
                      pl.BlockSpec((k * k, Cin_p, Cp), lambda n: (0, 0, 0)),
                      pl.BlockSpec((Rout, 1), lambda n: (0, 0))],
            out_specs=[pl.BlockSpec((None, Rout, Cp), lambda n: (n, 0, 0)),
                       pl.BlockSpec((None, 8, Cp), lambda n: (n, 0, 0))]),
        compiler_params=pltpu.CompilerParams(
            dimension_semantics=("parallel",),
            vmem_limit_bytes=vmem_limit),
    )(x_img, w_mat, mask)

    # ---- BatchNorm statistics (train mode, biased variance) ----------------
    tot = jnp.sum(stats, axis=0)                   # (8, Cp): row0=sum, row1=sumsq
    s1 = tot[0, :C_out]
    s2 = tot[1, :C_out]
    mean = s1 / M
    var = jnp.maximum(s2 / M - mean * mean, 0.0)
    scale = gamma.astype(jnp.float32) / jnp.sqrt(var + eps)
    shift = beta.astype(jnp.float32) - mean * scale
    # TODO(synk): PyTorch running_mean/running_var buffer updates are not emitted.

    # ---- epilogue: slice valid positions, fused BN affine, back to NCHW ----
    y = conv[:, :Rimg, :C_out].astype(jnp.float32).reshape(N, Hp, Wp, C_out)
    y = y[:, 0:(Hout - 1) * stride + 1:stride,
          0:(Wout - 1) * stride + 1:stride, :]
    y = y * scale.reshape(1, 1, 1, C_out) + shift.reshape(1, 1, 1, C_out)
    return jnp.transpose(y, (0, 3, 1, 2))


def reference(x, weight, gamma, beta, *, stride, padding, eps=1e-5):
    """Pure-JAX reference reproducing ReLU -> Conv2d -> BatchNorm2d (train mode)."""
    r = jnp.maximum(x, 0.0)
    c = jax.lax.conv_general_dilated(
        r, weight, window_strides=(stride, stride),
        padding=[(padding, padding), (padding, padding)],
        dimension_numbers=("NCHW", "OIHW", "NCHW"))
    mean = c.mean(axis=(0, 2, 3), keepdims=True)
    var = ((c - mean) ** 2).mean(axis=(0, 2, 3), keepdims=True)
    return ((c - mean) / jnp.sqrt(var + eps)) * gamma.reshape(1, -1, 1, 1) \
        + beta.reshape(1, -1, 1, 1)


if __name__ == "__main__":
    # ReLUConvBN(C_in=4, C_out=8, kernel_size=3, stride=1, padding=1)
    N, C_in, H, W = 2, 4, 16, 16
    C_out, k, stride, padding = 8, 3, 1, 1

    key = jax.random.PRNGKey(0)
    kx, kw = jax.random.split(key)
    x = jax.random.normal(kx, (N, C_in, H, W), dtype=jnp.float32)
    weight = 0.1 * jax.random.normal(kw, (C_out, C_in, k, k), dtype=jnp.float32)
    gamma = jnp.ones((C_out,), dtype=jnp.float32)   # BatchNorm2d affine init
    beta = jnp.zeros((C_out,), dtype=jnp.float32)

    y = relu_conv_bn(x, weight, gamma, beta, stride=stride, padding=padding)
    y = jax.block_until_ready(y)

    y_ref = reference(x, weight, gamma, beta, stride=stride, padding=padding)
    assert y.shape == (N, C_out, H, W), y.shape
    # f32 matmul; only the stored conv intermediate is bf16 -> loose tolerance
    assert jnp.allclose(y, y_ref, atol=3e-2, rtol=3e-2), \
        float(jnp.max(jnp.abs(y - y_ref)))

    print("KERNEL_OK")
</pallas_src>

<mosaic_0001>
module attributes {stable_mosaic.version = 11 : i64} {
  func.func @_relu_conv_stats_kernel(%arg0: i32, %arg1: memref<1x376x8xf32, #tpu.memory_space<vmem>>, %arg2: memref<9x8x128xf32, #tpu.memory_space<vmem>>, %arg3: memref<336x1xf32, #tpu.memory_space<vmem>>, %arg4: memref<1x336x128xbf16, #tpu.memory_space<vmem>>, %arg5: memref<1x8x128xf32, #tpu.memory_space<vmem>>) attributes {dimension_semantics = [#tpu.dimension_semantics<parallel>], iteration_bounds = array<i64: 2>, scalar_prefetch = 0 : i64, scratch_operands = 0 : i64, tpu.core_type = #tpu.core_type<tc>, window_params = [{transform_indices = @transform_0, window_bounds = array<i64: 1, 376, 8>}, {pipeline_mode = #tpu.pipeline_mode<synchronous>, transform_indices = @transform_1, window_bounds = array<i64: 9, 8, 128>}, {pipeline_mode = #tpu.pipeline_mode<synchronous>, transform_indices = @transform_2, window_bounds = array<i64: 336, 1>}, {transform_indices = @transform_3, window_bounds = array<i64: 1, 336, 128>}, {transform_indices = @transform_4, window_bounds = array<i64: 1, 8, 128>}]} {
    %cst = arith.constant 0.000000e+00 : f32
    %0 = vector.broadcast %cst : f32 to vector<336x128xf32>
    %c0 = arith.constant 0 : index
    %c0_0 = arith.constant 0 : index
    %c0_1 = arith.constant 0 : index
    %1 = vector.load %arg1[%c0, %c0_0, %c0_1] : memref<1x376x8xf32, #tpu.memory_space<vmem>>, vector<1x336x8xf32>
    %2 = vector.shape_cast %1 : vector<1x336x8xf32> to vector<336x8xf32>
    %cst_2 = arith.constant 0.000000e+00 : f32
    %3 = vector.broadcast %cst_2 : f32 to vector<336x8xf32>
    %4 = arith.maximumf %2, %3 : vector<336x8xf32>
    %c0_3 = arith.constant 0 : index
    %c0_4 = arith.constant 0 : index
    %c0_5 = arith.constant 0 : index
    %5 = vector.load %arg2[%c0_3, %c0_4, %c0_5] : memref<9x8x128xf32, #tpu.memory_space<vmem>>, vector<1x8x128xf32>
    %6 = vector.shape_cast %5 : vector<1x8x128xf32> to vector<8x128xf32>
    %cst_6 = arith.constant dense<0.000000e+00> : vector<336x128xf32>
    %7 = tpu.matmul %4, %6, %cst_6 {dimension_numbers = #tpu.dot_dimension_numbers<[1], [0], [0], [1], [0, 0, 1, 1], [], []>} : vector<336x8xf32>, vector<8x128xf32>, vector<336x128xf32> -> vector<336x128xf32>
    %8 = arith.addf %0, %7 : vector<336x128xf32>
    %c0_7 = arith.constant 0 : index
    %c1 = arith.constant 1 : index
    %c0_8 = arith.constant 0 : index
    %9 = vector.load %arg1[%c0_7, %c1, %c0_8] : memref<1x376x8xf32, #tpu.memory_space<vmem>>, vector<1x336x8xf32>
    %10 = vector.shape_cast %9 : vector<1x336x8xf32> to vector<336x8xf32>
    %cst_9 = arith.constant 0.000000e+00 : f32
    %11 = vector.broadcast %cst_9 : f32 to vector<336x8xf32>
    %12 = arith.maximumf %10, %11 : vector<336x8xf32>
    %c1_10 = arith.constant 1 : index
    %c0_11 = arith.constant 0 : index
    %c0_12 = arith.constant 0 : index
    %13 = vector.load %arg2[%c1_10, %c0_11, %c0_12] : memref<9x8x128xf32, #tpu.memory_space<vmem>>, vector<1x8x128xf32>
    %14 = vector.shape_cast %13 : vector<1x8x128xf32> to vector<8x128xf32>
    %cst_13 = arith.constant dense<0.000000e+00> : vector<336x128xf32>
    %15 = tpu.matmul %12, %14, %cst_13 {dimension_numbers = #tpu.dot_dimension_numbers<[1], [0], [0], [1], [0, 0, 1, 1], [], []>} : vector<336x8xf32>, vector<8x128xf32>, vector<336x128xf32> -> vector<336x128xf32>
    %16 = arith.addf %8, %15 : vector<336x128xf32>
    %c0_14 = arith.constant 0 : index
    %c2 = arith.constant 2 : index
    %c0_15 = arith.constant 0 : index
    %17 = vector.load %arg1[%c0_14, %c2, %c0_15] : memref<1x376x8xf32, #tpu.memory_space<vmem>>, vector<1x336x8xf32>
    %18 = vector.shape_cast %17 : vector<1x336x8xf32> to vector<336x8xf32>
    %cst_16 = arith.constant 0.000000e+00 : f32
    %19 = vector.broadcast %cst_16 : f32 to vector<336x8xf32>
    %20 = arith.maximumf %18, %19 : vector<336x8xf32>
    %c2_17 = arith.constant 2 : index
    %c0_18 = arith.constant 0 : index
    %c0_19 = arith.constant 0 : index
    %21 = vector.load %arg2[%c2_17, %c0_18, %c0_19] : memref<9x8x128xf32, #tpu.memory_space<vmem>>, vector<1x8x128xf32>
    %22 = vector.shape_cast %21 : vector<1x8x128xf32> to vector<8x128xf32>
    %cst_20 = arith.constant dense<0.000000e+00> : vector<336x128xf32>
    %23 = tpu.matmul %20, %22, %cst_20 {dimension_numbers = #tpu.dot_dimension_numbers<[1], [0], [0], [1], [0, 0, 1, 1], [], []>} : vector<336x8xf32>, vector<8x128xf32>, vector<336x128xf32> -> vector<336x128xf32>
    %24 = arith.addf %16, %23 : vector<336x128xf32>
    %c0_21 = arith.constant 0 : index
    %c18 = arith.constant 18 : index
    %c0_22 = arith.constant 0 : index
    %25 = vector.load %arg1[%c0_21, %c18, %c0_22] : memref<1x376x8xf32, #tpu.memory_space<vmem>>, vector<1x336x8xf32>
    %26 = vector.shape_cast %25 : vector<1x336x8xf32> to vector<336x8xf32>
    %cst_23 = arith.constant 0.000000e+00 : f32
    %27 = vector.broadcast %cst_23 : f32 to vector<336x8xf32>
    %28 = arith.maximumf %26, %27 : vector<336x8xf32>
    %c3 = arith.constant 3 : index
    %c0_24 = arith.constant 0 : index
    %c0_25 = arith.constant 0 : index
    %29 = vector.load %arg2[%c3, %c0_24, %c0_25] : memref<9x8x128xf32, #tpu.memory_space<vmem>>, vector<1x8x128xf32>
    %30 = vector.shape_cast %29 : vector<1x8x128xf32> to vector<8x128xf32>
    %cst_26 = arith.constant dense<0.000000e+00> : vector<336x128xf32>
    %31 = tpu.matmul %28, %30, %cst_26 {dimension_numbers = #tpu.dot_dimension_numbers<[1], [0], [0], [1], [0, 0, 1, 1], [], []>} : vector<336x8xf32>, vector<8x128xf32>, vector<336x128xf32> -> vector<336x128xf32>
    %32 = arith.addf %24, %31 : vector<336x128xf32>
    %c0_27 = arith.constant 0 : index
    %c19 = arith.constant 19 : index
    %c0_28 = arith.constant 0 : index
    %33 = vector.load %arg1[%c0_27, %c19, %c0_28] : memref<1x376x8xf32, #tpu.memory_space<vmem>>, vector<1x336x8xf32>
    %34 = vector.shape_cast %33 : vector<1x336x8xf32> to vector<336x8xf32>
    %cst_29 = arith.constant 0.000000e+00 : f32
    %35 = vector.broadcast %cst_29 : f32 to vector<336x8xf32>
    %36 = arith.maximumf %34, %35 : vector<336x8xf32>
    %c4 = arith.constant 4 : index
    %c0_30 = arith.constant 0 : index
    %c0_31 = arith.constant 0 : index
    %37 = vector.load %arg2[%c4, %c0_30, %c0_31] : memref<9x8x128xf32, #tpu.memory_space<vmem>>, vector<1x8x128xf32>
    %38 = vector.shape_cast %37 : vector<1x8x128xf32> to vector<8x128xf32>
    %cst_32 = arith.constant dense<0.000000e+00> : vector<336x128xf32>
    %39 = tpu.matmul %36, %38, %cst_32 {dimension_numbers = #tpu.dot_dimension_numbers<[1], [0], [0], [1], [0, 0, 1, 1], [], []>} : vector<336x8xf32>, vector<8x128xf32>, vector<336x128xf32> -> vector<336x128xf32>
    %40 = arith.addf %32, %39 : vector<336x128xf32>
    %c0_33 = arith.constant 0 : index
    %c20 = arith.constant 20 : index
    %c0_34 = arith.constant 0 : index
    %41 = vector.load %arg1[%c0_33, %c20, %c0_34] : memref<1x376x8xf32, #tpu.memory_space<vmem>>, vector<1x336x8xf32>
    %42 = vector.shape_cast %41 : vector<1x336x8xf32> to vector<336x8xf32>
    %cst_35 = arith.constant 0.000000e+00 : f32
    %43 = vector.broadcast %cst_35 : f32 to vector<336x8xf32>
    %44 = arith.maximumf %42, %43 : vector<336x8xf32>
    %c5 = arith.constant 5 : index
    %c0_36 = arith.constant 0 : index
    %c0_37 = arith.constant 0 : index
    %45 = vector.load %arg2[%c5, %c0_36, %c0_37] : memref<9x8x128xf32, #tpu.memory_space<vmem>>, vector<1x8x128xf32>
    %46 = vector.shape_cast %45 : vector<1x8x128xf32> to vector<8x128xf32>
    %cst_38 = arith.constant dense<0.000000e+00> : vector<336x128xf32>
    %47 = tpu.matmul %44, %46, %cst_38 {dimension_numbers = #tpu.dot_dimension_numbers<[1], [0], [0], [1], [0, 0, 1, 1], [], []>} : vector<336x8xf32>, vector<8x128xf32>, vector<336x128xf32> -> vector<336x128xf32>
    %48 = arith.addf %40, %47 : vector<336x128xf32>
    %c0_39 = arith.constant 0 : index
    %c36 = arith.constant 36 : index
    %c0_40 = arith.constant 0 : index
    %49 = vector.load %arg1[%c0_39, %c36, %c0_40] : memref<1x376x8xf32, #tpu.memory_space<vmem>>, vector<1x336x8xf32>
    %50 = vector.shape_cast %49 : vector<1x336x8xf32> to vector<336x8xf32>
    %cst_41 = arith.constant 0.000000e+00 : f32
    %51 = vector.broadcast %cst_41 : f32 to vector<336x8xf32>
    %52 = arith.maximumf %50, %51 : vector<336x8xf32>
    %c6 = arith.constant 6 : index
    %c0_42 = arith.constant 0 : index
    %c0_43 = arith.constant 0 : index
    %53 = vector.load %arg2[%c6, %c0_42, %c0_43] : memref<9x8x128xf32, #tpu.memory_space<vmem>>, vector<1x8x128xf32>
    %54 = vector.shape_cast %53 : vector<1x8x128xf32> to vector<8x128xf32>
    %cst_44 = arith.constant dense<0.000000e+00> : vector<336x128xf32>
    %55 = tpu.matmul %52, %54, %cst_44 {dimension_numbers = #tpu.dot_dimension_numbers<[1], [0], [0], [1], [0, 0, 1, 1], [], []>} : vector<336x8xf32>, vector<8x128xf32>, vector<336x128xf32> -> vector<336x128xf32>
    %56 = arith.addf %48, %55 : vector<336x128xf32>
    %c0_45 = arith.constant 0 : index
    %c37 = arith.constant 37 : index
    %c0_46 = arith.constant 0 : index
    %57 = vector.load %arg1[%c0_45, %c37, %c0_46] : memref<1x376x8xf32, #tpu.memory_space<vmem>>, vector<1x336x8xf32>
    %58 = vector.shape_cast %57 : vector<1x336x8xf32> to vector<336x8xf32>
    %cst_47 = arith.constant 0.000000e+00 : f32
    %59 = vector.broadcast %cst_47 : f32 to vector<336x8xf32>
    %60 = arith.maximumf %58, %59 : vector<336x8xf32>
    %c7 = arith.constant 7 : index
    %c0_48 = arith.constant 0 : index
    %c0_49 = arith.constant 0 : index
    %61 = vector.load %arg2[%c7, %c0_48, %c0_49] : memref<9x8x128xf32, #tpu.memory_space<vmem>>, vector<1x8x128xf32>
    %62 = vector.shape_cast %61 : vector<1x8x128xf32> to vector<8x128xf32>
    %cst_50 = arith.constant dense<0.000000e+00> : vector<336x128xf32>
    %63 = tpu.matmul %60, %62, %cst_50 {dimension_numbers = #tpu.dot_dimension_numbers<[1], [0], [0], [1], [0, 0, 1, 1], [], []>} : vector<336x8xf32>, vector<8x128xf32>, vector<336x128xf32> -> vector<336x128xf32>
    %64 = arith.addf %56, %63 : vector<336x128xf32>
    %c0_51 = arith.constant 0 : index
    %c38 = arith.constant 38 : index
    %c0_52 = arith.constant 0 : index
    %65 = vector.load %arg1[%c0_51, %c38, %c0_52] : memref<1x376x8xf32, #tpu.memory_space<vmem>>, vector<1x336x8xf32>
    %66 = vector.shape_cast %65 : vector<1x336x8xf32> to vector<336x8xf32>
    %cst_53 = arith.constant 0.000000e+00 : f32
    %67 = vector.broadcast %cst_53 : f32 to vector<336x8xf32>
    %68 = arith.maximumf %66, %67 : vector<336x8xf32>
    %c8 = arith.constant 8 : index
    %c0_54 = arith.constant 0 : index
    %c0_55 = arith.constant 0 : index
    %69 = vector.load %arg2[%c8, %c0_54, %c0_55] : memref<9x8x128xf32, #tpu.memory_space<vmem>>, vector<1x8x128xf32>
    %70 = vector.shape_cast %69 : vector<1x8x128xf32> to vector<8x128xf32>
    %cst_56 = arith.constant dense<0.000000e+00> : vector<336x128xf32>
    %71 = tpu.matmul %68, %70, %cst_56 {dimension_numbers = #tpu.dot_dimension_numbers<[1], [0], [0], [1], [0, 0, 1, 1], [], []>} : vector<336x8xf32>, vector<8x128xf32>, vector<336x128xf32> -> vector<336x128xf32>
    %72 = arith.addf %64, %71 : vector<336x128xf32>
    %73 = arith.truncf %72 : vector<336x128xf32> to vector<336x128xbf16>
    %c0_57 = arith.constant 0 : index
    %c0_58 = arith.constant 0 : index
    %c0_59 = arith.constant 0 : index
    %74 = vector.load %arg4[%c0_57, %c0_58, %c0_59] : memref<1x336x128xbf16, #tpu.memory_space<vmem>>, vector<1x336x128xbf16>
    %75 = vector.shape_cast %74 : vector<1x336x128xbf16> to vector<336x128xbf16>
    %76 = vector.shape_cast %73 : vector<336x128xbf16> to vector<1x336x128xbf16>
    tpu.vector_store %arg4[%c0_57, %c0_58, %c0_59], %76 {strides = array<i32>} : memref<1x336x128xbf16, #tpu.memory_space<vmem>>, vector<1x336x128xbf16>,
    %c0_60 = arith.constant 0 : index
    %c0_61 = arith.constant 0 : index
    %77 = vector.load %arg3[%c0_60, %c0_61] : memref<336x1xf32, #tpu.memory_space<vmem>>, vector<336x1xf32>
    %78 = vector.broadcast %77 : vector<336x1xf32> to vector<336x128xf32>
    %79 = arith.mulf %72, %78 : vector<336x128xf32>
    %cst_62 = arith.constant dense<0.000000e+00> : vector<128xf32>
    %80 = vector.multi_reduction <add>, %79, %cst_62 [0] : vector<336x128xf32> to vector<128xf32>
    %81 = vector.shape_cast %80 : vector<128xf32> to vector<1x128xf32>
    %82 = arith.mulf %79, %72 : vector<336x128xf32>
    %cst_63 = arith.constant dense<0.000000e+00> : vector<128xf32>
    %83 = vector.multi_reduction <add>, %82, %cst_63 [0] : vector<336x128xf32> to vector<128xf32>
    %84 = vector.shape_cast %83 : vector<128xf32> to vector<1x128xf32>
    %85 = tpu.iota {dimensions = array<i32: 0>} : vector<8x128xi32>
    %c0_i32 = arith.constant 0 : i32
    %86 = vector.broadcast %c0_i32 : i32 to vector<8x128xi32>
    %87 = arith.cmpi eq, %85, %86 : vector<8x128xi32>
    %c1_i32 = arith.constant 1 : i32
    %88 = vector.broadcast %c1_i32 : i32 to vector<8x128xi32>
    %89 = arith.cmpi eq, %85, %88 : vector<8x128xi32>
    %cst_64 = arith.constant 0.000000e+00 : f32
    %90 = vector.shape_cast %84 : vector<1x128xf32> to vector<1x128xf32>
    %91 = vector.broadcast %90 : vector<1x128xf32> to vector<8x128xf32>
    %92 = vector.broadcast %cst_64 : f32 to vector<8x128xf32>
    %93 = arith.select %89, %91, %92 : vector<8x128xi1>, vector<8x128xf32>
    %94 = vector.shape_cast %81 : vector<1x128xf32> to vector<1x128xf32>
    %95 = vector.broadcast %94 : vector<1x128xf32> to vector<8x128xf32>
    %96 = arith.select %87, %95, %93 : vector<8x128xi1>, vector<8x128xf32>
    %c0_65 = arith.constant 0 : index
    %c0_66 = arith.constant 0 : index
    %c0_67 = arith.constant 0 : index
    %97 = vector.load %arg5[%c0_65, %c0_66, %c0_67] : memref<1x8x128xf32, #tpu.memory_space<vmem>>, vector<1x8x128xf32>
    %98 = vector.shape_cast %97 : vector<1x8x128xf32> to vector<8x128xf32>
    %99 = vector.shape_cast %96 : vector<8x128xf32> to vector<1x8x128xf32>
    tpu.vector_store %arg5[%c0_65, %c0_66, %c0_67], %99 {strides = array<i32>} : memref<1x8x128xf32, #tpu.memory_space<vmem>>, vector<1x8x128xf32>,
    return
  }
  func.func @transform_0(%arg0: i32) -> (i32, i32, i32) {
    %c0_i32 = arith.constant 0 : i32
    %c0_i32_0 = arith.constant 0 : i32
    %c0_i32_1 = arith.constant 0 : i32
    return %arg0, %c0_i32, %c0_i32_0 : i32, i32, i32
  }
  func.func @transform_1(%arg0: i32) -> (i32, i32, i32) {
    %c0_i32 = arith.constant 0 : i32
    %c0_i32_0 = arith.constant 0 : i32
    %c0_i32_1 = arith.constant 0 : i32
    %c0_i32_2 = arith.constant 0 : i32
    return %c0_i32, %c0_i32_0, %c0_i32_1 : i32, i32, i32
  }
  func.func @transform_2(%arg0: i32) -> (i32, i32) {
    %c0_i32 = arith.constant 0 : i32
    %c0_i32_0 = arith.constant 0 : i32
    %c0_i32_1 = arith.constant 0 : i32
    return %c0_i32, %c0_i32_0 : i32, i32
  }
  func.func @transform_3(%arg0: i32) -> (i32, i32, i32) {
    %c0_i32 = arith.constant 0 : i32
    %c0_i32_0 = arith.constant 0 : i32
    %c0_i32_1 = arith.constant 0 : i32
    return %arg0, %c0_i32, %c0_i32_0 : i32, i32, i32
  }
  func.func @transform_4(%arg0: i32) -> (i32, i32, i32) {
    %c0_i32 = arith.constant 0 : i32
    %c0_i32_0 = arith.constant 0 : i32
    %c0_i32_1 = arith.constant 0 : i32
    return %arg0, %c0_i32, %c0_i32_0 : i32, i32, i32
  }
}

</mosaic_0001>

<bundles_post_ra>
// kernel: relu_conv_bn.1
= control target key start
LH: loop header
LB: loop body
LE: loop exit
PB: predicated region body
PF: predicated region fallthrough
CT: control target
= control target key end

     0   :  { %s7245_s15 = smov 0   ;;  %s9022_s0 = inlined_call_operand.vmem [shape: f32[2,376,8], index: 0, kind: input, shape index: {}]   ;;  %s9023_s1 = inlined_call_operand.vmem [shape: f32[9,8,128], index: 1, kind: input, shape index: {}]   ;;  %s9024_s2 = inlined_call_operand.vmem [shape: f32[336,1], index: 2, kind: input, shape index: {}]   ;;  %s9025_s3 = inlined_call_operand.vmem [shape: bf16[2,336,128], index: 3, kind: output, shape index: {0}]   ;;  %s9026_s4 = inlined_call_operand.vmem [shape: f32[2,8,128], index: 4, kind: output, shape index: {1}]  }
   0x1 LB: > { %s5619_s16 = sadd.s32 4294967295, %s7217_s15   ;;  %p5623_p0 = scmp.ge.s32.totalorder %s7217_s15, 1  ;;  %s7217_s15 = sphi %s7245_s15, %s15_s15  }
   0x2   : > { %p165_p1 = scmp.lt.s32.totalorder %s7217_s15, 3 }
   0x4   : > { %p166_p2 = pnand %p5623_p0, %p165_p1 }
   0x6   : > { %169 = sbr.rel (%p166_p2) target bundleno = 617 (0x269), region = 32 }
   0xb   : > { %v5627_v0 = vld [vmem:[%s9023_s1 + $0x8] sm:$0xff]  ;;  %p195_p3 = scmp.lt.s32.totalorder %s5619_s16, 1  ;;  %v5712_v1 = vld [vmem:[%s9023_s1 + $0x10] sm:$0xff]  ;;  %v293_v2 = vld [vmem:[%s9023_s1] sm:$0xff]  ;;  %vm380_vm0 = vcmask 64512  }
   0xc   : > { %6611 = vmatprep.subr.mxu0 %v5627_v0  ;;  %7196 = vmatprep.subr.mxu1 %v5627_v0  ;;  %v7287_v21 = vld [vmem:[%s9023_s1 + $0x18] sm:$0xff]  ;;  %v7292_v22 = vld [vmem:[%s9023_s1 + $0x20] sm:$0xff] }
   0xd   : > { %6612 = vmatpush3.msra.mxu0 %v5627_v0  ;;  %7197 = vmatpush3.msra.mxu1 %v5627_v0  ;;  %s9100_s16 = smov (!%p195_p3, %s5619_s16), 1 }
   0xe   : > { %6741 = vmatprep.subr.mxu0 %v5712_v1  ;;  %6676 = vmatprep.subr.mxu1 %v293_v2  ;;  %s7198_s23 = smul.u32 376, %s9100_s16  ;;  %s5626_s8 = sshll.u32 %s9100_s16, 3 }
   0xf   : > { %s208_s11 = scalar_lea.vmem %s9026_s4, %s5626_s8 }
  0x10   : > { %s7268_s26 = scalar_lea.vmem %s9022_s0, %s7198_s23 }
  0x11   : > { %v294_v3 = vld [vmem:[%s7268_s26 + $0x1] sm:$0xff]  ;;  %v316_v4 = vld [vmem:[%s7268_s26 + $0xb1] sm:$0xff]  ;;  %v295_v5 = vld [vmem:[%s7268_s26 + $0x9] sm:$0xff] }
  0x12   : > { %v336_v6 = vmax.f32 %v294_v3, 0.0  ;;  %v358_v7 = vmax.f32 %v316_v4, 0.0  ;;  %v337_v8 = vmax.f32 %v295_v5, 0.0  ;;  %v317_v9 = vld [vmem:[%s7268_s26 + $0xb9] sm:$0xff]  ;;  %v296_v10 = vld [vmem:[%s7268_s26 + $0x11] sm:$0xff]  ;;  %v318_v11 = vld [vmem:[%s7268_s26 + $0xc1] sm:$0xff] }
  0x13   : > { %v359_v12 = vmax.f32 %v317_v9, 0.0  ;;  %v338_v13 = vmax.f32 %v296_v10, 0.0  ;;  %v360_v14 = vmax.f32 %v318_v11, 0.0  ;;  %v297_v15 = vld [vmem:[%s7268_s26 + $0x19] sm:$0xff]  ;;  %v319_v16 = vld [vmem:[%s7268_s26 + $0xc9] sm:$0xff]  ;;  %v298_v17 = vld [vmem:[%s7268_s26 + $0x21] sm:$0xff] }
  0x14   : > { %6613 = vmatprep.mubr.msk.f32.mxu0 %vm380_vm0, %v336_v6  ;;  %6646 = vmatprep.mubr.msk.f32.mxu1 %vm380_vm0, %v358_v7  ;;  %v320_v18 = vld [vmem:[%s7268_s26 + $0xd1] sm:$0xff]  ;;  %v339_v19 = vmax.f32 %v297_v15, 0.0  ;;  %v361_v20 = vmax.f32 %v319_v16, 0.0  ;;  %v340_v23 = vmax.f32 %v298_v17, 0.0  ;;  %v299_v25 = vld [vmem:[%s7268_s26 + $0x29] sm:$0xff]  ;;  %v321_v26 = vld [vmem:[%s7268_s26 + $0xd9] sm:$0xff] }
  0x15   : > { %6614 = vmatmul.mubr.msk.f32.vlgmr.msra.gmra.mxu0 %vm380_vm0, %v337_v8  ;;  %6647 = vmatmul.mubr.msk.f32.vlgmr.msra.gmra.mxu1 %vm380_vm0, %v359_v12  ;;  %v362_v24 = vmax.f32 %v320_v18, 0.0  ;;  %v300_v27 = vld [vmem:[%s7268_s26 + $0x31] sm:$0xff]  ;;  %v322_v28 = vld [vmem:[%s7268_s26 + $0xe1] sm:$0xff]  ;;  %v341_v29 = vmax.f32 %v299_v25, 0.0  ;;  %v363_v30 = vmax.f32 %v321_v26, 0.0  ;;  %v301_v33 = vld [vmem:[%s7268_s26 + $0x39] sm:$0xff] }
  0x16   : > { %6742 = vmatpush3.msra.mxu0 %v5712_v1  ;;  %6677 = vmatpush3.msra.mxu1 %v293_v2  ;;  %v342_v31 = vmax.f32 %v300_v27, 0.0  ;;  %v364_v32 = vmax.f32 %v322_v28, 0.0  ;;  %v323_v34 = vld [vmem:[%s7268_s26 + $0xe9] sm:$0xff]  ;;  %v302_v35 = vld [vmem:[%s7268_s26 + $0x41] sm:$0xff]  ;;  %v324_v36 = vld [vmem:[%s7268_s26 + $0xf1] sm:$0xff]  ;;  %v343_v37 = vmax.f32 %v301_v33, 0.0 }
  0x17   : > { %6616 = vmatprep.mubr.msk.f32.mxu0 %vm380_vm0, %v338_v13  ;;  %6649 = vmatprep.mubr.msk.f32.mxu1 %vm380_vm0, %v360_v14  ;;  %v365_v38 = vmax.f32 %v323_v34, 0.0  ;;  %v344_v39 = vmax.f32 %v302_v35, 0.0  ;;  %v366_v40 = vmax.f32 %v324_v36, 0.0  ;;  %v303_v41 = vld [vmem:[%s7268_s26 + $0x49] sm:$0xff]  ;;  %v325_v42 = vld [vmem:[%s7268_s26 + $0xf9] sm:$0xff]  ;;  %v304_v43 = vld [vmem:[%s7268_s26 + $0x51] sm:$0xff] }
  0x18   : > { %6806 = vmatprep.subr.mxu1 %v7287_v21  ;;  %6871 = vmatprep.subr.mxu0 %v7292_v22  ;;  %v326_v44 = vld [vmem:[%s7268_s26 + $0x101] sm:$0xff]  ;;  %v345_v45 = vmax.f32 %v303_v41, 0.0  ;;  %v367_v46 = vmax.f32 %v325_v42, 0.0  ;;  %v346_v47 = vmax.f32 %v304_v43, 0.0  ;;  %v305_v49 = vld [vmem:[%s7268_s26 + $0x59] sm:$0xff]  ;;  %v327_v50 = vld [vmem:[%s7268_s26 + $0x109] sm:$0xff] }
  0x19   : > { %6617 = vmatmul.mubr.msk.f32.gmra.mxu0 %vm380_vm0, %v339_v19  ;;  %6650 = vmatmul.mubr.msk.f32.gmra.mxu1 %vm380_vm0, %v361_v20  ;;  %v368_v48 = vmax.f32 %v326_v44, 0.0  ;;  %v306_v51 = vld [vmem:[%s7268_s26 + $0x61] sm:$0xff]  ;;  %v328_v52 = vld [vmem:[%s7268_s26 + $0x111] sm:$0xff]  ;;  %v347_v53 = vmax.f32 %v305_v49, 0.0  ;;  %v369_v54 = vmax.f32 %v327_v50, 0.0  ;;  %v307_v57 = vld [vmem:[%s7268_s26 + $0x69] sm:$0xff] }
  0x1a   : > { %6619 = vmatprep.mubr.msk.f32.mxu0 %vm380_vm0, %v340_v23  ;;  %6652 = vmatprep.mubr.msk.f32.mxu1 %vm380_vm0, %v362_v24  ;;  %v348_v55 = vmax.f32 %v306_v51, 0.0  ;;  %v370_v56 = vmax.f32 %v328_v52, 0.0  ;;  %v329_v58 = vld [vmem:[%s7268_s26 + $0x119] sm:$0xff]  ;;  %v308_v59 = vld [vmem:[%s7268_s26 + $0x71] sm:$0xff]  ;;  %v330_v60 = vld [vmem:[%s7268_s26 + $0x121] sm:$0xff]  ;;  %v349_v61 = vmax.f32 %v307_v57, 0.0 }
  0x1b   : > { %v371_v62 = vmax.f32 %v329_v58, 0.0  ;;  %v350_v63 = vmax.f32 %v308_v59, 0.0  ;;  %v372_v0 = vmax.f32 %v330_v60, 0.0  ;;  %v309_v1 = vld [vmem:[%s7268_s26 + $0x79] sm:$0xff]  ;;  %v331_v2 = vld [vmem:[%s7268_s26 + $0x129] sm:$0xff]  ;;  %v310_v3 = vld [vmem:[%s7268_s26 + $0x81] sm:$0xff] }
  0x1c   : > { %v332_v4 = vld [vmem:[%s7268_s26 + $0x131] sm:$0xff]  ;;  %v351_v5 = vmax.f32 %v309_v1, 0.0  ;;  %v373_v6 = vmax.f32 %v331_v2, 0.0  ;;  %v352_v7 = vmax.f32 %v310_v3, 0.0  ;;  %v311_v9 = vld [vmem:[%s7268_s26 + $0x89] sm:$0xff]  ;;  %v333_v10 = vld [vmem:[%s7268_s26 + $0x139] sm:$0xff] }
  0x1d   : > { %6620 = vmatmul.mubr.msk.f32.gmra.mxu0 %vm380_vm0, %v341_v29  ;;  %6653 = vmatmul.mubr.msk.f32.gmra.mxu1 %vm380_vm0, %v363_v30  ;;  %v374_v8 = vmax.f32 %v332_v4, 0.0  ;;  %v312_v11 = vld [vmem:[%s7268_s26 + $0x91] sm:$0xff]  ;;  %v334_v12 = vld [vmem:[%s7268_s26 + $0x141] sm:$0xff]  ;;  %v353_v13 = vmax.f32 %v311_v9, 0.0  ;;  %v375_v14 = vmax.f32 %v333_v10, 0.0  ;;  %v313_v17 = vld [vmem:[%s7268_s26 + $0x99] sm:$0xff] }
  0x1e   : > { %6622 = vmatprep.mubr.msk.f32.mxu0 %vm380_vm0, %v342_v31  ;;  %6655 = vmatprep.mubr.msk.f32.mxu1 %vm380_vm0, %v364_v32  ;;  %v354_v15 = vmax.f32 %v312_v11, 0.0  ;;  %v376_v16 = vmax.f32 %v334_v12, 0.0  ;;  %v335_v18 = vld [vmem:[%s7268_s26 + $0x149] sm:$0xff]  ;;  %v314_v19 = vld [vmem:[%s7268_s26 + $0xa1] sm:$0xff]  ;;  %v355_v23 = vmax.f32 %v313_v17, 0.0  ;;  %v212_v34 = vld [vmem:[%s7268_s26 + $0x18] sm:$0xff] }
  0x1f   : > { %v209_v20 = vld [vmem:[%s7268_s26] sm:$0xff]  ;;  %v377_v24 = vmax.f32 %v335_v18, 0.0  ;;  %v356_v25 = vmax.f32 %v314_v19, 0.0  ;;  %v315_v27 = vld [vmem:[%s7268_s26 + $0xa9] sm:$0xff]  ;;  %v216_v52 = vld [vmem:[%s7268_s26 + $0x38] sm:$0xff] }
  0x20   : > { %v251_v26 = vmax.f32 %v209_v20, 0.0  ;;  %v210_v28 = vld [vmem:[%s7268_s26 + $0x8] sm:$0xff]  ;;  %v211_v29 = vld [vmem:[%s7268_s26 + $0x10] sm:$0xff]  ;;  %v357_v31 = vmax.f32 %v315_v27, 0.0  ;;  %v7387_v44 = vld [vmem:[%s7268_s26 + $0x1a] sm:$0xff] }
  0x21   : > { %6623 = vmatmul.mubr.msk.f32.gmra.mxu0 %vm380_vm0, %v343_v37  ;;  %6656 = vmatmul.mubr.msk.f32.gmra.mxu1 %vm380_vm0, %v365_v38  ;;  %v1183_v30 = vld [vmem:[%s7268_s26 + $0x2] sm:$0xff]  ;;  %v252_v32 = vmax.f32 %v210_v28, 0.0  ;;  %v253_v33 = vmax.f32 %v211_v29, 0.0  ;;  %v1184_v35 = vld [vmem:[%s7268_s26 + $0xa] sm:$0xff]  ;;  %v7374_v38 = vld [vmem:[%s7268_s26 + $0x12] sm:$0xff]  ;;  %v1228_v49 = vmax.f32 %v7387_v44, 0.0 }
  0x22   : > { %6625 = vmatprep.mubr.msk.f32.mxu0 %vm380_vm0, %v344_v39  ;;  %6658 = vmatprep.mubr.msk.f32.mxu1 %vm380_vm0, %v366_v40  ;;  %v1225_v36 = vmax.f32 %v1183_v30, 0.0  ;;  %v213_v37 = vld [vmem:[%s7268_s26 + $0x20] sm:$0xff]  ;;  %v7379_v39 = vld [vmem:[%s9023_s1 + $0x28] sm:$0xff]  ;;  %v254_v40 = vmax.f32 %v212_v34, 0.0  ;;  %v1226_v41 = vmax.f32 %v1184_v35, 0.0  ;;  %v220_v3 = vld [vmem:[%s7268_s26 + $0x58] sm:$0xff] }
  0x23   : > { %v255_v42 = vmax.f32 %v213_v37, 0.0  ;;  %v214_v43 = vld [vmem:[%s7268_s26 + $0x28] sm:$0xff]  ;;  %v7431_v60 = vld [vmem:[%s7268_s26 + $0x3a] sm:$0xff] }
  0x24   : > { %v218_v59 = vld [vmem:[%s7268_s26 + $0x48] sm:$0xff]  ;;  %v7467_v12 = vld [vmem:[%s7268_s26 + $0x5a] sm:$0xff] }
  0x25   : > { %6626 = vmatmul.mubr.msk.f32.gmra.mxu0 %vm380_vm0, %v345_v45  ;;  %6659 = vmatmul.mubr.msk.f32.gmra.mxu1 %vm380_vm0, %v367_v46  ;;  %v1227_v45 = vmax.f32 %v7374_v38, 0.0  ;;  %v215_v46 = vld [vmem:[%s7268_s26 + $0x30] sm:$0xff]  ;;  %v222_v11 = vld [vmem:[%s7268_s26 + $0x68] sm:$0xff]  ;;  %v224_v19 = vld [vmem:[%s7268_s26 + $0x78] sm:$0xff] }
  0x26   : > { %6628 = vmatprep.mubr.msk.f32.mxu0 %vm380_vm0, %v346_v47  ;;  %6661 = vmatprep.mubr.msk.f32.mxu1 %vm380_vm0, %v368_v48  ;;  %v7393_v47 = vld [vmem:[%s7268_s26 + $0x22] sm:$0xff]  ;;  %v256_v48 = vmax.f32 %v214_v43, 0.0  ;;  %v257_v50 = vmax.f32 %v215_v46, 0.0  ;;  %v7449_v4 = vld [vmem:[%s7268_s26 + $0x4a] sm:$0xff]  ;;  %v7503_v30 = vld [vmem:[%s7268_s26 + $0x7a] sm:$0xff] }
  0x27   : > { %v1229_v51 = vmax.f32 %v7393_v47, 0.0  ;;  %v7485_v20 = vld [vmem:[%s7268_s26 + $0x6a] sm:$0xff]  ;;  %v9046_v34 = vmax.f32 %v7503_v30, 0.0  ;;  %v228_v37 = vld [vmem:[%s7268_s26 + $0x98] sm:$0xff]  ;;  %v7773_v44 = vld [vmem:[%s9023_s1 + $0x40] sm:$0xff] }
  0x28   : > { %v226_v29 = vld [vmem:[%s7268_s26 + $0x88] sm:$0xff]  ;;  %v270_v43 = vmax.f32 %v228_v37, 0.0  ;;  %v236_v37 = vld [vmem:[%s7268_s26 + $0xd8] sm:$0xff] }
  0x29   : > { %6629 = vmatmul.mubr.msk.f32.gmra.mxu0 %vm380_vm0, %v347_v53  ;;  %6662 = vmatmul.mubr.msk.f32.gmra.mxu1 %vm380_vm0, %v369_v54  ;;  %v7409_v53 = vld [vmem:[%s7268_s26 + $0x2a] sm:$0xff]  ;;  %v217_v54 = vld [vmem:[%s7268_s26 + $0x40] sm:$0xff] }
  0x2a   : > { %6631 = vmatprep.mubr.msk.f32.mxu0 %vm380_vm0, %v348_v55  ;;  %6664 = vmatprep.mubr.msk.f32.mxu1 %vm380_vm0, %v370_v56  ;;  %v7416_v55 = vld [vmem:[%s7268_s26 + $0x32] sm:$0xff]  ;;  %v1230_v56 = vmax.f32 %v7409_v53, 0.0  ;;  %v259_v57 = vmax.f32 %v217_v54, 0.0  ;;  %v7539_v54 = vld [vmem:[%s7268_s26 + $0x9a] sm:$0xff] }
  0x2b   : > { %v1231_v58 = vmax.f32 %v7416_v55, 0.0  ;;  %v2248_v55 = vld [vmem:[%s7268_s26 + $0x4b] sm:$0xff] }
  0x2d   : > { %6632 = vmatmul.mubr.msk.f32.gmra.mxu0 %vm380_vm0, %v349_v61  ;;  %6665 = vmatmul.mubr.msk.f32.gmra.mxu1 %vm380_vm0, %v371_v62  ;;  %v219_v61 = vld [vmem:[%s7268_s26 + $0x50] sm:$0xff]  ;;  %v7435_v62 = vld [vmem:[%s7268_s26 + $0x42] sm:$0xff] }
  0x2e   : > { %6634 = vmatprep.mubr.msk.f32.mxu0 %vm380_vm0, %v350_v63  ;;  %6667 = vmatprep.mubr.msk.f32.mxu1 %vm380_vm0, %v372_v0  ;;  %v260_v63 = vmax.f32 %v218_v59, 0.0  ;;  %v1232_v0 = vmax.f32 %v7431_v60, 0.0  ;;  %v261_v1 = vmax.f32 %v219_v61, 0.0  ;;  %v1233_v2 = vmax.f32 %v7435_v62, 0.0  ;;  %v2250_v62 = vld [vmem:[%s7268_s26 + $0x5b] sm:$0xff] }
  0x2f   : > { %v9040_v61 = vmax.f32 %v7539_v54, 0.0 }
  0x31   : > { %6635 = vmatmul.mubr.msk.f32.gmra.mxu0 %vm380_vm0, %v351_v5  ;;  %6668 = vmatmul.mubr.msk.f32.gmra.mxu1 %vm380_vm0, %v373_v6  ;;  %v221_v5 = vld [vmem:[%s7268_s26 + $0x60] sm:$0xff]  ;;  %v7453_v6 = vld [vmem:[%s7268_s26 + $0x52] sm:$0xff] }
  0x32   : > { %6637 = vmatprep.mubr.msk.f32.mxu0 %vm380_vm0, %v352_v7  ;;  %6670 = vmatprep.mubr.msk.f32.mxu1 %vm380_vm0, %v374_v8  ;;  %v262_v7 = vmax.f32 %v220_v3, 0.0  ;;  %v1234_v8 = vmax.f32 %v7449_v4, 0.0  ;;  %v263_v9 = vmax.f32 %v221_v5, 0.0  ;;  %v1235_v10 = vmax.f32 %v7453_v6, 0.0  ;;  %v232_v3 = vld [vmem:[%s7268_s26 + $0xb8] sm:$0xff]  ;;  %v7557_v5 = vld [vmem:[%s7268_s26 + $0xaa] sm:$0xff] }
  0x33   : > { %v2252_v6 = vld [vmem:[%s7268_s26 + $0x6b] sm:$0xff] }
  0x35   : > { %6638 = vmatmul.mubr.msk.f32.gmra.mxu0 %vm380_vm0, %v353_v13  ;;  %6671 = vmatmul.mubr.msk.f32.gmra.mxu1 %vm380_vm0, %v375_v14  ;;  %v223_v13 = vld [vmem:[%s7268_s26 + $0x70] sm:$0xff]  ;;  %v7471_v14 = vld [vmem:[%s7268_s26 + $0x62] sm:$0xff] }
  0x36   : > { %6640 = vmatprep.mubr.msk.f32.mxu0 %vm380_vm0, %v354_v15  ;;  %6673 = vmatprep.mubr.msk.f32.mxu1 %vm380_vm0, %v376_v16  ;;  %v264_v15 = vmax.f32 %v222_v11, 0.0  ;;  %v1236_v16 = vmax.f32 %v7467_v12, 0.0  ;;  %v265_v17 = vmax.f32 %v223_v13, 0.0  ;;  %v1237_v18 = vmax.f32 %v7471_v14, 0.0  ;;  %v2254_v14 = vld [vmem:[%s7268_s26 + $0x7b] sm:$0xff] }
  0x37   : > { %v274_v11 = vmax.f32 %v232_v3, 0.0  ;;  %v9036_v13 = vmax.f32 %v7557_v5, 0.0  ;;  %v238_v3 = vld [vmem:[%s7268_s26 + $0xe8] sm:$0xff] }
  0x39   : > { %6641 = vmatmul.mubr.msk.f32.gmra.mxu0 %vm380_vm0, %v355_v23  ;;  %6674 = vmatmul.mubr.msk.f32.gmra.mxu1 %vm380_vm0, %v377_v24  ;;  %v225_v23 = vld [vmem:[%s7268_s26 + $0x80] sm:$0xff]  ;;  %v7489_v24 = vld [vmem:[%s7268_s26 + $0x72] sm:$0xff] }
  0x3a   : > { %6643 = vmatprep.mubr.msk.f32.mxu0 %vm380_vm0, %v356_v25  ;;  %6678 = vmatprep.mubr.msk.f32.mxu1 %vm380_vm0, %v251_v26  ;;  %v266_v25 = vmax.f32 %v224_v19, 0.0  ;;  %v1238_v26 = vmax.f32 %v7485_v20, 0.0  ;;  %v267_v27 = vmax.f32 %v225_v23, 0.0  ;;  %v1239_v28 = vmax.f32 %v7489_v24, 0.0  ;;  %v234_v19 = vld [vmem:[%s7268_s26 + $0xc8] sm:$0xff]  ;;  %v7575_v23 = vld [vmem:[%s7268_s26 + $0xba] sm:$0xff] }
  0x3b   : > { %v2296_v20 = vmax.f32 %v2254_v14, 0.0  ;;  %v2266_v14 = vld [vmem:[%s7268_s26 + $0xdb] sm:$0xff] }
  0x3d   : > { %6644 = vmatmul.mubr.msk.f32.gmra.mxu0 %vm380_vm0, %v357_v31  ;;  %6679 = vmatmul.mubr.msk.f32.vlgmr.msra.gmra.mxu1 %vm380_vm0, %v252_v32  ;;  %v227_v31 = vld [vmem:[%s7268_s26 + $0x90] sm:$0xff]  ;;  %v7507_v32 = vld [vmem:[%s7268_s26 + $0x82] sm:$0xff] }
  0x3e   : > { %6807 = vmatpush3.msra.mxu1 %v7287_v21  ;;  %6681 = vmatprep.mubr.msk.f32.mxu1 %vm380_vm0, %v253_v33  ;;  %v7399_v21 = vld [vmem:[%s9023_s1 + $0x30] sm:$0xff]  ;;  %v268_v33 = vmax.f32 %v226_v29, 0.0  ;;  %v269_v35 = vmax.f32 %v227_v31, 0.0  ;;  %v276_v29 = vmax.f32 %v234_v19, 0.0  ;;  %v9032_v31 = vmax.f32 %v7575_v23, 0.0 }
  0x3f   : > { %6743 = vmatprep.mubr.msk.f32.mxu0 %vm380_vm0, %v1225_v36  ;;  %6936 = vmatprep.subr.mxu1 %v7379_v39  ;;  %v9045_v36 = vmax.f32 %v7507_v32, 0.0  ;;  %v280_v19 = vmax.f32 %v238_v3, 0.0  ;;  %v7633_v3 = vld [vmem:[%s7268_s26 + $0xf2] sm:$0xff] }
  0x41   : > { %6682 = vmatmul.mubr.msk.f32.gmra.mxu1 %vm380_vm0, %v254_v40  ;;  %6744 = vmatmul.mubr.msk.f32.vlgmr.msra.gmra.mxu0 %vm380_vm0, %v1226_v41  ;;  %v7521_v40 = vld [vmem:[%s7268_s26 + $0x8a] sm:$0xff]  ;;  %v229_v41 = vld [vmem:[%s7268_s26 + $0xa0] sm:$0xff] }
  0x42   : > { %6872 = vmatpush3.msra.mxu0 %v7292_v22  ;;  %6684 = vmatprep.mubr.msk.f32.mxu1 %vm380_vm0, %v255_v42  ;;  %v258_v22 = vmax.f32 %v216_v52, 0.0  ;;  %v7525_v42 = vld [vmem:[%s7268_s26 + $0x92] sm:$0xff]  ;;  %v9042_v46 = vmax.f32 %v7521_v40, 0.0  ;;  %v230_v52 = vld [vmem:[%s7268_s26 + $0xa8] sm:$0xff] }
  0x43   : > { %6746 = vmatprep.mubr.msk.f32.mxu0 %vm380_vm0, %v1227_v45  ;;  %7001 = vmatprep.subr.mxu0 %v7399_v21  ;;  %v272_v59 = vmax.f32 %v230_v52, 0.0  ;;  %v278_v52 = vmax.f32 %v236_v37, 0.0  ;;  %v240_v37 = vld [vmem:[%s7268_s26 + $0xf8] sm:$0xff] }
  0x45   : > { %6685 = vmatmul.mubr.msk.f32.gmra.mxu1 %vm380_vm0, %v256_v48  ;;  %6747 = vmatmul.mubr.msk.f32.gmra.mxu0 %vm380_vm0, %v1228_v49  ;;  %v271_v48 = vmax.f32 %v229_v41, 0.0  ;;  %v7593_v41 = vld [vmem:[%s7268_s26 + $0xca] sm:$0xff] }
  0x46   : > { %6687 = vmatprep.mubr.msk.f32.mxu1 %vm380_vm0, %v257_v50  ;;  %6749 = vmatprep.mubr.msk.f32.mxu0 %vm380_vm0, %v1229_v51  ;;  %v9041_v50 = vmax.f32 %v7525_v42, 0.0 }
  0x49   : > { %6688 = vmatmul.mubr.msk.f32.gmra.mxu1 %vm380_vm0, %v258_v22  ;;  %6750 = vmatmul.mubr.msk.f32.gmra.mxu0 %vm380_vm0, %v1230_v56  ;;  %v231_v22 = vld [vmem:[%s7268_s26 + $0xb0] sm:$0xff] }
  0x4a   : > { %6690 = vmatprep.mubr.msk.f32.mxu1 %vm380_vm0, %v259_v57  ;;  %6752 = vmatprep.mubr.msk.f32.mxu0 %vm380_vm0, %v1231_v58  ;;  %v7543_v57 = vld [vmem:[%s7268_s26 + $0xa2] sm:$0xff] }
  0x4d   : > { %6691 = vmatmul.mubr.msk.f32.gmra.mxu1 %vm380_vm0, %v260_v63  ;;  %6753 = vmatmul.mubr.msk.f32.gmra.mxu0 %vm380_vm0, %v1232_v0  ;;  %v273_v63 = vmax.f32 %v231_v22, 0.0  ;;  %v9028_v22 = vmax.f32 %v7593_v41, 0.0 }
  0x4e   : > { %6693 = vmatprep.mubr.msk.f32.mxu1 %vm380_vm0, %v261_v1  ;;  %6755 = vmatprep.mubr.msk.f32.mxu0 %vm380_vm0, %v1233_v2  ;;  %v9037_v1 = vmax.f32 %v7543_v57, 0.0 }
  0x51   : > { %6694 = vmatmul.mubr.msk.f32.gmra.mxu1 %vm380_vm0, %v262_v7  ;;  %6756 = vmatmul.mubr.msk.f32.gmra.mxu0 %vm380_vm0, %v1234_v8  ;;  %v233_v7 = vld [vmem:[%s7268_s26 + $0xc0] sm:$0xff] }
  0x52   : > { %6696 = vmatprep.mubr.msk.f32.mxu1 %vm380_vm0, %v263_v9  ;;  %6758 = vmatprep.mubr.msk.f32.mxu0 %vm380_vm0, %v1235_v10  ;;  %v7561_v9 = vld [vmem:[%s7268_s26 + $0xb2] sm:$0xff] }
  0x55   : > { %6697 = vmatmul.mubr.msk.f32.gmra.mxu1 %vm380_vm0, %v264_v15  ;;  %6759 = vmatmul.mubr.msk.f32.gmra.mxu0 %vm380_vm0, %v1236_v16  ;;  %v275_v15 = vmax.f32 %v233_v7, 0.0  ;;  %v7611_v7 = vld [vmem:[%s7268_s26 + $0xda] sm:$0xff] }
  0x56   : > { %6699 = vmatprep.mubr.msk.f32.mxu1 %vm380_vm0, %v265_v17  ;;  %6761 = vmatprep.mubr.msk.f32.mxu0 %vm380_vm0, %v1237_v18  ;;  %v9033_v17 = vmax.f32 %v7561_v9, 0.0 }
  0x59   : > { %6700 = vmatmul.mubr.msk.f32.gmra.mxu1 %vm380_vm0, %v266_v25  ;;  %6762 = vmatmul.mubr.msk.f32.gmra.mxu0 %vm380_vm0, %v1238_v26  ;;  %v235_v25 = vld [vmem:[%s7268_s26 + $0xd0] sm:$0xff] }
  0x5a   : > { %6702 = vmatprep.mubr.msk.f32.mxu1 %vm380_vm0, %v267_v27  ;;  %6764 = vmatprep.mubr.msk.f32.mxu0 %vm380_vm0, %v1239_v28  ;;  %v7579_v27 = vld [vmem:[%s7268_s26 + $0xc2] sm:$0xff] }
  0x5d   : > { %6703 = vmatmul.mubr.msk.f32.gmra.mxu1 %vm380_vm0, %v268_v33  ;;  %6765 = vmatmul.mubr.msk.f32.gmra.mxu0 %vm380_vm0, %v9046_v34  ;;  %v277_v33 = vmax.f32 %v235_v25, 0.0  ;;  %v9030_v25 = vmax.f32 %v7611_v7, 0.0  ;;  %v7722_v34 = vld [vmem:[%s7268_s26 + $0x142] sm:$0xff] }
  0x5e   : > { %6705 = vmatprep.mubr.msk.f32.mxu1 %vm380_vm0, %v269_v35  ;;  %6767 = vmatprep.mubr.msk.f32.mxu0 %vm380_vm0, %v9045_v36  ;;  %v9029_v35 = vmax.f32 %v7579_v27, 0.0  ;;  %v250_v36 = vld [vmem:[%s7268_s26 + $0x148] sm:$0xff] }
  0x61   : > { %6706 = vmatmul.mubr.msk.f32.gmra.mxu1 %vm380_vm0, %v270_v43  ;;  %6768 = vmatmul.mubr.msk.f32.gmra.mxu0 %vm380_vm0, %v9042_v46  ;;  %v237_v43 = vld [vmem:[%s7268_s26 + $0xe0] sm:$0xff] }
  0x62   : > { %6708 = vmatprep.mubr.msk.f32.mxu1 %vm380_vm0, %v271_v48  ;;  %6770 = vmatprep.mubr.msk.f32.mxu0 %vm380_vm0, %v9041_v50  ;;  %v7597_v48 = vld [vmem:[%s7268_s26 + $0xd2] sm:$0xff]  ;;  %v7701_v50 = vld [vmem:[%s7268_s26 + $0x12a] sm:$0xff]  ;;  %v249_v46 = vld [vmem:[%s7268_s26 + $0x140] sm:$0xff] }
  0x65   : > { %6709 = vmatmul.mubr.msk.f32.gmra.mxu1 %vm380_vm0, %v272_v59  ;;  %6771 = vmatmul.mubr.msk.f32.gmra.mxu0 %vm380_vm0, %v9040_v61  ;;  %v279_v59 = vmax.f32 %v237_v43, 0.0  ;;  %v7629_v43 = vld [vmem:[%s7268_s26 + $0xea] sm:$0xff] }
  0x66   : > { %6711 = vmatprep.mubr.msk.f32.mxu1 %vm380_vm0, %v273_v63  ;;  %6773 = vmatprep.mubr.msk.f32.mxu0 %vm380_vm0, %v9037_v1  ;;  %v9027_v63 = vmax.f32 %v7597_v48, 0.0  ;;  %v7683_v1 = vld [vmem:[%s7268_s26 + $0x11a] sm:$0xff] }
  0x69   : > { %6712 = vmatmul.mubr.msk.f32.gmra.mxu1 %vm380_vm0, %v274_v11  ;;  %6774 = vmatmul.mubr.msk.f32.gmra.mxu0 %vm380_vm0, %v9036_v13  ;;  %v239_v11 = vld [vmem:[%s7268_s26 + $0xf0] sm:$0xff] }
  0x6a   : > { %6714 = vmatprep.mubr.msk.f32.mxu1 %vm380_vm0, %v275_v15  ;;  %6776 = vmatprep.mubr.msk.f32.mxu0 %vm380_vm0, %v9033_v17  ;;  %v7615_v15 = vld [vmem:[%s7268_s26 + $0xe2] sm:$0xff]  ;;  %v7665_v17 = vld [vmem:[%s7268_s26 + $0x10a] sm:$0xff] }
  0x6d   : > { %6715 = vmatmul.mubr.msk.f32.gmra.mxu1 %vm380_vm0, %v276_v29  ;;  %6777 = vmatmul.mubr.msk.f32.gmra.mxu0 %vm380_vm0, %v9032_v31  ;;  %v281_v29 = vmax.f32 %v239_v11, 0.0 }
  0x6e   : > { %6717 = vmatprep.mubr.msk.f32.mxu1 %vm380_vm0, %v277_v33  ;;  %6779 = vmatprep.mubr.msk.f32.mxu0 %vm380_vm0, %v9029_v35  ;;  %v9031_v33 = vmax.f32 %v7615_v15, 0.0  ;;  %v7647_v35 = vld [vmem:[%s7268_s26 + $0xfa] sm:$0xff] }
  0x71   : > { %6718 = vmatmul.mubr.msk.f32.gmra.mxu1 %vm380_vm0, %v278_v52  ;;  %6780 = vmatmul.mubr.msk.f32.gmra.mxu0 %vm380_vm0, %v9028_v22  ;;  %v241_v52 = vld [vmem:[%s7268_s26 + $0x100] sm:$0xff]  ;;  %v9035_v22 = vmax.f32 %v7633_v3, 0.0 }
  0x72   : > { %6720 = vmatprep.mubr.msk.f32.mxu1 %vm380_vm0, %v279_v59  ;;  %6782 = vmatprep.mubr.msk.f32.mxu0 %vm380_vm0, %v9027_v63  ;;  %v282_v59 = vmax.f32 %v240_v37, 0.0  ;;  %v9034_v63 = vmax.f32 %v7629_v43, 0.0  ;;  %v283_v11 = vmax.f32 %v241_v52, 0.0  ;;  %v7651_v37 = vld [vmem:[%s7268_s26 + $0x102] sm:$0xff] }
  0x73   : > { %v9039_v31 = vmax.f32 %v7651_v37, 0.0 }
  0x75   : > { %6721 = vmatmul.mubr.msk.f32.gmra.mxu1 %vm380_vm0, %v280_v19  ;;  %6783 = vmatmul.mubr.msk.f32.gmra.mxu0 %vm380_vm0, %v9030_v25  ;;  %v242_v19 = vld [vmem:[%s7268_s26 + $0x108] sm:$0xff]  ;;  %v243_v25 = vld [vmem:[%s7268_s26 + $0x110] sm:$0xff] }
  0x76   : > { %6723 = vmatprep.mubr.msk.f32.mxu1 %vm380_vm0, %v281_v29  ;;  %6785 = vmatprep.mubr.msk.f32.mxu0 %vm380_vm0, %v9031_v33  ;;  %v284_v29 = vmax.f32 %v242_v19, 0.0  ;;  %v9038_v33 = vmax.f32 %v7647_v35, 0.0  ;;  %v285_v52 = vmax.f32 %v243_v25, 0.0  ;;  %v7669_v19 = vld [vmem:[%s7268_s26 + $0x112] sm:$0xff] }
  0x77   : > { %v9044_v13 = vmax.f32 %v7669_v19, 0.0 }
  0x79   : > { %6724 = vmatmul.mubr.msk.f32.gmra.mxu1 %vm380_vm0, %v282_v59  ;;  %6786 = vmatmul.mubr.msk.f32.gmra.mxu0 %vm380_vm0, %v9034_v63  ;;  %v244_v59 = vld [vmem:[%s7268_s26 + $0x118] sm:$0xff]  ;;  %v245_v63 = vld [vmem:[%s7268_s26 + $0x120] sm:$0xff] }
  0x7a   : > { %6726 = vmatprep.mubr.msk.f32.mxu1 %vm380_vm0, %v283_v11  ;;  %6788 = vmatprep.mubr.msk.f32.mxu0 %vm380_vm0, %v9035_v22  ;;  %v286_v11 = vmax.f32 %v244_v59, 0.0  ;;  %v9043_v22 = vmax.f32 %v7665_v17, 0.0  ;;  %v287_v25 = vmax.f32 %v245_v63, 0.0  ;;  %v7687_v59 = vld [vmem:[%s7268_s26 + $0x122] sm:$0xff] }
  0x7b   : > { %v9047_v61 = vmax.f32 %v7687_v59, 0.0 }
  0x7d   : > { %6727 = vmatmul.mubr.msk.f32.gmra.mxu1 %vm380_vm0, %v284_v29  ;;  %6789 = vmatmul.mubr.msk.f32.gmra.mxu0 %vm380_vm0, %v9038_v33  ;;  %v246_v29 = vld [vmem:[%s7268_s26 + $0x128] sm:$0xff]  ;;  %v247_v33 = vld [vmem:[%s7268_s26 + $0x130] sm:$0xff] }
  0x7e   : > { %6729 = vmatprep.mubr.msk.f32.mxu1 %vm380_vm0, %v285_v52  ;;  %6791 = vmatprep.mubr.msk.f32.mxu0 %vm380_vm0, %v9039_v31  ;;  %v288_v52 = vmax.f32 %v246_v29, 0.0  ;;  %v1260_v31 = vmax.f32 %v7683_v1, 0.0  ;;  %v289_v63 = vmax.f32 %v247_v33, 0.0  ;;  %v9049_v29 = vmax.f32 %v7701_v50, 0.0  ;;  %v5111_v1 = vld [vmem:[%s9024_s2 + $0x78] sm:$0xff] }
  0x7f   : > { %v291_v33 = vmax.f32 %v249_v46, 0.0  ;;  %v9050_v46 = vmax.f32 %v7722_v34, 0.0 }
  0x81   : > { %6730 = vmatmul.mubr.msk.f32.gmra.mxu1 %vm380_vm0, %v286_v11  ;;  %6792 = vmatmul.mubr.msk.f32.gmra.mxu0 %vm380_vm0, %v9043_v22  ;;  %v248_v11 = vld [vmem:[%s7268_s26 + $0x138] sm:$0xff] }
  0x82   : > { %6732 = vmatprep.mubr.msk.f32.mxu1 %vm380_vm0, %v287_v25  ;;  %6794 = vmatprep.mubr.msk.f32.mxu0 %vm380_vm0, %v9044_v13  ;;  %v7705_v22 = vld [vmem:[%s7268_s26 + $0x132] sm:$0xff]  ;;  %v290_v25 = vmax.f32 %v248_v11, 0.0 }
  0x83   : > { %v9048_v13 = vmax.f32 %v7705_v22, 0.0 }
  0x85   : > { %6733 = vmatmul.mubr.msk.f32.gmra.mxu1 %vm380_vm0, %v288_v52  ;;  %6795 = vmatmul.mubr.msk.f32.gmra.mxu0 %vm380_vm0, %v1260_v31  ;;  %v7719_v52 = vld [vmem:[%s7268_s26 + $0x13a] sm:$0xff] }
  0x86   : > { %6735 = vmatprep.mubr.msk.f32.mxu1 %vm380_vm0, %v289_v63  ;;  %6797 = vmatprep.mubr.msk.f32.mxu0 %vm380_vm0, %v9047_v61  ;;  %v292_v63 = vmax.f32 %v250_v36, 0.0  ;;  %v1264_v11 = vmax.f32 %v7719_v52, 0.0  ;;  %v7735_v61 = vld [vmem:[%s7268_s26 + $0x14a] sm:$0xff]  ;;  %v2770_v52 = vld [vmem:[%s7268_s26 + $0x14] sm:$0xff] }
  0x87   : > { %v1266_v36 = vmax.f32 %v7735_v61, 0.0  ;;  %v2772_v61 = vld [vmem:[%s7268_s26 + $0x24] sm:$0xff] }
  0x89   : > { %6736 = vmatmul.mubr.msk.f32.gmra.mxu1 %vm380_vm0, %v290_v25  ;;  %6798 = vmatmul.mubr.msk.f32.gmra.mxu0 %vm380_vm0, %v9049_v29  ;;  %v2241_v25 = vld [vmem:[%s7268_s26 + $0x13] sm:$0xff]  ;;  %v2243_v29 = vld [vmem:[%s7268_s26 + $0x23] sm:$0xff] }
  0x8a   : > { %6738 = vmatprep.mubr.msk.f32.mxu1 %vm380_vm0, %v291_v33  ;;  %6800 = vmatprep.mubr.msk.f32.mxu0 %vm380_vm0, %v9048_v13  ;;  %v2242_v33 = vld [vmem:[%s7268_s26 + $0x1b] sm:$0xff]  ;;  %v2283_v13 = vmax.f32 %v2241_v25, 0.0  ;;  %v2285_v25 = vmax.f32 %v2243_v29, 0.0  ;;  %v9053_v29 = vmax.f32 %v7521_v40, 0.0 }
  0x8b   : > { %v2284_v38 = vmax.f32 %v2242_v33, 0.0  ;;  %v2258_v33 = vld [vmem:[%s7268_s26 + $0x9b] sm:$0xff] }
  0x8c   : > { %v2300_v40 = vmax.f32 %v2258_v33, 0.0  ;;  %v2270_v33 = vld [vmem:[%s7268_s26 + $0xfb] sm:$0xff] }
  0x8d   : > { %6739 = vmatmul.mubr.msk.f32.gmra.mxu1 %vm380_vm0, %v292_v63  ;;  %6801 = vmatmul.mubr.msk.f32.gmra.mxu0 %vm380_vm0, %v1264_v11  ;;  %v7754_v63 = vld [vmem:[%s9023_s1 + $0x38] sm:$0xff] }
  0x8e   : > { %6803 = vmatprep.mubr.msk.f32.mxu0 %vm380_vm0, %v9050_v46  ;;  %6808 = vmatprep.mubr.msk.f32.mxu1 %vm380_vm0, %v1227_v45  ;;  %v2244_v45 = vld [vmem:[%s7268_s26 + $0x2b] sm:$0xff]  ;;  %v2245_v46 = vld [vmem:[%s7268_s26 + $0x33] sm:$0xff] }
  0x8f   : > { %v2287_v47 = vmax.f32 %v2245_v46, 0.0  ;;  %v9054_v46 = vmax.f32 %v7525_v42, 0.0 }
  0x91   : > { %6804 = vmatmul.mubr.msk.f32.gmra.mxu0 %vm380_vm0, %v1266_v36  ;;  %6809 = vmatmul.mubr.msk.f32.vlgmr.msra.gmra.mxu1 %vm380_vm0, %v1228_v49  ;;  %v2246_v49 = vld [vmem:[%s7268_s26 + $0x3b] sm:$0xff] }
  0x92   : > { %6937 = vmatpush3.msra.mxu1 %v7379_v39  ;;  %6811 = vmatprep.mubr.msk.f32.mxu1 %vm380_vm0, %v1229_v51  ;;  %v2286_v39 = vmax.f32 %v2244_v45, 0.0  ;;  %v2247_v51 = vld [vmem:[%s7268_s26 + $0x43] sm:$0xff]  ;;  %v9055_v45 = vmax.f32 %v7539_v54, 0.0 }
  0x93   : > { %6873 = vmatprep.mubr.msk.f32.mxu0 %vm380_vm0, %v2283_v13  ;;  %7066 = vmatprep.subr.mxu1 %v7754_v63  ;;  %v2289_v53 = vmax.f32 %v2247_v51, 0.0  ;;  %v2257_v13 = vld [vmem:[%s7268_s26 + $0x93] sm:$0xff]  ;;  %v5096_v54 = vld [vmem:[%s9024_s2] sm:$0xff]  ;;  %v9057_v51 = vmax.f32 %v7557_v5, 0.0 }
  0x94   : > { %v5098_v5 = vld [vmem:[%s9024_s2 + $0x10] sm:$0xff] }
  0x95   : > { %6812 = vmatmul.mubr.msk.f32.gmra.mxu1 %vm380_vm0, %v1230_v56  ;;  %6874 = vmatmul.mubr.msk.f32.vlgmr.msra.gmra.mxu0 %vm380_vm0, %v2284_v38  ;;  %v2249_v56 = vld [vmem:[%s7268_s26 + $0x53] sm:$0xff]  ;;  %v2259_v38 = vld [vmem:[%s7268_s26 + $0xa3] sm:$0xff] }
  0x96   : > { %7002 = vmatpush3.msra.mxu0 %v7399_v21  ;;  %6814 = vmatprep.mubr.msk.f32.mxu1 %vm380_vm0, %v1231_v58  ;;  %v2288_v21 = vmax.f32 %v2246_v49, 0.0  ;;  %v2290_v58 = vmax.f32 %v2248_v55, 0.0  ;;  %v2291_v60 = vmax.f32 %v2249_v56, 0.0  ;;  %v2301_v42 = vmax.f32 %v2259_v38, 0.0  ;;  %v2262_v55 = vld [vmem:[%s7268_s26 + $0xbb] sm:$0xff]  ;;  %v2263_v56 = vld [vmem:[%s7268_s26 + $0xc3] sm:$0xff] }
  0x97   : > { %6876 = vmatprep.mubr.msk.f32.mxu0 %vm380_vm0, %v2285_v25  ;;  %7131 = vmatprep.subr.mxu0 %v7773_v44  ;;  %v9056_v25 = vmax.f32 %v7543_v57, 0.0  ;;  %v7219_v49 = vmov 0   ;;  %v2271_v38 = vld [vmem:[%s7268_s26 + $0x103] sm:$0xff] }
  0x98   : > { %7209 = vset.pattern.permute.xlu0 %v7219_v49  ;;  %7210 = vset.pattern.permute.xlu1 %v7219_v49  ;;  %v5108_v49 = vld [vmem:[%s9024_s2 + $0x60] sm:$0xff] }
  0x99   : > { %6815 = vmatmul.mubr.msk.f32.gmra.mxu1 %vm380_vm0, %v1232_v0  ;;  %6877 = vmatmul.mubr.msk.f32.gmra.mxu0 %vm380_vm0, %v2286_v39  ;;  %v2251_v0 = vld [vmem:[%s7268_s26 + $0x63] sm:$0xff]  ;;  %v2260_v39 = vld [vmem:[%s7268_s26 + $0xab] sm:$0xff] }
  0x9a   : > { %6817 = vmatprep.mubr.msk.f32.mxu1 %vm380_vm0, %v1233_v2  ;;  %6879 = vmatprep.mubr.msk.f32.mxu0 %vm380_vm0, %v2287_v47  ;;  %v2292_v2 = vmax.f32 %v2250_v62, 0.0  ;;  %v2293_v4 = vmax.f32 %v2251_v0, 0.0  ;;  %v2261_v47 = vld [vmem:[%s7268_s26 + $0xb3] sm:$0xff]  ;;  %v2302_v57 = vmax.f32 %v2260_v39, 0.0  ;;  %v9060_v62 = vmax.f32 %v7579_v27, 0.0  ;;  %v2272_v39 = vld [vmem:[%s7268_s26 + $0x10b] sm:$0xff] }
  0x9b   : > { %5140 = vperm.xlu0 %7209, %v5096_v54   ;;  %5150 = vperm.xlu1 %7210, %v5098_v5   ;;  %v2305_v0 = vmax.f32 %v2263_v56, 0.0  ;;  %v9061_v27 = vmax.f32 %v7593_v41, 0.0  ;;  %v5101_v41 = vld [vmem:[%s9024_s2 + $0x28] sm:$0xff]  ;;  %v2314_v54 = vmax.f32 %v2272_v39, 0.0  ;;  %v9071_v56 = vmax.f32 %v7687_v59, 0.0 }
  0x9d   : > { %6818 = vmatmul.mubr.msk.f32.gmra.mxu1 %vm380_vm0, %v1234_v8  ;;  %6880 = vmatmul.mubr.msk.f32.gmra.mxu0 %vm380_vm0, %v2288_v21  ;;  %v2253_v8 = vld [vmem:[%s7268_s26 + $0x73] sm:$0xff]  ;;  %v9058_v21 = vmax.f32 %v7561_v9, 0.0  ;;  %v9059_v9 = vmax.f32 %v7575_v23, 0.0 }
  0x9e   : > { %6820 = vmatprep.mubr.msk.f32.mxu1 %vm380_vm0, %v1235_v10  ;;  %6882 = vmatprep.mubr.msk.f32.mxu0 %vm380_vm0, %v2289_v53  ;;  %v2294_v10 = vmax.f32 %v2252_v6, 0.0  ;;  %v2295_v12 = vmax.f32 %v2253_v8, 0.0  ;;  %v2303_v53 = vmax.f32 %v2261_v47, 0.0  ;;  %v5099_v23 = vld [vmem:[%s9024_s2 + $0x18] sm:$0xff]  ;;  %v5100_v6 = vld [vmem:[%s9024_s2 + $0x20] sm:$0xff] }
  0x9f   : > { %5155 = vperm.xlu1 %7210, %v5099_v23   ;;  %v2273_v47 = vld [vmem:[%s7268_s26 + $0x113] sm:$0xff]  ;;  %v2278_v23 = vld [vmem:[%s7268_s26 + $0x13b] sm:$0xff] }
  0xa1   : > { %6821 = vmatmul.mubr.msk.f32.gmra.mxu1 %vm380_vm0, %v1236_v16  ;;  %6883 = vmatmul.mubr.msk.f32.gmra.mxu0 %vm380_vm0, %v2290_v58  ;;  %v2255_v16 = vld [vmem:[%s7268_s26 + $0x83] sm:$0xff] }
  0xa2   : > { %6823 = vmatprep.mubr.msk.f32.mxu1 %vm380_vm0, %v1237_v18  ;;  %6885 = vmatprep.mubr.msk.f32.mxu0 %vm380_vm0, %v2291_v60  ;;  %v9051_v18 = vmax.f32 %v7503_v30, 0.0  ;;  %v2297_v24 = vmax.f32 %v2255_v16, 0.0  ;;  %v5097_v58 = vld [vmem:[%s9024_s2 + $0x8] sm:$0xff]  ;;  %v2304_v60 = vmax.f32 %v2262_v55, 0.0  ;;  %v5110_v55 = vld [vmem:[%s9024_s2 + $0x70] sm:$0xff] }
  0xa3   : > { %5145 = vperm.xlu0 %7209, %v5097_v58   ;;  %v2267_v16 = vld [vmem:[%s7268_s26 + $0xe3] sm:$0xff]  ;;  %5165 = vperm.xlu1 %7210, %v5101_v41   ;;  %v2276_v58 = vld [vmem:[%s7268_s26 + $0x12b] sm:$0xff]  ;;  %v9074_v41 = vmax.f32 %v7722_v34, 0.0  ;;  %v5115_v34 = vld [vmem:[%s9024_s2 + $0x98] sm:$0xff] }
  0xa5   : > { %6824 = vmatmul.mubr.msk.f32.gmra.mxu1 %vm380_vm0, %v1238_v26  ;;  %6886 = vmatmul.mubr.msk.f32.gmra.mxu0 %vm380_vm0, %v2292_v2  ;;  %v9052_v26 = vmax.f32 %v7507_v32, 0.0  ;;  %v2299_v32 = vmax.f32 %v2257_v13, 0.0  ;;  %v2264_v2 = vld [vmem:[%s7268_s26 + $0xcb] sm:$0xff]  ;;  %v2269_v13 = vld [vmem:[%s7268_s26 + $0xf3] sm:$0xff] }
  0xa6   : > { %6826 = vmatprep.mubr.msk.f32.mxu1 %vm380_vm0, %v1239_v28  ;;  %6888 = vmatprep.mubr.msk.f32.mxu0 %vm380_vm0, %v2293_v4  ;;  %v2256_v28 = vld [vmem:[%s7268_s26 + $0x8b] sm:$0xff]  ;;  %v2265_v4 = vld [vmem:[%s7268_s26 + $0xd3] sm:$0xff]  ;;  %v2306_v8 = vmax.f32 %v2264_v2, 0.0  ;;  %v9073_v2 = vmax.f32 %v7705_v22, 0.0 }
  0xa7   : > { %v2298_v30 = vmax.f32 %v2256_v28, 0.0  ;;  %5160 = vperm.xlu0 %7209, %v5100_v6   ;;  %v2268_v28 = vld [vmem:[%s7268_s26 + $0xeb] sm:$0xff] }
  0xa8   : > { %v1752_v6 = vld [vmem:[%s7268_s26 + $0x152] sm:$0xff] }
  0xa9   : > { %6827 = vmatmul.mubr.msk.f32.gmra.mxu1 %vm380_vm0, %v9051_v18  ;;  %6889 = vmatmul.mubr.msk.f32.gmra.mxu0 %vm380_vm0, %v2294_v10  ;;  %v9062_v10 = vmax.f32 %v7597_v48, 0.0  ;;  %v5102_v18 = vld [vmem:[%s9024_s2 + $0x30] sm:$0xff]  ;;  %v9063_v48 = vmax.f32 %v7611_v7, 0.0  ;;  %v5103_v7 = vld [vmem:[%s9024_s2 + $0x38] sm:$0xff] }
  0xaa   : > { %6829 = vmatprep.mubr.msk.f32.mxu1 %vm380_vm0, %v9052_v26  ;;  %6891 = vmatprep.mubr.msk.f32.mxu0 %vm380_vm0, %v2295_v12  ;;  %v2307_v12 = vmax.f32 %v2265_v4, 0.0  ;;  %v9064_v26 = vmax.f32 %v7615_v15, 0.0  ;;  %v9065_v15 = vmax.f32 %v7629_v43, 0.0  ;;  %v5105_v43 = vld [vmem:[%s9024_s2 + $0x48] sm:$0xff]  ;;  %v5114_v22 = vld [vmem:[%s9024_s2 + $0x90] sm:$0xff] }
  0xab   : > { %5170 = vperm.xlu0 %7209, %v5102_v18   ;;  %5175 = vperm.xlu1 %7210, %v5103_v7   ;;  %v1794_v18 = vmax.f32 %v1752_v6, 0.0  ;;  %v2778_v6 = vld [vmem:[%s7268_s26 + $0x54] sm:$0xff] }
  0xad   : > { %6830 = vmatmul.mubr.msk.f32.gmra.mxu1 %vm380_vm0, %v9053_v29  ;;  %6892 = vmatmul.mubr.msk.f32.gmra.mxu0 %vm380_vm0, %v2296_v20  ;;  %v2308_v20 = vmax.f32 %v2266_v14, 0.0  ;;  %v5104_v29 = vld [vmem:[%s9024_s2 + $0x40] sm:$0xff] }
  0xae   : > { %6832 = vmatprep.mubr.msk.f32.mxu1 %vm380_vm0, %v9054_v46  ;;  %6894 = vmatprep.mubr.msk.f32.mxu0 %vm380_vm0, %v2297_v24  ;;  %v2309_v24 = vmax.f32 %v2267_v16, 0.0  ;;  %v9066_v46 = vmax.f32 %v7633_v3, 0.0  ;;  %v9067_v3 = vmax.f32 %v7647_v35, 0.0  ;;  %v5107_v35 = vld [vmem:[%s9024_s2 + $0x58] sm:$0xff]  ;;  %v2320_v16 = vmax.f32 %v2278_v23, 0.0 }
  0xaf   : > { %5180 = vperm.xlu0 %7209, %v5104_v29   ;;  %5185 = vperm.xlu1 %7210, %v5105_v43  }
  0xb1   : > { %6833 = vmatmul.mubr.msk.f32.gmra.mxu1 %vm380_vm0, %v9055_v45  ;;  %6895 = vmatmul.mubr.msk.f32.gmra.mxu0 %vm380_vm0, %v2298_v30  ;;  %v2310_v30 = vmax.f32 %v2268_v28, 0.0  ;;  %v5106_v45 = vld [vmem:[%s9024_s2 + $0x50] sm:$0xff] }
  0xb2   : > { %6835 = vmatprep.mubr.msk.f32.mxu1 %vm380_vm0, %v9056_v25  ;;  %6897 = vmatprep.mubr.msk.f32.mxu0 %vm380_vm0, %v2299_v32  ;;  %v2311_v32 = vmax.f32 %v2269_v13, 0.0  ;;  %v9068_v25 = vmax.f32 %v7651_v37, 0.0  ;;  %v9069_v37 = vmax.f32 %v7665_v17, 0.0  ;;  %v5109_v17 = vld [vmem:[%s9024_s2 + $0x68] sm:$0xff] }
  0xb3   : > { %5190 = vperm.xlu0 %7209, %v5106_v45   ;;  %5195 = vperm.xlu1 %7210, %v5107_v35   ;;  %v2773_v35 = vld [vmem:[%s7268_s26 + $0x2c] sm:$0xff] }
  0xb5   : > { %6836 = vmatmul.mubr.msk.f32.gmra.mxu1 %vm380_vm0, %v9057_v51  ;;  %6898 = vmatmul.mubr.msk.f32.gmra.mxu0 %vm380_vm0, %v2300_v40  ;;  %v2312_v40 = vmax.f32 %v2270_v33, 0.0  ;;  %v9070_v51 = vmax.f32 %v7669_v19, 0.0  ;;  %v2282_v33 = vld [vmem:[%s7268_s26 + $0x15b] sm:$0xff] }
  0xb6   : > { %6838 = vmatprep.mubr.msk.f32.mxu1 %vm380_vm0, %v9058_v21  ;;  %6900 = vmatprep.mubr.msk.f32.mxu0 %vm380_vm0, %v2301_v42  ;;  %v2313_v42 = vmax.f32 %v2271_v38, 0.0  ;;  %v2274_v21 = vld [vmem:[%s7268_s26 + $0x11b] sm:$0xff] }
  0xb7   : > { %5200 = vperm.xlu0 %7209, %v5108_v49   ;;  %5205 = vperm.xlu1 %7210, %v5109_v17   ;;  %v2316_v19 = vmax.f32 %v2274_v21, 0.0  ;;  %v2771_v38 = vld [vmem:[%s7268_s26 + $0x1c] sm:$0xff]  ;;  %v2815_v17 = vmax.f32 %v2773_v35, 0.0 }
  0xb8   : > { %v2813_v39 = vmax.f32 %v2771_v38, 0.0  ;;  %v2782_v38 = vld [vmem:[%s7268_s26 + $0x74] sm:$0xff]  ;;  %v2783_v35 = vld [vmem:[%s7268_s26 + $0x7c] sm:$0xff] }
  0xb9   : > { %6839 = vmatmul.mubr.msk.f32.gmra.mxu1 %vm380_vm0, %v9059_v9  ;;  %6901 = vmatmul.mubr.msk.f32.gmra.mxu0 %vm380_vm0, %v2302_v57  ;;  %v2315_v57 = vmax.f32 %v2273_v47, 0.0  ;;  %v2277_v9 = vld [vmem:[%s7268_s26 + $0x133] sm:$0xff]  ;;  %v2814_v47 = vmax.f32 %v2772_v61, 0.0 }
  0xba   : > { %6841 = vmatprep.mubr.msk.f32.mxu1 %vm380_vm0, %v9060_v62  ;;  %6903 = vmatprep.mubr.msk.f32.mxu0 %vm380_vm0, %v2303_v53  ;;  %v2275_v53 = vld [vmem:[%s7268_s26 + $0x123] sm:$0xff]  ;;  %v9072_v62 = vmax.f32 %v7701_v50, 0.0  ;;  %v2319_v4 = vmax.f32 %v2277_v9, 0.0  ;;  %v5127_v61 = vld [vmem:[%s9024_s2 + $0xf8] sm:$0xff] }
  0xbb   : > { %5210 = vperm.xlu0 %7209, %v5110_v55   ;;  %v2317_v5 = vmax.f32 %v2275_v53, 0.0  ;;  %5215 = vperm.xlu1 %7210, %v5111_v1   ;;  %v2279_v50 = vld [vmem:[%s7268_s26 + $0x143] sm:$0xff] }
  0xbc   : > { %v5121_v9 = vld [vmem:[%s9024_s2 + $0xc8] sm:$0xff] }
  0xbd   : > { %6842 = vmatmul.mubr.msk.f32.gmra.mxu1 %vm380_vm0, %v9061_v27  ;;  %6904 = vmatmul.mubr.msk.f32.gmra.mxu0 %vm380_vm0, %v2304_v60 }
  0xbe   : > { %6844 = vmatprep.mubr.msk.f32.mxu1 %vm380_vm0, %v9062_v10  ;;  %6906 = vmatprep.mubr.msk.f32.mxu0 %vm380_vm0, %v2305_v0  ;;  %v2318_v0 = vmax.f32 %v2276_v58, 0.0  ;;  %v5113_v10 = vld [vmem:[%s9024_s2 + $0x88] sm:$0xff] }
  0xbf   : > { %5225 = vperm.xlu1 %7210, %v5113_v10   ;;  %v2776_v58 = vld [vmem:[%s7268_s26 + $0x44] sm:$0xff] }
  0xc1   : > { %6845 = vmatmul.mubr.msk.f32.gmra.mxu1 %vm380_vm0, %v9063_v48  ;;  %6907 = vmatmul.mubr.msk.f32.gmra.mxu0 %vm380_vm0, %v2306_v8  ;;  %v2321_v48 = vmax.f32 %v2279_v50, 0.0  ;;  %v5123_v50 = vld [vmem:[%s9024_s2 + $0xd8] sm:$0xff] }
  0xc2   : > { %6847 = vmatprep.mubr.msk.f32.mxu1 %vm380_vm0, %v9064_v26  ;;  %6909 = vmatprep.mubr.msk.f32.mxu0 %vm380_vm0, %v2307_v12  ;;  %v2280_v26 = vld [vmem:[%s7268_s26 + $0x14b] sm:$0xff] }
  0xc3   : > { %5235 = vperm.xlu1 %7210, %v5115_v34  }
  0xc5   : > { %6848 = vmatmul.mubr.msk.f32.gmra.mxu1 %vm380_vm0, %v9065_v15  ;;  %6910 = vmatmul.mubr.msk.f32.gmra.mxu0 %vm380_vm0, %v2308_v20  ;;  %v1753_v20 = vld [vmem:[%s7268_s26 + $0x15a] sm:$0xff] }
  0xc6   : > { %6850 = vmatprep.mubr.msk.f32.mxu1 %vm380_vm0, %v9066_v46  ;;  %6912 = vmatprep.mubr.msk.f32.mxu0 %vm380_vm0, %v2309_v24  ;;  %v2281_v24 = vld [vmem:[%s7268_s26 + $0x153] sm:$0xff]  ;;  %v1795_v15 = vmax.f32 %v1753_v20, 0.0 }
  0xc7   : > { %v2323_v46 = vmax.f32 %v2281_v24, 0.0  ;;  %v5125_v24 = vld [vmem:[%s9024_s2 + $0xe8] sm:$0xff] }
  0xc9   : > { %6851 = vmatmul.mubr.msk.f32.gmra.mxu1 %vm380_vm0, %v9067_v3  ;;  %6913 = vmatmul.mubr.msk.f32.gmra.mxu0 %vm380_vm0, %v2310_v30  ;;  %v2322_v30 = vmax.f32 %v2280_v26, 0.0  ;;  %v5118_v3 = vld [vmem:[%s9024_s2 + $0xb0] sm:$0xff]  ;;  %v2780_v26 = vld [vmem:[%s7268_s26 + $0x64] sm:$0xff] }
  0xca   : > { %6853 = vmatprep.mubr.msk.f32.mxu1 %vm380_vm0, %v9068_v25  ;;  %6915 = vmatprep.mubr.msk.f32.mxu0 %vm380_vm0, %v2311_v32  ;;  %v2812_v32 = vmax.f32 %v2770_v52, 0.0  ;;  %v5126_v52 = vld [vmem:[%s9024_s2 + $0xf0] sm:$0xff] }
  0xcd   : > { %6854 = vmatmul.mubr.msk.f32.gmra.mxu1 %vm380_vm0, %v9069_v37  ;;  %6916 = vmatmul.mubr.msk.f32.gmra.mxu0 %vm380_vm0, %v2312_v40 }
  0xce   : > { %6856 = vmatprep.mubr.msk.f32.mxu1 %vm380_vm0, %v9070_v51  ;;  %6918 = vmatprep.mubr.msk.f32.mxu0 %vm380_vm0, %v2313_v42  ;;  %v2324_v42 = vmax.f32 %v2282_v33, 0.0  ;;  %v5119_v51 = vld [vmem:[%s9024_s2 + $0xb8] sm:$0xff] }
  0xd1   : > { %6857 = vmatmul.mubr.msk.f32.gmra.mxu1 %vm380_vm0, %v1260_v31  ;;  %6919 = vmatmul.mubr.msk.f32.gmra.mxu0 %vm380_vm0, %v2314_v54  ;;  %v5112_v31 = vld [vmem:[%s9024_s2 + $0x80] sm:$0xff]  ;;  %v2774_v54 = vld [vmem:[%s7268_s26 + $0x34] sm:$0xff] }
  0xd2   : > { %6859 = vmatprep.mubr.msk.f32.mxu1 %vm380_vm0, %v9071_v56  ;;  %6921 = vmatprep.mubr.msk.f32.mxu0 %vm380_vm0, %v2315_v57  ;;  %v5120_v57 = vld [vmem:[%s9024_s2 + $0xc0] sm:$0xff]  ;;  %v2816_v55 = vmax.f32 %v2774_v54, 0.0 }
  0xd3   : > { %5220 = vperm.xlu0 %7209, %v5112_v31  }
  0xd5   : > { %v7988_v59 = vpop.f32.mrf.mxu0  ;;  %v7990_v60 = vpop.f32.mrf.mxu1  ;;  %6860 = vmatmul.mubr.msk.f32.gmra.mxu1 %vm380_vm0, %v9072_v62  ;;  %6922 = vmatmul.mubr.msk.f32.gmra.mxu0 %vm380_vm0, %v2316_v19  ;;  %v2775_v19 = vld [vmem:[%s7268_s26 + $0x3c] sm:$0xff] }
  0xd6   : > { %6862 = vmatprep.mubr.msk.f32.mxu1 %vm380_vm0, %v9073_v2  ;;  %6924 = vmatprep.mubr.msk.f32.mxu0 %vm380_vm0, %v2317_v5  ;;  %v2817_v62 = vmax.f32 %v2775_v19, 0.0  ;;  %v2777_v2 = vld [vmem:[%s7268_s26 + $0x4c] sm:$0xff] }
  0xd7   : > { %v8002_v27 = vpop.f32.mrf.mxu0  ;;  %v8004_v8 = vpop.f32.mrf.mxu1  ;;  %5230 = vperm.xlu0 %7209, %v5114_v22  }
  0xd9   : > { %v8013_v12 = vpop.f32.mrf.mxu0  ;;  %v8015_v14 = vpop.f32.mrf.mxu1  ;;  %6863 = vmatmul.mubr.msk.f32.gmra.mxu1 %vm380_vm0, %v1264_v11  ;;  %6925 = vmatmul.mubr.msk.f32.gmra.mxu0 %vm380_vm0, %v2318_v0  ;;  %v5116_v11 = vld [vmem:[%s9024_s2 + $0xa0] sm:$0xff]  ;;  %v2818_v0 = vmax.f32 %v2776_v58, 0.0 }
  0xda   : > { %6865 = vmatprep.mubr.msk.f32.mxu1 %vm380_vm0, %v9074_v41  ;;  %6927 = vmatprep.mubr.msk.f32.mxu0 %vm380_vm0, %v2319_v4  ;;  %v2820_v41 = vmax.f32 %v2778_v6, 0.0  ;;  %v2786_v6 = vld [vmem:[%s7268_s26 + $0x94] sm:$0xff] }
  0xdb   : > { %v8028_v28 = vpop.f32.mrf.mxu0  ;;  %v8030_v13 = vpop.f32.mrf.mxu1  ;;  %5240 = vperm.xlu0 %7209, %v5116_v11  }
  0xdd   : > { %v8039_v7 = vpop.f32.mrf.mxu0  ;;  %v8041_v29 = vpop.f32.mrf.mxu1  ;;  %6866 = vmatmul.mubr.msk.f32.gmra.mxu1 %vm380_vm0, %v1266_v36  ;;  %6928 = vmatmul.mubr.msk.f32.gmra.mxu0 %vm380_vm0, %v2320_v16  ;;  %v5117_v36 = vld [vmem:[%s9024_s2 + $0xa8] sm:$0xff]  ;;  %v2819_v16 = vmax.f32 %v2777_v2, 0.0 }
  0xde   : > { %6868 = vmatprep.mubr.msk.f32.mxu1 %vm380_vm0, %v1794_v18  ;;  %6930 = vmatprep.mubr.msk.f32.mxu0 %vm380_vm0, %v2321_v48  ;;  %v2779_v18 = vld [vmem:[%s7268_s26 + $0x5c] sm:$0xff] }
  0xdf   : > { %v8051_v43 = vpop.f32.mrf.mxu0  ;;  %v8053_v45 = vpop.f32.mrf.mxu1  ;;  %5245 = vperm.xlu1 %7210, %v5117_v36   ;;  %5250 = vperm.xlu0 %7209, %v5118_v3   ;;  %v5128_v36 = vld [vmem:[%s9024_s2 + $0x100] sm:$0xff] }
  0xe1   : > { %v8062_v40 = vpop.f32.mrf.mxu0  ;;  %v8064_v25 = vpop.f32.mrf.mxu1  ;;  %6869 = vmatmul.mubr.msk.f32.gmra.mxu1 %vm380_vm0, %v1795_v15  ;;  %6931 = vmatmul.mubr.msk.f32.gmra.mxu0 %vm380_vm0, %v2322_v30  ;;  %v2821_v15 = vmax.f32 %v2779_v18, 0.0  ;;  %v2822_v30 = vmax.f32 %v2780_v26, 0.0 }
  0xe2   : > { %6933 = vmatprep.mubr.msk.f32.mxu0 %vm380_vm0, %v2323_v46  ;;  %6938 = vmatprep.mubr.msk.f32.mxu1 %vm380_vm0, %v2812_v32  ;;  %v2781_v46 = vld [vmem:[%s7268_s26 + $0x6c] sm:$0xff] }
  0xe3   : > { %v8071_v49 = vpop.f32.mrf.mxu0  ;;  %v8073_v37 = vpop.f32.mrf.mxu1  ;;  %5255 = vperm.xlu1 %7210, %v5119_v51   ;;  %5260 = vperm.xlu0 %7209, %v5120_v57   ;;  %v2784_v57 = vld [vmem:[%s7268_s26 + $0x84] sm:$0xff] }
  0xe5   : > { %v8082_v21 = vpop.f32.mrf.mxu0  ;;  %v8084_v53 = vpop.f32.mrf.mxu1  ;;  %6934 = vmatmul.mubr.msk.f32.gmra.mxu0 %vm380_vm0, %v2324_v42  ;;  %6939 = vmatmul.mubr.msk.f32.vlgmr.msra.gmra.mxu1 %vm380_vm0, %v2813_v39  ;;  %v2823_v39 = vmax.f32 %v2781_v46, 0.0  ;;  %v2788_v46 = vld [vmem:[%s7268_s26 + $0xa4] sm:$0xff] }
  0xe6   : > { %7067 = vmatpush3.msra.mxu1 %v7754_v63  ;;  %6941 = vmatprep.mubr.msk.f32.mxu1 %vm380_vm0, %v2814_v47  ;;  %v5122_v63 = vld [vmem:[%s9024_s2 + $0xd0] sm:$0xff] }
  0xe7   : > { %v8091_v56 = vpop.f32.mrf.mxu0  ;;  %v8093_v5 = vpop.f32.mrf.mxu1  ;;  %7003 = vmatprep.mubr.msk.f32.mxu0 %vm380_vm0, %v2814_v47  ;;  %5265 = vperm.xlu1 %7210, %v5121_v9   ;;  %v2824_v47 = vmax.f32 %v2782_v38, 0.0  ;;  %v2825_v9 = vmax.f32 %v2783_v35, 0.0  ;;  %v5133_v38 = vld [vmem:[%s9024_s2 + $0x128] sm:$0xff] }
  0xe8   : > { %5270 = vperm.xlu0 %7209, %v5122_v63   ;;  %v2826_v63 = vmax.f32 %v2784_v57, 0.0 }
  0xe9   : > { %v8103_v1 = vpop.f32.mrf.mxu0  ;;  %v8105_v31 = vpop.f32.mrf.mxu1  ;;  %6942 = vmatmul.mubr.msk.f32.gmra.mxu1 %vm380_vm0, %v2815_v17  ;;  %7004 = vmatmul.mubr.msk.f32.vlgmr.msra.gmra.mxu0 %vm380_vm0, %v2815_v17  ;;  %v5129_v17 = vld [vmem:[%s9024_s2 + $0x108] sm:$0xff] }
  0xea   : > { %7132 = vmatpush3.msra.mxu0 %v7773_v44  ;;  %6944 = vmatprep.mubr.msk.f32.mxu1 %vm380_vm0, %v2816_v55  ;;  %v5124_v44 = vld [vmem:[%s9024_s2 + $0xe0] sm:$0xff] }
  0xeb   : > { %v8112_v4 = vpop.f32.mrf.mxu0  ;;  %v8114_v23 = vpop.f32.mrf.mxu1  ;;  %7006 = vmatprep.mubr.msk.f32.mxu0 %vm380_vm0, %v2816_v55  ;;  %5275 = vperm.xlu1 %7210, %v5123_v50   ;;  %v5130_v55 = vld [vmem:[%s9024_s2 + $0x110] sm:$0xff]  ;;  %v5131_v50 = vld [vmem:[%s9024_s2 + $0x118] sm:$0xff] }
  0xec   : > { %5280 = vperm.xlu0 %7209, %v5124_v44   ;;  %v5132_v44 = vld [vmem:[%s9024_s2 + $0x120] sm:$0xff] }
  0xed   : > { %v8124_v10 = vpop.f32.mrf.mxu0  ;;  %v8126_v22 = vpop.f32.mrf.mxu1  ;;  %6945 = vmatmul.mubr.msk.f32.gmra.mxu1 %vm380_vm0, %v2817_v62  ;;  %7007 = vmatmul.mubr.msk.f32.gmra.mxu0 %vm380_vm0, %v2817_v62  ;;  %v2785_v62 = vld [vmem:[%s7268_s26 + $0x8c] sm:$0xff] }
  0xee   : > { %6947 = vmatprep.mubr.msk.f32.mxu1 %vm380_vm0, %v2818_v0  ;;  %7009 = vmatprep.mubr.msk.f32.mxu0 %vm380_vm0, %v2818_v0  ;;  %v2827_v18 = vmax.f32 %v2785_v62, 0.0  ;;  %v5135_v62 = vld [vmem:[%s9024_s2 + $0x138] sm:$0xff] }
  0xef   : > { %v8133_v48 = vpop.f32.mrf.mxu0  ;;  %v8135_v20 = vpop.f32.mrf.mxu1  ;;  %5285 = vperm.xlu1 %7210, %v5125_v24   ;;  %v2828_v24 = vmax.f32 %v2786_v6, 0.0 }
  0xf0   : > { %5290 = vperm.xlu0 %7209, %v5126_v52   ;;  %v2787_v52 = vld [vmem:[%s7268_s26 + $0x9c] sm:$0xff] }
  0xf1   : > { %v8144_v34 = vpop.f32.mrf.mxu0  ;;  %v8146_v11 = vpop.f32.mrf.mxu1  ;;  %6948 = vmatmul.mubr.msk.f32.gmra.mxu1 %vm380_vm0, %v2819_v16  ;;  %7010 = vmatmul.mubr.msk.f32.gmra.mxu0 %vm380_vm0, %v2819_v16 }
  0xf2   : > { %6950 = vmatprep.mubr.msk.f32.mxu1 %vm380_vm0, %v2820_v41  ;;  %7012 = vmatprep.mubr.msk.f32.mxu0 %vm380_vm0, %v2820_v41 }
  0xf3   : > { %v8153_v32 = vpop.f32.mrf.mxu0  ;;  %v8155_v33 = vpop.f32.mrf.mxu1  ;;  %5295 = vperm.xlu1 %7210, %v5127_v61   ;;  %v5134_v61 = vld [vmem:[%s9024_s2 + $0x130] sm:$0xff] }
  0xf4   : > { %5300 = vperm.xlu0 %7209, %v5128_v36  }
  0xf5   : > { %v8164_v3 = vpop.f32.mrf.mxu0  ;;  %v8166_v42 = vpop.f32.mrf.mxu1  ;;  %6951 = vmatmul.mubr.msk.f32.gmra.mxu1 %vm380_vm0, %v2821_v15  ;;  %7013 = vmatmul.mubr.msk.f32.gmra.mxu0 %vm380_vm0, %v2821_v15 }
  0xf6   : > { %6953 = vmatprep.mubr.msk.f32.mxu1 %vm380_vm0, %v2822_v30  ;;  %7015 = vmatprep.mubr.msk.f32.mxu0 %vm380_vm0, %v2822_v30 }
  0xf7   : > { %v8173_v54 = vpop.f32.mrf.mxu0  ;;  %v8175_v51 = vpop.f32.mrf.mxu1  ;;  %5305 = vperm.xlu1 %7210, %v5129_v17   ;;  %v2830_v17 = vmax.f32 %v2788_v46, 0.0 }
  0xf8   : > { %5310 = vperm.xlu0 %7209, %v5130_v55  }
  0xf9   : > { %v8184_v19 = vpop.f32.mrf.mxu0  ;;  %v8186_v58 = vpop.f32.mrf.mxu1  ;;  %6954 = vmatmul.mubr.msk.f32.gmra.mxu1 %vm380_vm0, %v2823_v39  ;;  %7016 = vmatmul.mubr.msk.f32.gmra.mxu0 %vm380_vm0, %v2823_v39 }
  0xfa   : > { %6956 = vmatprep.mubr.msk.f32.mxu1 %vm380_vm0, %v2824_v47  ;;  %7018 = vmatprep.mubr.msk.f32.mxu0 %vm380_vm0, %v2824_v47  ;;  %v2829_v47 = vmax.f32 %v2787_v52, 0.0  ;;  %v2791_v52 = vld [vmem:[%s7268_s26 + $0xbc] sm:$0xff] }
  0xfb   : > { %v8193_v0 = vpop.f32.mrf.mxu0  ;;  %v8195_v2 = vpop.f32.mrf.mxu1  ;;  %5315 = vperm.xlu1 %7210, %v5131_v50  }
  0xfc   : > { %5320 = vperm.xlu0 %7209, %v5132_v44  }
  0xfd   : > { %v8204_v16 = vpop.f32.mrf.mxu0  ;;  %v6680_v41 = vpop.f32.mrf.mxu1  ;;  %6957 = vmatmul.mubr.msk.f32.gmra.mxu1 %vm380_vm0, %v2825_v9  ;;  %7019 = vmatmul.mubr.msk.f32.gmra.mxu0 %vm380_vm0, %v2825_v9 }
  0xfe   : > { %v980_v26 = vadd.f32 %v6680_v41, %v7988_v59  ;;  %6959 = vmatprep.mubr.msk.f32.mxu1 %vm380_vm0, %v2826_v63  ;;  %7021 = vmatprep.mubr.msk.f32.mxu0 %vm380_vm0, %v2826_v63  ;;  %v2790_v63 = vld [vmem:[%s7268_s26 + $0xb4] sm:$0xff] }
  0xff   : > { %v8212_v15 = vpop.f32.mrf.mxu0  ;;  %v974_v30 = vpop.f32.mrf.mxu1  ;;  %5325 = vperm.xlu1 %7210, %v5133_v38   ;;  %v2792_v38 = vld [vmem:[%s7268_s26 + $0xc4] sm:$0xff] }
 0x100   : > { %v975_v59 = vadd.f32 %v974_v30, %v8002_v27  ;;  %5330 = vperm.xlu0 %7209, %v5134_v61   ;;  %v2789_v27 = vld [vmem:[%s7268_s26 + $0xac] sm:$0xff] }
 0x101   : > { %v6683_v36 = vpop.f32.mrf.mxu1  ;;  %v6745_v39 = vpop.f32.mrf.mxu0  ;;  %6960 = vmatmul.mubr.msk.f32.gmra.mxu1 %vm380_vm0, %v2827_v18  ;;  %7022 = vmatmul.mubr.msk.f32.gmra.mxu0 %vm380_vm0, %v2827_v18  ;;  %v2831_v18 = vmax.f32 %v2789_v27, 0.0  ;;  %v5137_v61 = vld [vmem:[%s9024_s2 + $0x148] sm:$0xff] }
 0x102   : > { %v990_v35 = vadd.f32 %v6683_v36, %v8013_v12  ;;  %v8225_v57 = vadd.f32 %v6745_v39, %v980_v26  ;;  %6962 = vmatprep.mubr.msk.f32.mxu1 %vm380_vm0, %v2828_v24  ;;  %7024 = vmatprep.mubr.msk.f32.mxu0 %vm380_vm0, %v2828_v24  ;;  %v5136_v12 = vld [vmem:[%s9024_s2 + $0x140] sm:$0xff]  ;;  %v2793_v27 = vld [vmem:[%s7268_s26 + $0xcc] sm:$0xff] }
 0x103   : > { %v984_v55 = vpop.f32.mrf.mxu1  ;;  %v1461_v9 = vpop.f32.mrf.mxu0  ;;  %5335 = vperm.xlu1 %7210, %v5135_v62  }
 0x104   : > { %v985_v6 = vadd.f32 %v984_v55, %v8028_v28  ;;  %v8238_v50 = vadd.f32 %v1461_v9, %v975_v59  ;;  %5340 = vperm.xlu0 %7209, %v5136_v12   ;;  %v2832_v28 = vmax.f32 %v2790_v63, 0.0  ;;  %v2794_v63 = vld [vmem:[%s7268_s26 + $0xd4] sm:$0xff] }
 0x105   : > { %v6686_v44 = vpop.f32.mrf.mxu1  ;;  %v6748_v41 = vpop.f32.mrf.mxu0  ;;  %6963 = vmatmul.mubr.msk.f32.gmra.mxu1 %vm380_vm0, %v2829_v47  ;;  %7025 = vmatmul.mubr.msk.f32.gmra.mxu0 %vm380_vm0, %v2829_v47  ;;  %v2833_v47 = vmax.f32 %v2791_v52, 0.0 }
 0x106   : > { %v1000_v26 = vadd.f32 %v6686_v44, %v8039_v7  ;;  %v8243_v24 = vadd.f32 %v6748_v41, %v990_v35  ;;  %6965 = vmatprep.mubr.msk.f32.mxu1 %vm380_vm0, %v2830_v17  ;;  %7027 = vmatprep.mubr.msk.f32.mxu0 %vm380_vm0, %v2830_v17 }
 0x107   : > { %v994_v30 = vpop.f32.mrf.mxu1  ;;  %v1471_v46 = vpop.f32.mrf.mxu0  ;;  %5345 = vperm.xlu1 %7210, %v5137_v61  }
 0x108   : > { %v995_v59 = vadd.f32 %v994_v30, %v8051_v43  ;;  %v8253_v7 = vadd.f32 %v1471_v46, %v985_v6  ;;  %v2834_v43 = vmax.f32 %v2792_v38, 0.0  ;;  %v2796_v30 = vld [vmem:[%s7268_s26 + $0xe4] sm:$0xff] }
 0x109   : > { %v6689_v36 = vpop.f32.mrf.mxu1  ;;  %v6751_v39 = vpop.f32.mrf.mxu0  ;;  %6966 = vmatmul.mubr.msk.f32.gmra.mxu1 %vm380_vm0, %v2831_v18  ;;  %7028 = vmatmul.mubr.msk.f32.gmra.mxu0 %vm380_vm0, %v2831_v18 }
 0x10a   : > { %v1010_v35 = vadd.f32 %v6689_v36, %v8062_v40  ;;  %v8258_v17 = vadd.f32 %v6751_v39, %v1000_v26  ;;  %6968 = vmatprep.mubr.msk.f32.mxu1 %vm380_vm0, %v2832_v28  ;;  %7030 = vmatprep.mubr.msk.f32.mxu0 %vm380_vm0, %v2832_v28  ;;  %v2835_v40 = vmax.f32 %v2793_v27, 0.0  ;;  %v2836_v26 = vmax.f32 %v2794_v63, 0.0  ;;  %v2795_v28 = vld [vmem:[%s7268_s26 + $0xdc] sm:$0xff]  ;;  %v2798_v27 = vld [vmem:[%s7268_s26 + $0xf4] sm:$0xff] }
 0x10b   : > { %v1004_v55 = vpop.f32.mrf.mxu1  ;;  %v1481_v9 = vpop.f32.mrf.mxu0 }
 0x10c   : > { %v1005_v62 = vadd.f32 %v1004_v55, %v8071_v49  ;;  %v8265_v12 = vadd.f32 %v1481_v9, %v995_v59 }
 0x10d   : > { %v6692_v6 = vpop.f32.mrf.mxu1  ;;  %v6754_v44 = vpop.f32.mrf.mxu0  ;;  %6969 = vmatmul.mubr.msk.f32.gmra.mxu1 %vm380_vm0, %v2833_v47  ;;  %7031 = vmatmul.mubr.msk.f32.gmra.mxu0 %vm380_vm0, %v2833_v47  ;;  %v2838_v47 = vmax.f32 %v2796_v30, 0.0 }
 0x10e   : > { %v1020_v41 = vadd.f32 %v6692_v6, %v8082_v21  ;;  %v8270_v18 = vadd.f32 %v6754_v44, %v1010_v35  ;;  %6971 = vmatprep.mubr.msk.f32.mxu1 %vm380_vm0, %v2834_v43  ;;  %7033 = vmatprep.mubr.msk.f32.mxu0 %vm380_vm0, %v2834_v43  ;;  %v2837_v21 = vmax.f32 %v2795_v28, 0.0  ;;  %v2797_v35 = vld [vmem:[%s7268_s26 + $0xec] sm:$0xff]  ;;  %v2800_v28 = vld [vmem:[%s7268_s26 + $0x104] sm:$0xff] }
 0x10f   : > { %v1014_v49 = vpop.f32.mrf.mxu1  ;;  %v1491_v52 = vpop.f32.mrf.mxu0 }
 0x110   : > { %v1015_v46 = vadd.f32 %v1014_v49, %v8091_v56  ;;  %v8277_v38 = vadd.f32 %v1491_v52, %v1005_v62 }
 0x111   : > { %v6695_v61 = vpop.f32.mrf.mxu1  ;;  %v6757_v59 = vpop.f32.mrf.mxu0  ;;  %6972 = vmatmul.mubr.msk.f32.gmra.mxu1 %vm380_vm0, %v2835_v40  ;;  %7034 = vmatmul.mubr.msk.f32.gmra.mxu0 %vm380_vm0, %v2835_v40  ;;  %v2840_v40 = vmax.f32 %v2798_v27, 0.0 }
 0x112   : > { %v1030_v36 = vadd.f32 %v6695_v61, %v8103_v1  ;;  %v8282_v39 = vadd.f32 %v6757_v59, %v1020_v41  ;;  %6974 = vmatprep.mubr.msk.f32.mxu1 %vm380_vm0, %v2836_v26  ;;  %7036 = vmatprep.mubr.msk.f32.mxu0 %vm380_vm0, %v2836_v26  ;;  %v2839_v1 = vmax.f32 %v2797_v35, 0.0  ;;  %v2799_v41 = vld [vmem:[%s7268_s26 + $0xfc] sm:$0xff]  ;;  %v2802_v35 = vld [vmem:[%s7268_s26 + $0x114] sm:$0xff] }
 0x113   : > { %v1024_v56 = vpop.f32.mrf.mxu1  ;;  %v1501_v43 = vpop.f32.mrf.mxu0 }
 0x114   : > { %v1025_v55 = vadd.f32 %v1024_v56, %v8112_v4  ;;  %v8289_v9 = vadd.f32 %v1501_v43, %v1015_v46 }
 0x115   : > { %v6698_v63 = vpop.f32.mrf.mxu1  ;;  %v6760_v62 = vpop.f32.mrf.mxu0  ;;  %6975 = vmatmul.mubr.msk.f32.gmra.mxu1 %vm380_vm0, %v2837_v21  ;;  %7037 = vmatmul.mubr.msk.f32.gmra.mxu0 %vm380_vm0, %v2837_v21  ;;  %v2842_v21 = vmax.f32 %v2800_v28, 0.0 }
 0x116   : > { %v1040_v6 = vadd.f32 %v6698_v63, %v8124_v10  ;;  %v8294_v44 = vadd.f32 %v6760_v62, %v1030_v36  ;;  %6977 = vmatprep.mubr.msk.f32.mxu1 %vm380_vm0, %v2838_v47  ;;  %7039 = vmatprep.mubr.msk.f32.mxu0 %vm380_vm0, %v2838_v47  ;;  %v2841_v10 = vmax.f32 %v2799_v41, 0.0  ;;  %v2801_v36 = vld [vmem:[%s7268_s26 + $0x10c] sm:$0xff]  ;;  %v2804_v41 = vld [vmem:[%s7268_s26 + $0x124] sm:$0xff] }
 0x117   : > { %v1034_v4 = vpop.f32.mrf.mxu1  ;;  %v1511_v26 = vpop.f32.mrf.mxu0 }
 0x118   : > { %v1035_v49 = vadd.f32 %v1034_v4, %v8133_v48  ;;  %v8301_v52 = vadd.f32 %v1511_v26, %v1025_v55 }
 0x119   : > { %v6701_v30 = vpop.f32.mrf.mxu1  ;;  %v6763_v46 = vpop.f32.mrf.mxu0  ;;  %6978 = vmatmul.mubr.msk.f32.gmra.mxu1 %vm380_vm0, %v2839_v1  ;;  %7040 = vmatmul.mubr.msk.f32.gmra.mxu0 %vm380_vm0, %v2839_v1  ;;  %v2844_v1 = vmax.f32 %v2802_v35, 0.0 }
 0x11a   : > { %v1050_v61 = vadd.f32 %v6701_v30, %v8144_v34  ;;  %v8306_v59 = vadd.f32 %v6763_v46, %v1040_v6  ;;  %6980 = vmatprep.mubr.msk.f32.mxu1 %vm380_vm0, %v2840_v40  ;;  %7042 = vmatprep.mubr.msk.f32.mxu0 %vm380_vm0, %v2840_v40  ;;  %v2843_v34 = vmax.f32 %v2801_v36, 0.0  ;;  %v2803_v6 = vld [vmem:[%s7268_s26 + $0x11c] sm:$0xff]  ;;  %v2806_v36 = vld [vmem:[%s7268_s26 + $0x134] sm:$0xff] }
 0x11b   : > { %v1044_v48 = vpop.f32.mrf.mxu1  ;;  %v1521_v47 = vpop.f32.mrf.mxu0 }
 0x11c   : > { %v1045_v56 = vadd.f32 %v1044_v48, %v8153_v32  ;;  %v8313_v43 = vadd.f32 %v1521_v47, %v1035_v49 }
 0x11d   : > { %v6704_v27 = vpop.f32.mrf.mxu1  ;;  %v6766_v55 = vpop.f32.mrf.mxu0  ;;  %6981 = vmatmul.mubr.msk.f32.gmra.mxu1 %vm380_vm0, %v2841_v10  ;;  %7043 = vmatmul.mubr.msk.f32.gmra.mxu0 %vm380_vm0, %v2841_v10  ;;  %v2846_v10 = vmax.f32 %v2804_v41, 0.0 }
 0x11e   : > { %v1060_v63 = vadd.f32 %v6704_v27, %v8164_v3  ;;  %v8318_v62 = vadd.f32 %v6766_v55, %v1050_v61  ;;  %6983 = vmatprep.mubr.msk.f32.mxu1 %vm380_vm0, %v2842_v21  ;;  %7045 = vmatprep.mubr.msk.f32.mxu0 %vm380_vm0, %v2842_v21  ;;  %v2845_v3 = vmax.f32 %v2803_v6, 0.0  ;;  %v2805_v61 = vld [vmem:[%s7268_s26 + $0x12c] sm:$0xff]  ;;  %v2808_v6 = vld [vmem:[%s7268_s26 + $0x144] sm:$0xff] }
 0x11f   : > { %v1054_v32 = vpop.f32.mrf.mxu1  ;;  %v1531_v40 = vpop.f32.mrf.mxu0 }
 0x120   : > { %v1055_v4 = vadd.f32 %v1054_v32, %v8173_v54  ;;  %v8325_v26 = vadd.f32 %v1531_v40, %v1045_v56 }
 0x121   : > { %v6707_v28 = vpop.f32.mrf.mxu1  ;;  %v6769_v49 = vpop.f32.mrf.mxu0  ;;  %6984 = vmatmul.mubr.msk.f32.gmra.mxu1 %vm380_vm0, %v2843_v34  ;;  %7046 = vmatmul.mubr.msk.f32.gmra.mxu0 %vm380_vm0, %v2843_v34  ;;  %v2848_v34 = vmax.f32 %v2806_v36, 0.0 }
 0x122   : > { %v1070_v30 = vadd.f32 %v6707_v28, %v8184_v19  ;;  %v8330_v46 = vadd.f32 %v6769_v49, %v1060_v63  ;;  %6986 = vmatprep.mubr.msk.f32.mxu1 %vm380_vm0, %v2844_v1  ;;  %7048 = vmatprep.mubr.msk.f32.mxu0 %vm380_vm0, %v2844_v1  ;;  %v2847_v19 = vmax.f32 %v2805_v61, 0.0  ;;  %v2850_v49 = vmax.f32 %v2808_v6, 0.0 }
 0x123   : > { %v1064_v54 = vpop.f32.mrf.mxu1  ;;  %v1541_v21 = vpop.f32.mrf.mxu0 }
 0x124   : > { %v1065_v48 = vadd.f32 %v1064_v54, %v8193_v0  ;;  %v8337_v47 = vadd.f32 %v1541_v21, %v1055_v4  ;;  %v2807_v0 = vld [vmem:[%s7268_s26 + $0x13c] sm:$0xff] }
 0x125   : > { %v6710_v35 = vpop.f32.mrf.mxu1  ;;  %v6772_v56 = vpop.f32.mrf.mxu0  ;;  %6987 = vmatmul.mubr.msk.f32.gmra.mxu1 %vm380_vm0, %v2845_v3  ;;  %7049 = vmatmul.mubr.msk.f32.gmra.mxu0 %vm380_vm0, %v2845_v3  ;;  %v2809_v3 = vld [vmem:[%s7268_s26 + $0x14c] sm:$0xff] }
 0x126   : > { %v1080_v27 = vadd.f32 %v6710_v35, %v8204_v16  ;;  %v8342_v55 = vadd.f32 %v6772_v56, %v1070_v30  ;;  %6989 = vmatprep.mubr.msk.f32.mxu1 %vm380_vm0, %v2846_v10  ;;  %7051 = vmatprep.mubr.msk.f32.mxu0 %vm380_vm0, %v2846_v10  ;;  %v2849_v16 = vmax.f32 %v2807_v0, 0.0  ;;  %v2810_v10 = vld [vmem:[%s7268_s26 + $0x154] sm:$0xff]  ;;  %v3339_v0 = vld [vmem:[%s7268_s26 + $0x164] sm:$0xff] }
 0x127   : > { %v1074_v63 = vpop.f32.mrf.mxu1  ;;  %v1551_v1 = vpop.f32.mrf.mxu0 }
 0x128   : > { %v1075_v32 = vadd.f32 %v1074_v63, %v8212_v15  ;;  %v8349_v40 = vadd.f32 %v1551_v1, %v1065_v48  ;;  %v2851_v48 = vmax.f32 %v2809_v3, 0.0  ;;  %v3828_v63 = vld [vmem:[%s7268_s26 + $0x25] sm:$0xff] }
 0x129   : > { %v6713_v41 = vpop.f32.mrf.mxu1  ;;  %v6775_v4 = vpop.f32.mrf.mxu0  ;;  %6990 = vmatmul.mubr.msk.f32.gmra.mxu1 %vm380_vm0, %v2847_v19  ;;  %7052 = vmatmul.mubr.msk.f32.gmra.mxu0 %vm380_vm0, %v2847_v19  ;;  %v2852_v19 = vmax.f32 %v2810_v10, 0.0  ;;  %v3340_v3 = vld [vmem:[%s7268_s26 + $0x16c] sm:$0xff] }
 0x12a   : > { %v8353_v28 = vadd.f32 %v6775_v4, %v1080_v27  ;;  %6992 = vmatprep.mubr.msk.f32.mxu1 %vm380_vm0, %v2848_v34  ;;  %7054 = vmatprep.mubr.msk.f32.mxu0 %vm380_vm0, %v2848_v34  ;;  %v1090_v61 = vadd.f32 %v6713_v41, %v7990_v60  ;;  %v2811_v60 = vld [vmem:[%s7268_s26 + $0x15c] sm:$0xff] }
 0x12b   : > { %v1084_v30 = vpop.f32.mrf.mxu1  ;;  %v1561_v15 = vpop.f32.mrf.mxu0  ;;  %v2853_v41 = vmax.f32 %v2811_v60, 0.0 }
 0x12c   : > { %v8360_v54 = vadd.f32 %v1561_v15, %v1075_v32  ;;  %v1085_v35 = vadd.f32 %v1084_v30, %v8004_v8  ;;  %v3829_v30 = vld [vmem:[%s7268_s26 + $0x2d] sm:$0xff] }
 0x12d   : > { %v6716_v21 = vpop.f32.mrf.mxu1  ;;  %v6778_v36 = vpop.f32.mrf.mxu0  ;;  %6993 = vmatmul.mubr.msk.f32.gmra.mxu1 %vm380_vm0, %v2849_v16  ;;  %7055 = vmatmul.mubr.msk.f32.gmra.mxu0 %vm380_vm0, %v2849_v16  ;;  %v3871_v60 = vmax.f32 %v3829_v30, 0.0 }
 0x12e   : > { %v8365_v56 = vadd.f32 %v6778_v36, %v1090_v61  ;;  %6995 = vmatprep.mubr.msk.f32.mxu1 %vm380_vm0, %v2850_v49  ;;  %7057 = vmatprep.mubr.msk.f32.mxu0 %vm380_vm0, %v2850_v49  ;;  %v1100_v1 = vadd.f32 %v6716_v21, %v8015_v14  ;;  %v3381_v14 = vmax.f32 %v3339_v0, 0.0  ;;  %v3870_v49 = vmax.f32 %v3828_v63, 0.0  ;;  %v3830_v61 = vld [vmem:[%s7268_s26 + $0x35] sm:$0xff]  ;;  %v4357_v21 = vld [vmem:[%s7268_s26 + $0x26] sm:$0xff]  ;;  %v3831_v63 = vld [vmem:[%s7268_s26 + $0x3d] sm:$0xff] }
 0x12f   : > { %v1094_v27 = vpop.f32.mrf.mxu1  ;;  %v1571_v34 = vpop.f32.mrf.mxu0  ;;  %v4399_v0 = vmax.f32 %v4357_v21, 0.0 }
 0x130   : > { %v8373_v6 = vadd.f32 %v1571_v34, %v1085_v35  ;;  %v1095_v4 = vadd.f32 %v1094_v27, %v8030_v13 }
 0x131   : > { %v6719_v8 = vpop.f32.mrf.mxu1  ;;  %v6781_v32 = vpop.f32.mrf.mxu0  ;;  %6996 = vmatmul.mubr.msk.f32.gmra.mxu1 %vm380_vm0, %v2851_v48  ;;  %7058 = vmatmul.mubr.msk.f32.gmra.mxu0 %vm380_vm0, %v2851_v48 }
 0x132   : > { %v8378_v16 = vadd.f32 %v6781_v32, %v1100_v1  ;;  %6998 = vmatprep.mubr.msk.f32.mxu1 %vm380_vm0, %v2852_v19  ;;  %7060 = vmatprep.mubr.msk.f32.mxu0 %vm380_vm0, %v2852_v19  ;;  %v1110_v36 = vadd.f32 %v6719_v8, %v8041_v29  ;;  %v3382_v19 = vmax.f32 %v3340_v3, 0.0  ;;  %v3872_v29 = vmax.f32 %v3830_v61, 0.0  ;;  %v4358_v1 = vld [vmem:[%s7268_s26 + $0x2e] sm:$0xff] }
 0x133   : > { %v1104_v15 = vpop.f32.mrf.mxu1  ;;  %v1581_v10 = vpop.f32.mrf.mxu0 }
 0x134   : > { %v8387_v48 = vadd.f32 %v1581_v10, %v1095_v4  ;;  %v1105_v27 = vadd.f32 %v1104_v15, %v8053_v45  ;;  %v3832_v4 = vld [vmem:[%s7268_s26 + $0x45] sm:$0xff]  ;;  %v4359_v10 = vld [vmem:[%s7268_s26 + $0x36] sm:$0xff] }
 0x135   : > { %v6722_v13 = vpop.f32.mrf.mxu1  ;;  %v6784_v35 = vpop.f32.mrf.mxu0  ;;  %6999 = vmatmul.mubr.msk.f32.gmra.mxu1 %vm380_vm0, %v2853_v41  ;;  %7061 = vmatmul.mubr.msk.f32.gmra.mxu0 %vm380_vm0, %v2853_v41  ;;  %v4401_v21 = vmax.f32 %v4359_v10, 0.0 }
 0x136   : > { %v8392_v34 = vadd.f32 %v6784_v35, %v1110_v36  ;;  %7063 = vmatprep.mubr.msk.f32.mxu0 %vm380_vm0, %v3381_v14  ;;  %7068 = vmatprep.mubr.msk.f32.mxu1 %vm380_vm0, %v3870_v49  ;;  %v1120_v41 = vadd.f32 %v6722_v13, %v8064_v25  ;;  %v3873_v14 = vmax.f32 %v3831_v63, 0.0  ;;  %v4400_v49 = vmax.f32 %v4358_v1, 0.0  ;;  %v3833_v36 = vld [vmem:[%s7268_s26 + $0x4d] sm:$0xff]  ;;  %v4360_v13 = vld [vmem:[%s7268_s26 + $0x3e] sm:$0xff] }
 0x137   : > { %v1114_v8 = vpop.f32.mrf.mxu1  ;;  %v1591_v32 = vpop.f32.mrf.mxu0  ;;  %v3874_v25 = vmax.f32 %v3832_v4, 0.0 }
 0x138   : > { %v8401_v3 = vadd.f32 %v1591_v32, %v1105_v27  ;;  %v1115_v15 = vadd.f32 %v1114_v8, %v8073_v37  ;;  %v3834_v32 = vld [vmem:[%s7268_s26 + $0x55] sm:$0xff] }
 0x139   : > { %v6725_v45 = vpop.f32.mrf.mxu1  ;;  %v6787_v30 = vpop.f32.mrf.mxu0  ;;  %7064 = vmatmul.mubr.msk.f32.gmra.mxu0 %vm380_vm0, %v3382_v19  ;;  %7069 = vmatmul.mubr.msk.f32.vlgmr.msra.gmra.mxu1 %vm380_vm0, %v3871_v60  ;;  %v4361_v19 = vld [vmem:[%s7268_s26 + $0x46] sm:$0xff] }
 0x13a   : > { %v8406_v61 = vadd.f32 %v6787_v30, %v1120_v41  ;;  %7071 = vmatprep.mubr.msk.f32.mxu1 %vm380_vm0, %v3872_v29  ;;  %7133 = vmatprep.mubr.msk.f32.mxu0 %vm380_vm0, %v4399_v0  ;;  %v1130_v60 = vadd.f32 %v6725_v45, %v8084_v53  ;;  %v3875_v29 = vmax.f32 %v3833_v36, 0.0  ;;  %v4402_v0 = vmax.f32 %v4360_v13, 0.0  ;;  %v3835_v41 = vld [vmem:[%s7268_s26 + $0x5d] sm:$0xff]  ;;  %v4362_v45 = vld [vmem:[%s7268_s26 + $0x4e] sm:$0xff] }
 0x13b   : > { %v1124_v35 = vpop.f32.mrf.mxu1  ;;  %v1601_v27 = vpop.f32.mrf.mxu0  ;;  %v3876_v53 = vmax.f32 %v3834_v32, 0.0  ;;  %v4403_v10 = vmax.f32 %v4361_v19, 0.0 }
 0x13c   : > { %v8415_v63 = vadd.f32 %v1601_v27, %v1115_v15  ;;  %v1125_v8 = vadd.f32 %v1124_v35, %v8093_v5  ;;  %v3836_v27 = vld [vmem:[%s7268_s26 + $0x65] sm:$0xff] }
 0x13d   : > { %v6728_v37 = vpop.f32.mrf.mxu1  ;;  %v6790_v1 = vpop.f32.mrf.mxu0  ;;  %7072 = vmatmul.mubr.msk.f32.gmra.mxu1 %vm380_vm0, %v3873_v14  ;;  %7134 = vmatmul.mubr.msk.f32.vlgmr.msra.gmra.mxu0 %vm380_vm0, %v4400_v49  ;;  %v4363_v14 = vld [vmem:[%s7268_s26 + $0x56] sm:$0xff] }
 0x13e   : > { %v8420_v4 = vadd.f32 %v6790_v1, %v1130_v60  ;;  %7074 = vmatprep.mubr.msk.f32.mxu1 %vm380_vm0, %v3874_v25  ;;  %7136 = vmatprep.mubr.msk.f32.mxu0 %vm380_vm0, %v4401_v21  ;;  %v1140_v49 = vadd.f32 %v6728_v37, %v8105_v31  ;;  %v3877_v25 = vmax.f32 %v3835_v41, 0.0  ;;  %v4404_v21 = vmax.f32 %v4362_v45, 0.0  ;;  %v3837_v60 = vld [vmem:[%s7268_s26 + $0x6d] sm:$0xff]  ;;  %v4364_v37 = vld [vmem:[%s7268_s26 + $0x5e] sm:$0xff] }
 0x13f   : > { %v1134_v30 = vpop.f32.mrf.mxu1  ;;  %v1611_v15 = vpop.f32.mrf.mxu0  ;;  %v3878_v31 = vmax.f32 %v3836_v27, 0.0  ;;  %v4405_v19 = vmax.f32 %v4363_v14, 0.0 }
 0x140   : > { %v8429_v36 = vadd.f32 %v1611_v15, %v1125_v8  ;;  %v1135_v35 = vadd.f32 %v1134_v30, %v8114_v23  ;;  %v3838_v15 = vld [vmem:[%s7268_s26 + $0x75] sm:$0xff] }
 0x141   : > { %v6731_v5 = vpop.f32.mrf.mxu1  ;;  %v6793_v13 = vpop.f32.mrf.mxu0  ;;  %7075 = vmatmul.mubr.msk.f32.gmra.mxu1 %vm380_vm0, %v3875_v29  ;;  %7137 = vmatmul.mubr.msk.f32.gmra.mxu0 %vm380_vm0, %v4402_v0  ;;  %v4365_v29 = vld [vmem:[%s7268_s26 + $0x66] sm:$0xff] }
 0x142   : > { %v8434_v32 = vadd.f32 %v6793_v13, %v1140_v49  ;;  %7077 = vmatprep.mubr.msk.f32.mxu1 %vm380_vm0, %v3876_v53  ;;  %7139 = vmatprep.mubr.msk.f32.mxu0 %vm380_vm0, %v4403_v10  ;;  %v1150_v0 = vadd.f32 %v6731_v5, %v8126_v22  ;;  %v3879_v53 = vmax.f32 %v3837_v60, 0.0  ;;  %v4406_v10 = vmax.f32 %v4364_v37, 0.0  ;;  %v3839_v49 = vld [vmem:[%s7268_s26 + $0x7d] sm:$0xff]  ;;  %v4366_v5 = vld [vmem:[%s7268_s26 + $0x6e] sm:$0xff] }
 0x143   : > { %v1144_v1 = vpop.f32.mrf.mxu1  ;;  %v1621_v8 = vpop.f32.mrf.mxu0  ;;  %v3880_v22 = vmax.f32 %v3838_v15, 0.0  ;;  %v4407_v14 = vmax.f32 %v4365_v29, 0.0 }
 0x144   : > { %v8443_v41 = vadd.f32 %v1621_v8, %v1135_v35  ;;  %v1145_v30 = vadd.f32 %v1144_v1, %v8135_v20  ;;  %v3840_v8 = vld [vmem:[%s7268_s26 + $0x85] sm:$0xff] }
 0x145   : > { %v6734_v23 = vpop.f32.mrf.mxu1  ;;  %v6796_v45 = vpop.f32.mrf.mxu0  ;;  %7078 = vmatmul.mubr.msk.f32.gmra.mxu1 %vm380_vm0, %v3877_v25  ;;  %7140 = vmatmul.mubr.msk.f32.gmra.mxu0 %vm380_vm0, %v4404_v21  ;;  %v4367_v25 = vld [vmem:[%s7268_s26 + $0x76] sm:$0xff] }
 0x146   : > { %v8448_v27 = vadd.f32 %v6796_v45, %v1150_v0  ;;  %7080 = vmatprep.mubr.msk.f32.mxu1 %vm380_vm0, %v3878_v31  ;;  %7142 = vmatprep.mubr.msk.f32.mxu0 %vm380_vm0, %v4405_v19  ;;  %v1160_v21 = vadd.f32 %v6734_v23, %v8146_v11  ;;  %v3881_v31 = vmax.f32 %v3839_v49, 0.0  ;;  %v4408_v19 = vmax.f32 %v4366_v5, 0.0  ;;  %v3841_v0 = vld [vmem:[%s7268_s26 + $0x8d] sm:$0xff]  ;;  %v4368_v23 = vld [vmem:[%s7268_s26 + $0x7e] sm:$0xff] }
 0x147   : > { %v1154_v13 = vpop.f32.mrf.mxu1  ;;  %v1631_v35 = vpop.f32.mrf.mxu0  ;;  %v3882_v11 = vmax.f32 %v3840_v8, 0.0  ;;  %v4409_v29 = vmax.f32 %v4367_v25, 0.0 }
 0x148   : > { %v8457_v60 = vadd.f32 %v1631_v35, %v1145_v30  ;;  %v1155_v1 = vadd.f32 %v1154_v13, %v8155_v33  ;;  %v3842_v35 = vld [vmem:[%s7268_s26 + $0x95] sm:$0xff] }
 0x149   : > { %v6737_v20 = vpop.f32.mrf.mxu1  ;;  %v6799_v37 = vpop.f32.mrf.mxu0  ;;  %7081 = vmatmul.mubr.msk.f32.gmra.mxu1 %vm380_vm0, %v3879_v53  ;;  %7143 = vmatmul.mubr.msk.f32.gmra.mxu0 %vm380_vm0, %v4406_v10  ;;  %v4369_v53 = vld [vmem:[%s7268_s26 + $0x86] sm:$0xff] }
 0x14a   : > { %v8462_v15 = vadd.f32 %v6799_v37, %v1160_v21  ;;  %7083 = vmatprep.mubr.msk.f32.mxu1 %vm380_vm0, %v3880_v22  ;;  %7145 = vmatprep.mubr.msk.f32.mxu0 %vm380_vm0, %v4407_v14  ;;  %v1170_v10 = vadd.f32 %v6737_v20, %v8166_v42  ;;  %v3883_v22 = vmax.f32 %v3841_v0, 0.0  ;;  %v4410_v14 = vmax.f32 %v4368_v23, 0.0  ;;  %v3843_v21 = vld [vmem:[%s7268_s26 + $0x9d] sm:$0xff]  ;;  %v4370_v20 = vld [vmem:[%s7268_s26 + $0x8e] sm:$0xff]  ;;  %v3844_v37 = vld [vmem:[%s7268_s26 + $0xa5] sm:$0xff] }
 0x14b   : > { %v1164_v45 = vpop.f32.mrf.mxu1  ;;  %v1641_v30 = vpop.f32.mrf.mxu0  ;;  %v3884_v42 = vmax.f32 %v3842_v35, 0.0  ;;  %v4411_v25 = vmax.f32 %v4369_v53, 0.0 }
 0x14c   : > { %v8471_v33 = vadd.f32 %v1641_v30, %v1155_v1  ;;  %v1165_v13 = vadd.f32 %v1164_v45, %v8175_v51  ;;  %v3886_v45 = vmax.f32 %v3844_v37, 0.0 }
 0x14d   : > { %v6740_v49 = vpop.f32.mrf.mxu1  ;;  %v6802_v5 = vpop.f32.mrf.mxu0  ;;  %7084 = vmatmul.mubr.msk.f32.gmra.mxu1 %vm380_vm0, %v3881_v31  ;;  %7146 = vmatmul.mubr.msk.f32.gmra.mxu0 %vm380_vm0, %v4408_v19  ;;  %v4371_v31 = vld [vmem:[%s7268_s26 + $0x96] sm:$0xff] }
 0x14e   : > { %v8476_v8 = vadd.f32 %v6802_v5, %v1170_v10  ;;  %7086 = vmatprep.mubr.msk.f32.mxu1 %vm380_vm0, %v3882_v11  ;;  %7148 = vmatprep.mubr.msk.f32.mxu0 %vm380_vm0, %v4409_v29  ;;  %v1180_v19 = vadd.f32 %v6740_v49, %v8186_v58  ;;  %v3885_v11 = vmax.f32 %v3843_v21, 0.0  ;;  %v4412_v29 = vmax.f32 %v4370_v20, 0.0  ;;  %v3845_v49 = vld [vmem:[%s7268_s26 + $0xad] sm:$0xff]  ;;  %v4372_v5 = vld [vmem:[%s7268_s26 + $0x9e] sm:$0xff] }
 0x14f   : > { %v1174_v1 = vpop.f32.mrf.mxu1  ;;  %v1651_v30 = vpop.f32.mrf.mxu0  ;;  %v4413_v10 = vmax.f32 %v4371_v31, 0.0 }
 0x150   : > { %v8485_v0 = vadd.f32 %v1651_v30, %v1165_v13  ;;  %v1175_v35 = vadd.f32 %v1174_v1, %v8195_v2  ;;  %v3846_v30 = vld [vmem:[%s7268_s26 + $0xb5] sm:$0xff] }
 0x151   : > { %v6805_v51 = vpop.f32.mrf.mxu0  ;;  %v6810_v23 = vpop.f32.mrf.mxu1  ;;  %7087 = vmatmul.mubr.msk.f32.gmra.mxu1 %vm380_vm0, %v3883_v22  ;;  %7149 = vmatmul.mubr.msk.f32.gmra.mxu0 %vm380_vm0, %v4410_v14  ;;  %v4373_v14 = vld [vmem:[%s7268_s26 + $0xa6] sm:$0xff]  ;;  %v3888_v31 = vmax.f32 %v3846_v30, 0.0 }
 0x152   : > { %v8490_v53 = vadd.f32 %v6805_v51, %v1180_v19  ;;  %v2200_v58 = vadd.f32 %v6810_v23, %v8225_v57  ;;  %7089 = vmatprep.mubr.msk.f32.mxu1 %vm380_vm0, %v3884_v42  ;;  %7151 = vmatprep.mubr.msk.f32.mxu0 %vm380_vm0, %v4411_v25  ;;  %v3887_v42 = vmax.f32 %v3845_v49, 0.0  ;;  %v4414_v25 = vmax.f32 %v4372_v5, 0.0  ;;  %v3847_v19 = vld [vmem:[%s7268_s26 + $0xbd] sm:$0xff]  ;;  %v4374_v51 = vld [vmem:[%s7268_s26 + $0xae] sm:$0xff] }
 0x153   : > { %v1661_v22 = vpop.f32.mrf.mxu0  ;;  %v1990_v13 = vpop.f32.mrf.mxu1 }
 0x154   : > { %v8499_v21 = vadd.f32 %v1661_v22, %v1175_v35  ;;  %v2199_v2 = vadd.f32 %v1990_v13, %v8238_v50  ;;  %v4415_v50 = vmax.f32 %v4373_v14, 0.0  ;;  %v3848_v22 = vld [vmem:[%s7268_s26 + $0xc5] sm:$0xff]  ;;  %v3849_v14 = vld [vmem:[%s7268_s26 + $0xcd] sm:$0xff] }
 0x155   : > { %v6813_v20 = vpop.f32.mrf.mxu1  ;;  %v6875_v57 = vpop.f32.mrf.mxu0  ;;  %7090 = vmatmul.mubr.msk.f32.gmra.mxu1 %vm380_vm0, %v3885_v11  ;;  %7152 = vmatmul.mubr.msk.f32.gmra.mxu0 %vm380_vm0, %v4412_v29  ;;  %v4375_v11 = vld [vmem:[%s7268_s26 + $0xb6] sm:$0xff] }
 0x156   : > { %v2202_v37 = vadd.f32 %v6813_v20, %v8243_v24  ;;  %v8505_v1 = vadd.f32 %v6875_v57, %v2200_v58  ;;  %7092 = vmatprep.mubr.msk.f32.mxu1 %vm380_vm0, %v3886_v45  ;;  %7154 = vmatprep.mubr.msk.f32.mxu0 %vm380_vm0, %v4413_v10  ;;  %v3889_v45 = vmax.f32 %v3847_v19, 0.0  ;;  %v4416_v10 = vmax.f32 %v4374_v51, 0.0 }
 0x157   : > { %v2000_v23 = vpop.f32.mrf.mxu1  ;;  %v2519_v35 = vpop.f32.mrf.mxu0  ;;  %v4417_v30 = vmax.f32 %v4375_v11, 0.0  ;;  %v3851_v11 = vld [vmem:[%s7268_s26 + $0xdd] sm:$0xff] }
 0x158   : > { %v2201_v29 = vadd.f32 %v2000_v23, %v8253_v7  ;;  %v8514_v49 = vadd.f32 %v2519_v35, %v2199_v2  ;;  %v3890_v7 = vmax.f32 %v3848_v22, 0.0  ;;  %v4376_v2 = vld [vmem:[%s7268_s26 + $0xbe] sm:$0xff]  ;;  %v3850_v23 = vld [vmem:[%s7268_s26 + $0xd5] sm:$0xff] }
 0x159   : > { %v6816_v24 = vpop.f32.mrf.mxu1  ;;  %v6878_v58 = vpop.f32.mrf.mxu0  ;;  %7093 = vmatmul.mubr.msk.f32.gmra.mxu1 %vm380_vm0, %v3887_v42  ;;  %7155 = vmatmul.mubr.msk.f32.gmra.mxu0 %vm380_vm0, %v4414_v25  ;;  %v4377_v42 = vld [vmem:[%s7268_s26 + $0xc6] sm:$0xff] }
 0x15a   : > { %v2204_v5 = vadd.f32 %v6816_v24, %v8258_v17  ;;  %v8519_v13 = vadd.f32 %v6878_v58, %v2202_v37  ;;  %7095 = vmatprep.mubr.msk.f32.mxu1 %vm380_vm0, %v3888_v31  ;;  %7157 = vmatprep.mubr.msk.f32.mxu0 %vm380_vm0, %v4415_v50  ;;  %v3891_v31 = vmax.f32 %v3849_v14, 0.0  ;;  %v4418_v50 = vmax.f32 %v4376_v2, 0.0 }
 0x15b   : > { %v2010_v20 = vpop.f32.mrf.mxu1  ;;  %v2529_v57 = vpop.f32.mrf.mxu0  ;;  %v4419_v22 = vmax.f32 %v4377_v42, 0.0  ;;  %v3853_v42 = vld [vmem:[%s7268_s26 + $0xed] sm:$0xff] }
 0x15c   : > { %v2203_v25 = vadd.f32 %v2010_v20, %v8265_v12  ;;  %v8528_v19 = vadd.f32 %v2529_v57, %v2201_v29  ;;  %v3892_v12 = vmax.f32 %v3850_v23, 0.0  ;;  %v4378_v29 = vld [vmem:[%s7268_s26 + $0xce] sm:$0xff]  ;;  %v3852_v20 = vld [vmem:[%s7268_s26 + $0xe5] sm:$0xff] }
 0x15d   : > { %v6819_v17 = vpop.f32.mrf.mxu1  ;;  %v6881_v37 = vpop.f32.mrf.mxu0  ;;  %7096 = vmatmul.mubr.msk.f32.gmra.mxu1 %vm380_vm0, %v3889_v45  ;;  %7158 = vmatmul.mubr.msk.f32.gmra.mxu0 %vm380_vm0, %v4416_v10  ;;  %v4379_v45 = vld [vmem:[%s7268_s26 + $0xd6] sm:$0xff] }
 0x15e   : > { %v2206_v51 = vadd.f32 %v6819_v17, %v8270_v18  ;;  %v8533_v35 = vadd.f32 %v6881_v37, %v2204_v5  ;;  %7098 = vmatprep.mubr.msk.f32.mxu1 %vm380_vm0, %v3890_v7  ;;  %7160 = vmatprep.mubr.msk.f32.mxu0 %vm380_vm0, %v4417_v30  ;;  %v3893_v7 = vmax.f32 %v3851_v11, 0.0  ;;  %v4420_v30 = vmax.f32 %v4378_v29, 0.0 }
 0x15f   : > { %v2020_v24 = vpop.f32.mrf.mxu1  ;;  %v2539_v58 = vpop.f32.mrf.mxu0  ;;  %v4421_v23 = vmax.f32 %v4379_v45, 0.0  ;;  %v3855_v45 = vld [vmem:[%s7268_s26 + $0xfd] sm:$0xff] }
 0x160   : > { %v2205_v10 = vadd.f32 %v2020_v24, %v8277_v38  ;;  %v8542_v14 = vadd.f32 %v2539_v58, %v2203_v25  ;;  %v3894_v38 = vmax.f32 %v3852_v20, 0.0  ;;  %v4380_v25 = vld [vmem:[%s7268_s26 + $0xde] sm:$0xff]  ;;  %v3854_v24 = vld [vmem:[%s7268_s26 + $0xf5] sm:$0xff] }
 0x161   : > { %v6822_v18 = vpop.f32.mrf.mxu1  ;;  %v6884_v5 = vpop.f32.mrf.mxu0  ;;  %7099 = vmatmul.mubr.msk.f32.gmra.mxu1 %vm380_vm0, %v3891_v31  ;;  %7161 = vmatmul.mubr.msk.f32.gmra.mxu0 %vm380_vm0, %v4418_v50  ;;  %v4381_v31 = vld [vmem:[%s7268_s26 + $0xe6] sm:$0xff] }
 0x162   : > { %v2208_v2 = vadd.f32 %v6822_v18, %v8282_v39  ;;  %v8547_v57 = vadd.f32 %v6884_v5, %v2206_v51  ;;  %7101 = vmatprep.mubr.msk.f32.mxu1 %vm380_vm0, %v3892_v12  ;;  %7163 = vmatprep.mubr.msk.f32.mxu0 %vm380_vm0, %v4419_v22  ;;  %v3895_v12 = vmax.f32 %v3853_v42, 0.0  ;;  %v4422_v22 = vmax.f32 %v4380_v25, 0.0 }
 0x163   : > { %v2030_v17 = vpop.f32.mrf.mxu1  ;;  %v2549_v37 = vpop.f32.mrf.mxu0  ;;  %v4423_v20 = vmax.f32 %v4381_v31, 0.0  ;;  %v3857_v31 = vld [vmem:[%s7268_s26 + $0x10d] sm:$0xff] }
 0x164   : > { %v2207_v50 = vadd.f32 %v2030_v17, %v8289_v9  ;;  %v8556_v11 = vadd.f32 %v2549_v37, %v2205_v10  ;;  %v3896_v9 = vmax.f32 %v3854_v24, 0.0  ;;  %v4382_v10 = vld [vmem:[%s7268_s26 + $0xee] sm:$0xff]  ;;  %v3856_v17 = vld [vmem:[%s7268_s26 + $0x105] sm:$0xff] }
 0x165   : > { %v6825_v39 = vpop.f32.mrf.mxu1  ;;  %v6887_v51 = vpop.f32.mrf.mxu0  ;;  %7102 = vmatmul.mubr.msk.f32.gmra.mxu1 %vm380_vm0, %v3893_v7  ;;  %7164 = vmatmul.mubr.msk.f32.gmra.mxu0 %vm380_vm0, %v4420_v30  ;;  %v4383_v7 = vld [vmem:[%s7268_s26 + $0xf6] sm:$0xff] }
 0x166   : > { %v2210_v29 = vadd.f32 %v6825_v39, %v8294_v44  ;;  %v8561_v58 = vadd.f32 %v6887_v51, %v2208_v2  ;;  %7104 = vmatprep.mubr.msk.f32.mxu1 %vm380_vm0, %v3894_v38  ;;  %7166 = vmatprep.mubr.msk.f32.mxu0 %vm380_vm0, %v4421_v23  ;;  %v3897_v38 = vmax.f32 %v3855_v45, 0.0  ;;  %v4424_v23 = vmax.f32 %v4382_v10, 0.0 }
 0x167   : > { %v2040_v18 = vpop.f32.mrf.mxu1  ;;  %v2559_v5 = vpop.f32.mrf.mxu0  ;;  %v4425_v24 = vmax.f32 %v4383_v7, 0.0  ;;  %v3859_v7 = vld [vmem:[%s7268_s26 + $0x11d] sm:$0xff] }
 0x168   : > { %v2209_v30 = vadd.f32 %v2040_v18, %v8301_v52  ;;  %v8570_v42 = vadd.f32 %v2559_v5, %v2207_v50  ;;  %v3898_v52 = vmax.f32 %v3856_v17, 0.0  ;;  %v4384_v50 = vld [vmem:[%s7268_s26 + $0xfe] sm:$0xff]  ;;  %v3858_v18 = vld [vmem:[%s7268_s26 + $0x115] sm:$0xff] }
 0x169   : > { %v6828_v44 = vpop.f32.mrf.mxu1  ;;  %v6890_v2 = vpop.f32.mrf.mxu0  ;;  %7105 = vmatmul.mubr.msk.f32.gmra.mxu1 %vm380_vm0, %v3895_v12  ;;  %7167 = vmatmul.mubr.msk.f32.gmra.mxu0 %vm380_vm0, %v4422_v22  ;;  %v4385_v12 = vld [vmem:[%s7268_s26 + $0x106] sm:$0xff] }
 0x16a   : > { %v2212_v25 = vadd.f32 %v6828_v44, %v8306_v59  ;;  %v8575_v37 = vadd.f32 %v6890_v2, %v2210_v29  ;;  %7107 = vmatprep.mubr.msk.f32.mxu1 %vm380_vm0, %v3896_v9  ;;  %7169 = vmatprep.mubr.msk.f32.mxu0 %vm380_vm0, %v4423_v20  ;;  %v3899_v9 = vmax.f32 %v3857_v31, 0.0  ;;  %v4426_v20 = vmax.f32 %v4384_v50, 0.0 }
 0x16b   : > { %v2050_v39 = vpop.f32.mrf.mxu1  ;;  %v2569_v51 = vpop.f32.mrf.mxu0  ;;  %v4427_v17 = vmax.f32 %v4385_v12, 0.0  ;;  %v3861_v12 = vld [vmem:[%s7268_s26 + $0x12d] sm:$0xff] }
 0x16c   : > { %v2211_v22 = vadd.f32 %v2050_v39, %v8313_v43  ;;  %v8584_v45 = vadd.f32 %v2569_v51, %v2209_v30  ;;  %v3900_v43 = vmax.f32 %v3858_v18, 0.0  ;;  %v4386_v30 = vld [vmem:[%s7268_s26 + $0x10e] sm:$0xff]  ;;  %v3860_v39 = vld [vmem:[%s7268_s26 + $0x125] sm:$0xff] }
 0x16d   : > { %v6831_v59 = vpop.f32.mrf.mxu1  ;;  %v6893_v29 = vpop.f32.mrf.mxu0  ;;  %7108 = vmatmul.mubr.msk.f32.gmra.mxu1 %vm380_vm0, %v3897_v38  ;;  %7170 = vmatmul.mubr.msk.f32.gmra.mxu0 %vm380_vm0, %v4424_v23  ;;  %v4387_v38 = vld [vmem:[%s7268_s26 + $0x116] sm:$0xff] }
 0x16e   : > { %v2214_v10 = vadd.f32 %v6831_v59, %v8318_v62  ;;  %v8589_v5 = vadd.f32 %v6893_v29, %v2212_v25  ;;  %7110 = vmatprep.mubr.msk.f32.mxu1 %vm380_vm0, %v3898_v52  ;;  %7172 = vmatprep.mubr.msk.f32.mxu0 %vm380_vm0, %v4425_v24  ;;  %v3901_v52 = vmax.f32 %v3859_v7, 0.0  ;;  %v4428_v24 = vmax.f32 %v4386_v30, 0.0 }
 0x16f   : > { %v2060_v44 = vpop.f32.mrf.mxu1  ;;  %v2579_v2 = vpop.f32.mrf.mxu0  ;;  %v4429_v18 = vmax.f32 %v4387_v38, 0.0  ;;  %v3863_v38 = vld [vmem:[%s7268_s26 + $0x13d] sm:$0xff] }
 0x170   : > { %v2213_v23 = vadd.f32 %v2060_v44, %v8325_v26  ;;  %v8598_v31 = vadd.f32 %v2579_v2, %v2211_v22  ;;  %v3902_v26 = vmax.f32 %v3860_v39, 0.0  ;;  %v4388_v22 = vld [vmem:[%s7268_s26 + $0x11e] sm:$0xff]  ;;  %v3862_v44 = vld [vmem:[%s7268_s26 + $0x135] sm:$0xff] }
 0x171   : > { %v6834_v62 = vpop.f32.mrf.mxu1  ;;  %v6896_v25 = vpop.f32.mrf.mxu0  ;;  %7111 = vmatmul.mubr.msk.f32.gmra.mxu1 %vm380_vm0, %v3899_v9  ;;  %7173 = vmatmul.mubr.msk.f32.gmra.mxu0 %vm380_vm0, %v4426_v20  ;;  %v4389_v9 = vld [vmem:[%s7268_s26 + $0x126] sm:$0xff] }
 0x172   : > { %v2216_v50 = vadd.f32 %v6834_v62, %v8330_v46  ;;  %v8603_v51 = vadd.f32 %v6896_v25, %v2214_v10  ;;  %7113 = vmatprep.mubr.msk.f32.mxu1 %vm380_vm0, %v3900_v43  ;;  %7175 = vmatprep.mubr.msk.f32.mxu0 %vm380_vm0, %v4427_v17  ;;  %v3903_v43 = vmax.f32 %v3861_v12, 0.0  ;;  %v4430_v17 = vmax.f32 %v4388_v22, 0.0 }
 0x173   : > { %v2070_v59 = vpop.f32.mrf.mxu1  ;;  %v2589_v29 = vpop.f32.mrf.mxu0  ;;  %v4431_v39 = vmax.f32 %v4389_v9, 0.0  ;;  %v3865_v9 = vld [vmem:[%s7268_s26 + $0x14d] sm:$0xff] }
 0x174   : > { %v2215_v20 = vadd.f32 %v2070_v59, %v8337_v47  ;;  %v8612_v7 = vadd.f32 %v2589_v29, %v2213_v23  ;;  %v3904_v47 = vmax.f32 %v3862_v44, 0.0  ;;  %v4390_v23 = vld [vmem:[%s7268_s26 + $0x12e] sm:$0xff]  ;;  %v3864_v59 = vld [vmem:[%s7268_s26 + $0x145] sm:$0xff] }
 0x175   : > { %v6837_v46 = vpop.f32.mrf.mxu1  ;;  %v6899_v10 = vpop.f32.mrf.mxu0  ;;  %7114 = vmatmul.mubr.msk.f32.gmra.mxu1 %vm380_vm0, %v3901_v52  ;;  %7176 = vmatmul.mubr.msk.f32.gmra.mxu0 %vm380_vm0, %v4428_v24  ;;  %v4391_v52 = vld [vmem:[%s7268_s26 + $0x136] sm:$0xff] }
 0x176   : > { %v2218_v30 = vadd.f32 %v6837_v46, %v8342_v55  ;;  %v8617_v2 = vadd.f32 %v6899_v10, %v2216_v50  ;;  %7116 = vmatprep.mubr.msk.f32.mxu1 %vm380_vm0, %v3902_v26  ;;  %7178 = vmatprep.mubr.msk.f32.mxu0 %vm380_vm0, %v4429_v18  ;;  %v3905_v26 = vmax.f32 %v3863_v38, 0.0  ;;  %v4432_v18 = vmax.f32 %v4390_v23, 0.0 }
 0x177   : > { %v2080_v62 = vpop.f32.mrf.mxu1  ;;  %v2599_v25 = vpop.f32.mrf.mxu0  ;;  %v4433_v44 = vmax.f32 %v4391_v52, 0.0  ;;  %v3867_v52 = vld [vmem:[%s7268_s26 + $0x15d] sm:$0xff] }
 0x178   : > { %v2217_v24 = vadd.f32 %v2080_v62, %v8349_v40  ;;  %v8626_v12 = vadd.f32 %v2599_v25, %v2215_v20  ;;  %v3906_v40 = vmax.f32 %v3864_v59, 0.0  ;;  %v4392_v20 = vld [vmem:[%s7268_s26 + $0x13e] sm:$0xff]  ;;  %v3866_v62 = vld [vmem:[%s7268_s26 + $0x155] sm:$0xff] }
 0x179   : > { %v6840_v55 = vpop.f32.mrf.mxu1  ;;  %v6902_v50 = vpop.f32.mrf.mxu0  ;;  %7117 = vmatmul.mubr.msk.f32.gmra.mxu1 %vm380_vm0, %v3903_v43  ;;  %7179 = vmatmul.mubr.msk.f32.gmra.mxu0 %vm380_vm0, %v4430_v17  ;;  %v4393_v43 = vld [vmem:[%s7268_s26 + $0x146] sm:$0xff] }
 0x17a   : > { %v2220_v22 = vadd.f32 %v6840_v55, %v8353_v28  ;;  %v8631_v29 = vadd.f32 %v6902_v50, %v2218_v30  ;;  %7119 = vmatprep.mubr.msk.f32.mxu1 %vm380_vm0, %v3904_v47  ;;  %7181 = vmatprep.mubr.msk.f32.mxu0 %vm380_vm0, %v4431_v39  ;;  %v3907_v47 = vmax.f32 %v3865_v9, 0.0  ;;  %v4434_v39 = vmax.f32 %v4392_v20, 0.0 }
 0x17b   : > { %v2090_v46 = vpop.f32.mrf.mxu1  ;;  %v2609_v10 = vpop.f32.mrf.mxu0  ;;  %v4435_v59 = vmax.f32 %v4393_v43, 0.0  ;;  %v3869_v43 = vld [vmem:[%s7268_s26 + $0x16d] sm:$0xff] }
 0x17c   : > { %v2219_v17 = vadd.f32 %v2090_v46, %v8360_v54  ;;  %v8640_v38 = vadd.f32 %v2609_v10, %v2217_v24  ;;  %v3908_v54 = vmax.f32 %v3866_v62, 0.0  ;;  %v4394_v24 = vld [vmem:[%s7268_s26 + $0x14e] sm:$0xff]  ;;  %v3868_v46 = vld [vmem:[%s7268_s26 + $0x165] sm:$0xff] }
 0x17d   : > { %v6843_v28 = vpop.f32.mrf.mxu1  ;;  %v6905_v30 = vpop.f32.mrf.mxu0  ;;  %7120 = vmatmul.mubr.msk.f32.gmra.mxu1 %vm380_vm0, %v3905_v26  ;;  %7182 = vmatmul.mubr.msk.f32.gmra.mxu0 %vm380_vm0, %v4432_v18  ;;  %v4395_v26 = vld [vmem:[%s7268_s26 + $0x156] sm:$0xff] }
 0x17e   : > { %v2222_v23 = vadd.f32 %v6843_v28, %v8365_v56  ;;  %v8645_v25 = vadd.f32 %v6905_v30, %v2220_v22  ;;  %7122 = vmatprep.mubr.msk.f32.mxu1 %vm380_vm0, %v3906_v40  ;;  %7184 = vmatprep.mubr.msk.f32.mxu0 %vm380_vm0, %v4433_v44  ;;  %v3909_v40 = vmax.f32 %v3867_v52, 0.0  ;;  %v4436_v44 = vmax.f32 %v4394_v24, 0.0 }
 0x17f   : > { %v2100_v55 = vpop.f32.mrf.mxu1  ;;  %v2619_v50 = vpop.f32.mrf.mxu0  ;;  %v4437_v62 = vmax.f32 %v4395_v26, 0.0 }
 0x180   : > { %v2221_v18 = vadd.f32 %v2100_v55, %v8373_v6  ;;  %v8654_v9 = vadd.f32 %v2619_v50, %v2219_v17  ;;  %v3910_v6 = vmax.f32 %v3868_v46, 0.0  ;;  %v4396_v17 = vld [vmem:[%s7268_s26 + $0x15e] sm:$0xff] }
 0x181   : > { %v6846_v56 = vpop.f32.mrf.mxu1  ;;  %v6908_v22 = vpop.f32.mrf.mxu0  ;;  %7123 = vmatmul.mubr.msk.f32.gmra.mxu1 %vm380_vm0, %v3907_v47  ;;  %7185 = vmatmul.mubr.msk.f32.gmra.mxu0 %vm380_vm0, %v4434_v39  ;;  %v4397_v47 = vld [vmem:[%s7268_s26 + $0x166] sm:$0xff] }
 0x182   : > { %v2224_v20 = vadd.f32 %v6846_v56, %v8378_v16  ;;  %v8659_v10 = vadd.f32 %v6908_v22, %v2222_v23  ;;  %7125 = vmatprep.mubr.msk.f32.mxu1 %vm380_vm0, %v3908_v54  ;;  %7187 = vmatprep.mubr.msk.f32.mxu0 %vm380_vm0, %v4435_v59  ;;  %v3911_v23 = vmax.f32 %v3869_v43, 0.0  ;;  %v4438_v54 = vmax.f32 %v4396_v17, 0.0 }
 0x183   : > { %v2110_v28 = vpop.f32.mrf.mxu1  ;;  %v2629_v30 = vpop.f32.mrf.mxu0  ;;  %v4439_v50 = vmax.f32 %v4397_v47, 0.0 }
 0x184   : > { %v2223_v39 = vadd.f32 %v2110_v28, %v8387_v48  ;;  %v8667_v52 = vadd.f32 %v2629_v30, %v2221_v18  ;;  %v4398_v48 = vld [vmem:[%s7268_s26 + $0x16e] sm:$0xff]  ;;  %s7199_s26 = smul.u32 168, %s9100_s16 }
 0x185   : > { %v6849_v24 = vpop.f32.mrf.mxu1  ;;  %v6911_v16 = vpop.f32.mrf.mxu0  ;;  %7126 = vmatmul.mubr.msk.f32.gmra.mxu1 %vm380_vm0, %v3909_v40  ;;  %7188 = vmatmul.mubr.msk.f32.gmra.mxu0 %vm380_vm0, %v4436_v44 }
 0x186   : > { %v2226_v59 = vadd.f32 %v6849_v24, %v8392_v34  ;;  %v8672_v55 = vadd.f32 %v6911_v16, %v2224_v20  ;;  %7128 = vmatprep.mubr.msk.f32.mxu1 %vm380_vm0, %v3910_v6  ;;  %7190 = vmatprep.mubr.msk.f32.mxu0 %vm380_vm0, %v4437_v62  ;;  %v4440_v34 = vmax.f32 %v4398_v48, 0.0  ;;  %s8892_s7 = scalar_lea.vmem %s9025_s3, %s7199_s26 }
 0x187   : > { %v2120_v46 = vpop.f32.mrf.mxu1  ;;  %v2639_v26 = vpop.f32.mrf.mxu0 }
 0x188   : > { %v2225_v18 = vadd.f32 %v2120_v46, %v8401_v3  ;;  %v8678_v56 = vadd.f32 %v2639_v26, %v2223_v39 }
 0x189   : > { %v6852_v22 = vpop.f32.mrf.mxu1  ;;  %v6914_v40 = vpop.f32.mrf.mxu0  ;;  %7129 = vmatmul.mubr.msk.f32.gmra.mxu1 %vm380_vm0, %v3911_v23  ;;  %7191 = vmatmul.mubr.msk.f32.gmra.mxu0 %vm380_vm0, %v4438_v54 }
 0x18a   : > { %v2228_v44 = vadd.f32 %v6852_v22, %v8406_v61  ;;  %v8683_v20 = vadd.f32 %v6914_v40, %v2226_v59  ;;  %7193 = vmatprep.mubr.msk.f32.mxu0 %vm380_vm0, %v4439_v50 }
 0x18b   : > { %v2130_v6 = vpop.f32.mrf.mxu1  ;;  %v2649_v62 = vpop.f32.mrf.mxu0 }
 0x18c   : > { %v2227_v43 = vadd.f32 %v2130_v6, %v8415_v63  ;;  %v8687_v3 = vadd.f32 %v2649_v62, %v2225_v18 }
 0x18d   : > { %v6855_v17 = vpop.f32.mrf.mxu1  ;;  %v6917_v28 = vpop.f32.mrf.mxu0  ;;  %7194 = vmatmul.mubr.msk.f32.gmra.mxu0 %vm380_vm0, %v4440_v34 }
 0x18e   : > { %v2230_v30 = vadd.f32 %v6855_v17, %v8420_v4  ;;  %v8691_v47 = vadd.f32 %v6917_v28, %v2228_v44 }
 0x18f   : > { %v2140_v39 = vpop.f32.mrf.mxu1  ;;  %v2659_v61 = vpop.f32.mrf.mxu0 }
 0x190   : > { %v2229_v24 = vadd.f32 %v2140_v39, %v8429_v36  ;;  %v8694_v16 = vadd.f32 %v2659_v61, %v2227_v43 }
 0x191   : > { %v6858_v23 = vpop.f32.mrf.mxu1  ;;  %v6920_v54 = vpop.f32.mrf.mxu0 }
 0x192   : > { %v2232_v63 = vadd.f32 %v6858_v23, %v8434_v32  ;;  %v8697_v59 = vadd.f32 %v6920_v54, %v2230_v30 }
 0x193   : > { %v2150_v50 = vpop.f32.mrf.mxu1  ;;  %v2669_v48 = vpop.f32.mrf.mxu0 }
 0x194   : > { %v2231_v46 = vadd.f32 %v2150_v50, %v8443_v41  ;;  %v8700_v26 = vadd.f32 %v2669_v48, %v2229_v24 }
 0x195   : > { %v6861_v4 = vpop.f32.mrf.mxu1  ;;  %v6923_v18 = vpop.f32.mrf.mxu0 }
 0x196   : > { %v2234_v22 = vadd.f32 %v6861_v4, %v8448_v27  ;;  %v8703_v40 = vadd.f32 %v6923_v18, %v2232_v63 }
 0x197   : > { %v2160_v36 = vpop.f32.mrf.mxu1  ;;  %v2679_v34 = vpop.f32.mrf.mxu0 }
 0x198   : > { %v2233_v44 = vadd.f32 %v2160_v36, %v8457_v60  ;;  %v8706_v6 = vadd.f32 %v2679_v34, %v2231_v46 }
 0x199   : > { %v6864_v32 = vpop.f32.mrf.mxu1  ;;  %v6926_v62 = vpop.f32.mrf.mxu0 }
 0x19a   : > { %v2236_v43 = vadd.f32 %v6864_v32, %v8462_v15  ;;  %v8709_v17 = vadd.f32 %v6926_v62, %v2234_v22 }
 0x19b   : > { %v2170_v41 = vpop.f32.mrf.mxu1  ;;  %v2689_v28 = vpop.f32.mrf.mxu0 }
 0x19c   : > { %v2235_v30 = vadd.f32 %v2170_v41, %v8471_v33  ;;  %v8712_v39 = vadd.f32 %v2689_v28, %v2233_v44 }
 0x19d   : > { %v6867_v27 = vpop.f32.mrf.mxu1  ;;  %v6929_v61 = vpop.f32.mrf.mxu0 }
 0x19e   : > { %v2238_v24 = vadd.f32 %v6867_v27, %v8476_v8  ;;  %v8715_v23 = vadd.f32 %v6929_v61, %v2236_v43 }
 0x19f   : > { %v2180_v60 = vpop.f32.mrf.mxu1  ;;  %v2699_v54 = vpop.f32.mrf.mxu0 }
 0x1a0   : > { %v2237_v63 = vadd.f32 %v2180_v60, %v8485_v0  ;;  %v8718_v50 = vadd.f32 %v2699_v54, %v2235_v30 }
 0x1a1   : > { %v6870_v15 = vpop.f32.mrf.mxu1  ;;  %v6932_v48 = vpop.f32.mrf.mxu0 }
 0x1a2   : > { %v2240_v46 = vadd.f32 %v6870_v15, %v8490_v53  ;;  %v8721_v4 = vadd.f32 %v6932_v48, %v2238_v24 }
 0x1a3   : > { %v2190_v33 = vpop.f32.mrf.mxu1  ;;  %v2709_v18 = vpop.f32.mrf.mxu0 }
 0x1a4   : > { %v2239_v22 = vadd.f32 %v2190_v33, %v8499_v21  ;;  %v8724_v36 = vadd.f32 %v2709_v18, %v2237_v63 }
 0x1a5   : > { %v6935_v8 = vpop.f32.mrf.mxu0  ;;  %v6940_v34 = vpop.f32.mrf.mxu1 }
 0x1a6   : > { %v8726_v44 = vadd.f32 %v6935_v8, %v2240_v46  ;;  %v3258_v0 = vadd.f32 %v6940_v34, %v8505_v1 }
 0x1a7   : > { %v2719_v32 = vpop.f32.mrf.mxu0  ;;  %v3048_v62 = vpop.f32.mrf.mxu1 }
 0x1a8   : > { %v8729_v43 = vadd.f32 %v2719_v32, %v2239_v22  ;;  %v3257_v53 = vadd.f32 %v3048_v62, %v8514_v49 }
 0x1a9   : > { %v6943_v41 = vpop.f32.mrf.mxu1  ;;  %v7005_v28 = vpop.f32.mrf.mxu0 }
 0x1aa   : > { %v3260_v30 = vadd.f32 %v6943_v41, %v8519_v13  ;;  %v8733_v27 = vadd.f32 %v7005_v28, %v3258_v0 }
 0x1ab   : > { %v3058_v21 = vpop.f32.mrf.mxu1  ;;  %v3577_v61 = vpop.f32.mrf.mxu0 }
 0x1ac   : > { %v3259_v24 = vadd.f32 %v3058_v21, %v8528_v19  ;;  %v8736_v60 = vadd.f32 %v3577_v61, %v3257_v53 }
 0x1ad   : > { %v6946_v54 = vpop.f32.mrf.mxu1  ;;  %v7008_v1 = vpop.f32.mrf.mxu0 }
 0x1ae   : > { %v3262_v63 = vadd.f32 %v6946_v54, %v8533_v35  ;;  %v8739_v15 = vadd.f32 %v7008_v1, %v3260_v30 }
 0x1af   : > { %v3068_v48 = vpop.f32.mrf.mxu1  ;;  %v3587_v49 = vpop.f32.mrf.mxu0 }
 0x1b0   : > { %v3261_v46 = vadd.f32 %v3068_v48, %v8542_v14  ;;  %v8742_v33 = vadd.f32 %v3587_v49, %v3259_v24 }
 0x1b1   : > { %v6949_v13 = vpop.f32.mrf.mxu1  ;;  %v7011_v18 = vpop.f32.mrf.mxu0 }
 0x1b2   : > { %v3264_v22 = vadd.f32 %v6949_v13, %v8547_v57  ;;  %v8745_v8 = vadd.f32 %v7011_v18, %v3262_v63 }
 0x1b3   : > { %v3078_v19 = vpop.f32.mrf.mxu1  ;;  %v3597_v34 = vpop.f32.mrf.mxu0 }
 0x1b4   : > { %v3263_v0 = vadd.f32 %v3078_v19, %v8556_v11  ;;  %v8748_v32 = vadd.f32 %v3597_v34, %v3261_v46 }
 0x1b5   : > { %v6952_v35 = vpop.f32.mrf.mxu1  ;;  %v7014_v62 = vpop.f32.mrf.mxu0 }
 0x1b6   : > { %v3266_v53 = vadd.f32 %v6952_v35, %v8561_v58  ;;  %v8751_v41 = vadd.f32 %v7014_v62, %v3264_v22 }
 0x1b7   : > { %v3088_v14 = vpop.f32.mrf.mxu1  ;;  %v3607_v28 = vpop.f32.mrf.mxu0 }
 0x1b8   : > { %v3265_v30 = vadd.f32 %v3088_v14, %v8570_v42  ;;  %v8754_v21 = vadd.f32 %v3607_v28, %v3263_v0 }
 0x1b9   : > { %v6955_v57 = vpop.f32.mrf.mxu1  ;;  %v7017_v61 = vpop.f32.mrf.mxu0 }
 0x1ba   : > { %v3268_v24 = vadd.f32 %v6955_v57, %v8575_v37  ;;  %v8757_v54 = vadd.f32 %v7017_v61, %v3266_v53 }
 0x1bb   : > { %v3098_v11 = vpop.f32.mrf.mxu1  ;;  %v3617_v1 = vpop.f32.mrf.mxu0 }
 0x1bc   : > { %v3267_v63 = vadd.f32 %v3098_v11, %v8584_v45  ;;  %v8760_v48 = vadd.f32 %v3617_v1, %v3265_v30 }
 0x1bd   : > { %v6958_v58 = vpop.f32.mrf.mxu1  ;;  %v7020_v49 = vpop.f32.mrf.mxu0 }
 0x1be   : > { %v3270_v46 = vadd.f32 %v6958_v58, %v8589_v5  ;;  %v8763_v13 = vadd.f32 %v7020_v49, %v3268_v24 }
 0x1bf   : > { %v3108_v42 = vpop.f32.mrf.mxu1  ;;  %v3627_v18 = vpop.f32.mrf.mxu0 }
 0x1c0   : > { %v3269_v22 = vadd.f32 %v3108_v42, %v8598_v31  ;;  %v8766_v19 = vadd.f32 %v3627_v18, %v3267_v63 }
 0x1c1   : > { %v6961_v37 = vpop.f32.mrf.mxu1  ;;  %v7023_v34 = vpop.f32.mrf.mxu0 }
 0x1c2   : > { %v3272_v0 = vadd.f32 %v6961_v37, %v8603_v51  ;;  %v8769_v35 = vadd.f32 %v7023_v34, %v3270_v46 }
 0x1c3   : > { %v3118_v45 = vpop.f32.mrf.mxu1  ;;  %v3637_v62 = vpop.f32.mrf.mxu0 }
 0x1c4   : > { %v3271_v53 = vadd.f32 %v3118_v45, %v8612_v7  ;;  %v8772_v14 = vadd.f32 %v3637_v62, %v3269_v22 }
 0x1c5   : > { %v6964_v5 = vpop.f32.mrf.mxu1  ;;  %v7026_v28 = vpop.f32.mrf.mxu0 }
 0x1c6   : > { %v3274_v30 = vadd.f32 %v6964_v5, %v8617_v2  ;;  %v8775_v57 = vadd.f32 %v7026_v28, %v3272_v0 }
 0x1c7   : > { %v3128_v31 = vpop.f32.mrf.mxu1  ;;  %v3647_v61 = vpop.f32.mrf.mxu0 }
 0x1c8   : > { %v3273_v24 = vadd.f32 %v3128_v31, %v8626_v12  ;;  %v8778_v11 = vadd.f32 %v3647_v61, %v3271_v53 }
 0x1c9   : > { %v6967_v51 = vpop.f32.mrf.mxu1  ;;  %v7029_v1 = vpop.f32.mrf.mxu0 }
 0x1ca   : > { %v3276_v63 = vadd.f32 %v6967_v51, %v8631_v29  ;;  %v8781_v58 = vadd.f32 %v7029_v1, %v3274_v30 }
 0x1cb   : > { %v3138_v7 = vpop.f32.mrf.mxu1  ;;  %v3657_v49 = vpop.f32.mrf.mxu0 }
 0x1cc   : > { %v3275_v46 = vadd.f32 %v3138_v7, %v8640_v38  ;;  %v8784_v42 = vadd.f32 %v3657_v49, %v3273_v24 }
 0x1cd   : > { %v6970_v2 = vpop.f32.mrf.mxu1  ;;  %v7032_v18 = vpop.f32.mrf.mxu0 }
 0x1ce   : > { %v3278_v22 = vadd.f32 %v6970_v2, %v8645_v25  ;;  %v8787_v37 = vadd.f32 %v7032_v18, %v3276_v63  ;;  %v8801_v63 = vpop.permute.xlu0 %5140  ;;  %v8806_v2 = vpop.permute.xlu1 %5150 }
 0x1cf   : > { %v3148_v12 = vpop.f32.mrf.mxu1  ;;  %v3667_v34 = vpop.f32.mrf.mxu0 }
 0x1d0   : > { %v3277_v0 = vadd.f32 %v3148_v12, %v8654_v9  ;;  %v8790_v45 = vadd.f32 %v3667_v34, %v3275_v46 }
 0x1d1   : > { %v6973_v29 = vpop.f32.mrf.mxu1  ;;  %v7035_v62 = vpop.f32.mrf.mxu0 }
 0x1d2   : > { %v3280_v53 = vadd.f32 %v6973_v29, %v8659_v10  ;;  %v8793_v5 = vadd.f32 %v7035_v62, %v3278_v22  ;;  %v8814_v62 = vpop.permute.xlu0 %5145 }
 0x1d3   : > { %v3158_v38 = vpop.f32.mrf.mxu1  ;;  %v3677_v28 = vpop.f32.mrf.mxu0 }
 0x1d4   : > { %v3279_v30 = vadd.f32 %v3158_v38, %v8667_v52  ;;  %v8796_v31 = vadd.f32 %v3677_v28, %v3277_v0 }
 0x1d5   : > { %v6976_v25 = vpop.f32.mrf.mxu1  ;;  %v7038_v61 = vpop.f32.mrf.mxu0 }
 0x1d6   : > { %v3282_v24 = vadd.f32 %v6976_v25, %v8672_v55  ;;  %v8799_v51 = vadd.f32 %v7038_v61, %v3280_v53 }
 0x1d7   : > { %v3168_v9 = vpop.f32.mrf.mxu1  ;;  %v3687_v1 = vpop.f32.mrf.mxu0 }
 0x1d8   : > { %v3281_v10 = vadd.f32 %v3168_v9, %v8678_v56  ;;  %v8804_v7 = vadd.f32 %v3687_v1, %v3279_v30  ;;  %v8819_v30 = vpop.permute.xlu1 %5155 }
 0x1d9   : > { %v6979_v49 = vpop.f32.mrf.mxu1  ;;  %v7041_v46 = vpop.f32.mrf.mxu0 }
 0x1da   : > { %v3284_v52 = vadd.f32 %v6979_v49, %v8683_v20  ;;  %v8809_v18 = vadd.f32 %v7041_v46, %v3282_v24  ;;  %v8827_v49 = vpop.permute.xlu0 %5160 }
 0x1db   : > { %v3178_v22 = vpop.f32.mrf.mxu1  ;;  %v3697_v55 = vpop.f32.mrf.mxu0 }
 0x1dc   : > { %v3283_v12 = vadd.f32 %v3178_v22, %v8687_v3  ;;  %v8812_v34 = vadd.f32 %v3697_v55, %v3281_v10  ;;  %v8832_v55 = vpop.permute.xlu1 %5165 }
 0x1dd   : > { %v6982_v0 = vpop.f32.mrf.mxu1  ;;  %v7044_v29 = vpop.f32.mrf.mxu0 }
 0x1de   : > { %v3286_v56 = vadd.f32 %v6982_v0, %v8691_v47  ;;  %v8817_v53 = vadd.f32 %v7044_v29, %v3284_v52 }
 0x1df   : > { %v3188_v38 = vpop.f32.mrf.mxu1  ;;  %v3707_v28 = vpop.f32.mrf.mxu0 }
 0x1e0   : > { %v3285_v20 = vadd.f32 %v3188_v38, %v8694_v16  ;;  %v8822_v25 = vadd.f32 %v3707_v28, %v3283_v12 }
 0x1e1   : > { %v6985_v61 = vpop.f32.mrf.mxu1  ;;  %v7047_v3 = vpop.f32.mrf.mxu0 }
 0x1e2   : > { %v3288_v24 = vadd.f32 %v6985_v61, %v8697_v59  ;;  %v8825_v9 = vadd.f32 %v7047_v3, %v3286_v56  ;;  %v8840_v61 = vpop.permute.xlu0 %5170 }
 0x1e3   : > { %v3198_v1 = vpop.f32.mrf.mxu1  ;;  %v3717_v10 = vpop.f32.mrf.mxu0 }
 0x1e4   : > { %v3287_v47 = vadd.f32 %v3198_v1, %v8700_v26  ;;  %v8830_v46 = vadd.f32 %v3717_v10, %v3285_v20  ;;  %v8845_v10 = vpop.permute.xlu1 %5175 }
 0x1e5   : > { %v6988_v52 = vpop.f32.mrf.mxu1  ;;  %v7050_v22 = vpop.f32.mrf.mxu0 }
 0x1e6   : > { %v3290_v16 = vadd.f32 %v6988_v52, %v8703_v40  ;;  %v8835_v12 = vadd.f32 %v7050_v22, %v3288_v24 }
 0x1e7   : > { %v3208_v0 = vpop.f32.mrf.mxu1  ;;  %v3727_v59 = vpop.f32.mrf.mxu0 }
 0x1e8   : > { %9075 = vst [vmem:[#allocation2_spill] sm:$0xff] %v8835_v12  ;;  %v3289_v29 = vadd.f32 %v3208_v0, %v8706_v6  ;;  %v8838_v56 = vadd.f32 %v3727_v59, %v3287_v47 }
 0x1e9   : > { %v6991_v38 = vpop.f32.mrf.mxu1  ;;  %v7053_v28 = vpop.f32.mrf.mxu0 }
 0x1ea   : > { %9076 = vst [vmem:[#allocation3_spill] sm:$0xff] %v8838_v56  ;;  %v3292_v26 = vadd.f32 %v6991_v38, %v8709_v17  ;;  %v8843_v20 = vadd.f32 %v7053_v28, %v3290_v16  ;;  %v8853_v56 = vpop.permute.xlu0 %5180 }
 0x1eb   : > { %v3218_v3 = vpop.f32.mrf.mxu1  ;;  %v3737_v1 = vpop.f32.mrf.mxu0 }
 0x1ec   : > { %9077 = vst [vmem:[#allocation4_spill] sm:$0xff] %v8843_v20  ;;  %v3291_v40 = vadd.f32 %v3218_v3, %v8712_v39  ;;  %v8848_v24 = vadd.f32 %v3737_v1, %v3289_v29  ;;  %v8858_v20 = vpop.permute.xlu1 %5185 }
 0x1ed   : > { %v6994_v52 = vpop.f32.mrf.mxu1  ;;  %v7056_v6 = vpop.f32.mrf.mxu0 }
 0x1ee   : > { %9078 = vst [vmem:[#allocation5_spill] sm:$0xff] %v8848_v24  ;;  %v3294_v47 = vadd.f32 %v6994_v52, %v8715_v23  ;;  %v8851_v22 = vadd.f32 %v7056_v6, %v3292_v26 }
 0x1ef   : > { %v3228_v0 = vpop.f32.mrf.mxu1  ;;  %v3747_v59 = vpop.f32.mrf.mxu0 }
 0x1f0   : > { %9079 = vst [vmem:[#allocation6_spill] sm:$0xff] %v8851_v22  ;;  %v3293_v17 = vadd.f32 %v3228_v0, %v8718_v50  ;;  %v8856_v16 = vadd.f32 %v3747_v59, %v3291_v40  ;;  %v8866_v22 = vpop.permute.xlu0 %5190 }
 0x1f1   : > { %v6997_v38 = vpop.f32.mrf.mxu1  ;;  %v7059_v28 = vpop.f32.mrf.mxu0 }
 0x1f2   : > { %9080 = vst [vmem:[#allocation7_spill] sm:$0xff] %v8856_v16  ;;  %v3296_v39 = vadd.f32 %v6997_v38, %v8721_v4  ;;  %v8861_v29 = vadd.f32 %v7059_v28, %v3294_v47  ;;  %v8871_v4 = vpop.permute.xlu1 %5195 }
 0x1f3   : > { %v3238_v3 = vpop.f32.mrf.mxu1  ;;  %v3757_v23 = vpop.f32.mrf.mxu0 }
 0x1f4   : > { %9081 = vst [vmem:[#allocation8_spill] sm:$0xff] %v8861_v29  ;;  %v3295_v26 = vadd.f32 %v3238_v3, %v8724_v36  ;;  %v8864_v1 = vadd.f32 %v3757_v23, %v3293_v17 }
 0x1f5   : > { %v7000_v52 = vpop.f32.mrf.mxu1  ;;  %v7062_v6 = vpop.f32.mrf.mxu0 }
 0x1f6   : > { %9082 = vst [vmem:[#allocation9_spill] sm:$0xff] %v8864_v1  ;;  %v3298_v50 = vadd.f32 %v7000_v52, %v8726_v44  ;;  %v8869_v40 = vadd.f32 %v7062_v6, %v3296_v39  ;;  %v8878_v1 = vpop.permute.xlu0 %5200 }
 0x1f7   : > { %v3248_v0 = vpop.f32.mrf.mxu1  ;;  %v3767_v59 = vpop.f32.mrf.mxu0 }
 0x1f8   : > { %9083 = vst [vmem:[#allocation10_spill] sm:$0xff] %v8869_v40  ;;  %v3297_v47 = vadd.f32 %v3248_v0, %v8729_v43  ;;  %v8874_v38 = vadd.f32 %v3767_v59, %v3295_v26  ;;  %v8884_v40 = vpop.permute.xlu1 %5205 }
 0x1f9   : > { %v7065_v36 = vpop.f32.mrf.mxu0  ;;  %v7070_v17 = vpop.f32.mrf.mxu1 }
 0x1fa   : > { %9084 = vst [vmem:[#allocation11_spill] sm:$0xff] %v8874_v38  ;;  %v8876_v28 = vadd.f32 %v7065_v36, %v3298_v50  ;;  %v4316_v44 = vadd.f32 %v7070_v17, %v8733_v27  ;;  %v8894_v17 = vpop.permute.xlu0 %5210 }
 0x1fb   : > { %v3777_v3 = vpop.f32.mrf.mxu0  ;;  %v4106_v23 = vpop.f32.mrf.mxu1 }
 0x1fc   : > { %9085 = vst [vmem:[#allocation12_spill] sm:$0xff] %v8876_v28  ;;  %v8881_v39 = vadd.f32 %v3777_v3, %v3297_v47  ;;  %v4315_v43 = vadd.f32 %v4106_v23, %v8736_v60 }
 0x1fd   : > { %v7073_v52 = vpop.f32.mrf.mxu1  ;;  %v7135_v6 = vpop.f32.mrf.mxu0 }
 0x1fe   : > { %9086 = vst [vmem:[#allocation13_spill] sm:$0xff] %v8881_v39  ;;  %v4845_v26 = vadd.f32 %v7135_v6, %v4316_v44  ;;  %v4318_v28 = vadd.f32 %v7073_v52, %v8739_v15 }
 0x1ff   : > { %v4116_v0 = vpop.f32.mrf.mxu1  ;;  %v4635_v59 = vpop.f32.mrf.mxu0 }
 0x200   : > { %v5349_v50 = vmul.f32 %v8814_v62, %v4845_v26  ;;  %v4844_v36 = vadd.f32 %v4635_v59, %v4315_v43  ;;  %v4317_v60 = vadd.f32 %v4116_v0, %v8742_v33  ;;  %v8898_v43 = vpop.permute.xlu1 %5215 }
 0x201   : > { %v7076_v27 = vpop.f32.mrf.mxu1  ;;  %v7138_v47 = vpop.f32.mrf.mxu0 }
 0x202   : > { %v6102_v3 = vpack.c.bf16 %v4845_v26, %v4844_v36  ;;  %v5348_v23 = vmul.f32 %v8801_v63, %v4844_v36  ;;  %v4847_v44 = vadd.f32 %v7138_v47, %v4318_v28  ;;  %v5438_v15 = vmul.f32 %v5349_v50, %v4845_v26 }
 0x203   : > { %v4126_v62 = vpop.f32.mrf.mxu1  ;;  %v4645_v6 = vpop.f32.mrf.mxu0  ;;  %v4320_v38 = vadd.f32 %v7076_v27, %v8745_v8 }
 0x204   : > { %6103 = vst [vmem:[%s8892_s7] sm:$0xff] %v6102_v3   ;;  %v5390_v52 = vadd.f32 %v5349_v50, %v5348_v23  ;;  %v5437_v59 = vmul.f32 %v5348_v23, %v4844_v36  ;;  %v4846_v39 = vadd.f32 %v4645_v6, %v4317_v60  ;;  %v5351_v29 = vmul.f32 %v8819_v30, %v4847_v44  ;;  %v8905_v3 = vpop.permute.xlu0 %5220 }
 0x205   : > { %v7079_v16 = vpop.f32.mrf.mxu1  ;;  %v7141_v33 = vpop.f32.mrf.mxu0  ;;  %v4319_v63 = vadd.f32 %v4126_v62, %v8748_v32 }
 0x206   : > { %v5479_v0 = vadd.f32 %v5438_v15, %v5437_v59  ;;  %v6107_v28 = vpack.c.bf16 %v4847_v44, %v4846_v39  ;;  %v5350_v47 = vmul.f32 %v8806_v2, %v4846_v39  ;;  %v4849_v24 = vadd.f32 %v7141_v33, %v4320_v38  ;;  %v8910_v62 = vpop.permute.xlu1 %5225 }
 0x207   : > { %v4136_v12 = vpop.f32.mrf.mxu1  ;;  %v4655_v26 = vpop.f32.mrf.mxu0  ;;  %v5440_v27 = vmul.f32 %v5351_v29, %v4847_v44  ;;  %v4322_v30 = vadd.f32 %v7079_v16, %v8751_v41 }
 0x208   : > { %6204 = vst [vmem:[%s8892_s7 + $0x8] sm:$0xff] %v6107_v28   ;;  %v5391_v50 = vadd.f32 %v5390_v52, %v5350_v47  ;;  %v5439_v36 = vmul.f32 %v5350_v47, %v4846_v39  ;;  %v4848_v8 = vadd.f32 %v4655_v26, %v4319_v63  ;;  %v5353_v60 = vmul.f32 %v8832_v55, %v4849_v24  ;;  %v8916_v26 = vpop.permute.xlu0 %5230 }
 0x209   : > { %v7082_v23 = vpop.f32.mrf.mxu1  ;;  %v7144_v32 = vpop.f32.mrf.mxu0  ;;  %v4321_v59 = vadd.f32 %v4136_v12, %v8754_v21 }
 0x20a   : > { %v5480_v2 = vadd.f32 %v5479_v0, %v5439_v36  ;;  %v6112_v38 = vpack.c.bf16 %v4849_v24, %v4848_v8  ;;  %v5352_v6 = vmul.f32 %v8827_v49, %v4848_v8  ;;  %v5392_v15 = vadd.f32 %v5391_v50, %v5351_v29 }
 0x20b   : > { %v4851_v52 = vadd.f32 %v7144_v32, %v4322_v30  ;;  %v4146_v39 = vpop.f32.mrf.mxu1  ;;  %v4665_v33 = vpop.f32.mrf.mxu0  ;;  %v5442_v16 = vmul.f32 %v5353_v60, %v4849_v24  ;;  %v4324_v55 = vadd.f32 %v7082_v23, %v8757_v54 }
 0x20c   : > { %6205 = vst [vmem:[%s8892_s7 + $0x10] sm:$0xff] %v6112_v38   ;;  %v5393_v44 = vadd.f32 %v5392_v15, %v5352_v6  ;;  %v5441_v63 = vmul.f32 %v5352_v6, %v4848_v8  ;;  %v5481_v41 = vadd.f32 %v5480_v2, %v5440_v27  ;;  %v4850_v28 = vadd.f32 %v4665_v33, %v4321_v59  ;;  %v8921_v30 = vpop.permute.xlu1 %5235 }
 0x20d   : > { %v7085_v47 = vpop.f32.mrf.mxu1  ;;  %v7147_v0 = vpop.f32.mrf.mxu0  ;;  %v5355_v29 = vmul.f32 %v8845_v10, %v4851_v52  ;;  %v4323_v21 = vadd.f32 %v4146_v39, %v8760_v48 }
 0x20e   : > { %v5482_v49 = vadd.f32 %v5481_v41, %v5441_v63  ;;  %v5394_v12 = vadd.f32 %v5393_v44, %v5353_v60  ;;  %v6117_v50 = vpack.c.bf16 %v4851_v52, %v4850_v28  ;;  %v5354_v36 = vmul.f32 %v8840_v61, %v4850_v28 }
 0x20f   : > { %v4853_v8 = vadd.f32 %v7147_v0, %v4324_v55  ;;  %v4156_v27 = vpop.f32.mrf.mxu1  ;;  %v4675_v24 = vpop.f32.mrf.mxu0  ;;  %v4326_v38 = vadd.f32 %v7085_v47, %v8763_v13  ;;  %v5444_v48 = vmul.f32 %v5355_v29, %v4851_v52 }
 0x210   : > { %v5483_v54 = vadd.f32 %v5482_v49, %v5442_v16  ;;  %v4852_v23 = vadd.f32 %v4675_v24, %v4323_v21  ;;  %6206 = vst [vmem:[%s8892_s7 + $0x18] sm:$0xff] %v6117_v50   ;;  %v5395_v32 = vadd.f32 %v5394_v12, %v5354_v36  ;;  %v5443_v2 = vmul.f32 %v5354_v36, %v4850_v28  ;;  %v8928_v16 = vpop.permute.xlu0 %5240 }
 0x211   : > { %v7088_v10 = vpop.f32.mrf.mxu1  ;;  %v7150_v6 = vpop.f32.mrf.mxu0  ;;  %v4325_v60 = vadd.f32 %v4156_v27, %v8766_v19  ;;  %v5357_v39 = vmul.f32 %v8858_v20, %v4853_v8 }
 0x212   : > { %v6122_v15 = vpack.c.bf16 %v4853_v8, %v4852_v23  ;;  %v5356_v61 = vmul.f32 %v8853_v56, %v4852_v23  ;;  %v5484_v59 = vadd.f32 %v5483_v54, %v5443_v2  ;;  %v5396_v33 = vadd.f32 %v5395_v32, %v5355_v29  ;;  %v8932_v56 = vpop.permute.xlu1 %5245 }
 0x213   : > { %v4855_v44 = vadd.f32 %v7150_v6, %v4326_v38  ;;  %v4166_v63 = vpop.f32.mrf.mxu1  ;;  %v4685_v41 = vpop.f32.mrf.mxu0  ;;  %v4328_v19 = vadd.f32 %v7088_v10, %v8769_v35  ;;  %v5446_v12 = vmul.f32 %v5357_v39, %v4853_v8 }
 0x214   : > { %6207 = vst [vmem:[%s8892_s7 + $0x20] sm:$0xff] %v6122_v15   ;;  %v5445_v55 = vmul.f32 %v5356_v61, %v4852_v23  ;;  %v4854_v13 = vadd.f32 %v4685_v41, %v4325_v60  ;;  %v5397_v28 = vadd.f32 %v5396_v33, %v5356_v61  ;;  %v5485_v52 = vadd.f32 %v5484_v59, %v5444_v48 }
 0x215   : > { %v7091_v47 = vpop.f32.mrf.mxu1  ;;  %v7153_v0 = vpop.f32.mrf.mxu0  ;;  %v5359_v20 = vmul.f32 %v8871_v4, %v4855_v44  ;;  %v4327_v49 = vadd.f32 %v4166_v63, %v8772_v14 }
 0x216   : > { %v6127_v29 = vpack.c.bf16 %v4855_v44, %v4854_v13  ;;  %v5358_v21 = vmul.f32 %v8866_v22, %v4854_v13  ;;  %v5486_v50 = vadd.f32 %v5485_v52, %v5445_v55  ;;  %v5398_v36 = vadd.f32 %v5397_v28, %v5357_v39  ;;  %v8939_v14 = vpop.permute.xlu0 %5250  ;;  %v8944_v63 = vpop.permute.xlu1 %5255 }
 0x217   : > { %v4857_v27 = vadd.f32 %v7153_v0, %v4328_v19  ;;  %v4176_v24 = vpop.f32.mrf.mxu1  ;;  %v4695_v54 = vpop.f32.mrf.mxu0  ;;  %v4330_v38 = vadd.f32 %v7091_v47, %v8775_v57  ;;  %v5448_v6 = vmul.f32 %v5359_v20, %v4855_v44 }
 0x218   : > { %6208 = vst [vmem:[%s8892_s7 + $0x28] sm:$0xff] %v6127_v29   ;;  %v5447_v23 = vmul.f32 %v5358_v21, %v4854_v13  ;;  %v4856_v35 = vadd.f32 %v4695_v54, %v4327_v49  ;;  %v5399_v32 = vadd.f32 %v5398_v36, %v5358_v21  ;;  %v5487_v2 = vadd.f32 %v5486_v50, %v5446_v12 }
 0x219   : > { %v7094_v4 = vpop.f32.mrf.mxu1  ;;  %v7156_v10 = vpop.f32.mrf.mxu0  ;;  %v4329_v22 = vadd.f32 %v4176_v24, %v8778_v11  ;;  %v5361_v15 = vmul.f32 %v8884_v40, %v4857_v27 }
 0x21a   : > { %v6132_v8 = vpack.c.bf16 %v4857_v27, %v4856_v35  ;;  %v5360_v48 = vmul.f32 %v8878_v1, %v4856_v35  ;;  %v5488_v60 = vadd.f32 %v5487_v2, %v5447_v23  ;;  %v5400_v61 = vadd.f32 %v5399_v32, %v5359_v20  ;;  %v8951_v12 = vpop.permute.xlu0 %5260  ;;  %v8955_v23 = vpop.permute.xlu1 %5265 }
 0x21b   : > { %v4859_v59 = vadd.f32 %v7156_v10, %v4330_v38  ;;  %v4186_v39 = vpop.f32.mrf.mxu1  ;;  %v4705_v33 = vpop.f32.mrf.mxu0  ;;  %v4332_v11 = vadd.f32 %v7094_v4, %v8781_v58  ;;  %v5450_v47 = vmul.f32 %v5361_v15, %v4857_v27 }
 0x21c   : > { %6209 = vst [vmem:[%s8892_s7 + $0x30] sm:$0xff] %v6132_v8   ;;  %v5449_v57 = vmul.f32 %v5360_v48, %v4856_v35  ;;  %v4858_v41 = vadd.f32 %v4705_v33, %v4329_v22  ;;  %v5401_v55 = vadd.f32 %v5400_v61, %v5360_v48  ;;  %v5489_v44 = vadd.f32 %v5488_v60, %v5448_v6 }
 0x21d   : > { %v7097_v13 = vpop.f32.mrf.mxu1  ;;  %v7159_v28 = vpop.f32.mrf.mxu0  ;;  %v5363_v1 = vmul.f32 %v8898_v43, %v4859_v59  ;;  %v4331_v40 = vadd.f32 %v4186_v39, %v8784_v42 }
 0x21e   : > { %v6137_v52 = vpack.c.bf16 %v4859_v59, %v4858_v41  ;;  %v5362_v19 = vmul.f32 %v8894_v17, %v4858_v41  ;;  %v5490_v0 = vadd.f32 %v5489_v44, %v5449_v57  ;;  %v5402_v20 = vadd.f32 %v5401_v55, %v5361_v15 }
 0x21f   : > { %v4861_v49 = vadd.f32 %v7159_v28, %v4332_v11  ;;  %v4196_v29 = vpop.f32.mrf.mxu1  ;;  %v4715_v21 = vpop.f32.mrf.mxu0  ;;  %v4334_v43 = vadd.f32 %v7097_v13, %v8787_v37  ;;  %v5452_v17 = vmul.f32 %v5363_v1, %v4859_v59 }
 0x220   : > { %6210 = vst [vmem:[%s8892_s7 + $0x38] sm:$0xff] %v6137_v52   ;;  %v5451_v50 = vmul.f32 %v5362_v19, %v4858_v41  ;;  %v4860_v58 = vadd.f32 %v4715_v21, %v4331_v40  ;;  %v5403_v36 = vadd.f32 %v5402_v20, %v5362_v19  ;;  %v5491_v24 = vadd.f32 %v5490_v0, %v5450_v47  ;;  %v8962_v59 = vpop.permute.xlu0 %5270  ;;  %v8967_v28 = vpop.permute.xlu1 %5275 }
 0x221   : > { %v7100_v42 = vpop.f32.mrf.mxu1  ;;  %v7162_v54 = vpop.f32.mrf.mxu0  ;;  %v4333_v27 = vadd.f32 %v4196_v29, %v8790_v45  ;;  %v5365_v38 = vmul.f32 %v8910_v62, %v4861_v49 }
 0x222   : > { %v6142_v35 = vpack.c.bf16 %v4861_v49, %v4860_v58  ;;  %v5364_v32 = vmul.f32 %v8905_v3, %v4860_v58  ;;  %v5492_v2 = vadd.f32 %v5491_v24, %v5451_v50  ;;  %v5404_v4 = vadd.f32 %v5403_v36, %v5363_v1 }
 0x223   : > { %v4863_v10 = vadd.f32 %v7162_v54, %v4334_v43  ;;  %v4206_v6 = vpop.f32.mrf.mxu1  ;;  %v4725_v22 = vpop.f32.mrf.mxu0  ;;  %v4336_v15 = vadd.f32 %v7100_v42, %v8793_v5  ;;  %v5454_v57 = vmul.f32 %v5365_v38, %v4861_v49 }
 0x224   : > { %6211 = vst [vmem:[%s8892_s7 + $0x40] sm:$0xff] %v6142_v35   ;;  %v5453_v8 = vmul.f32 %v5364_v32, %v4860_v58  ;;  %v4862_v37 = vadd.f32 %v4725_v22, %v4333_v27  ;;  %v5405_v48 = vadd.f32 %v5404_v4, %v5364_v32  ;;  %v5493_v60 = vadd.f32 %v5492_v2, %v5452_v17  ;;  %v8974_v24 = vpop.permute.xlu0 %5280 }
 0x225   : > { %v7103_v61 = vpop.f32.mrf.mxu1  ;;  %v7165_v45 = vpop.f32.mrf.mxu0  ;;  %v5367_v3 = vmul.f32 %v8921_v30, %v4863_v10  ;;  %v4335_v62 = vadd.f32 %v4206_v6, %v8796_v31 }
 0x226   : > { %v6147_v39 = vpack.c.bf16 %v4863_v10, %v4862_v37  ;;  %v5366_v33 = vmul.f32 %v8916_v26, %v4862_v37  ;;  %v5494_v41 = vadd.f32 %v5493_v60, %v5453_v8  ;;  %v5406_v55 = vadd.f32 %v5405_v48, %v5365_v38 }
 0x227   : > { %v4865_v44 = vadd.f32 %v7165_v45, %v4336_v15  ;;  %v4216_v11 = vpop.f32.mrf.mxu1  ;;  %v4735_v13 = vpop.f32.mrf.mxu0  ;;  %v4338_v30 = vadd.f32 %v7103_v61, %v8799_v51  ;;  %v5456_v47 = vmul.f32 %v5367_v3, %v4863_v10 }
 0x228   : > { %6212 = vst [vmem:[%s8892_s7 + $0x48] sm:$0xff] %v6147_v39   ;;  %v5455_v5 = vmul.f32 %v5366_v33, %v4862_v37  ;;  %v4864_v1 = vadd.f32 %v4735_v13, %v4335_v62  ;;  %v5407_v40 = vadd.f32 %v5406_v55, %v5366_v33  ;;  %v5495_v52 = vadd.f32 %v5494_v41, %v5454_v57 }
 0x229   : > { %v7106_v31 = vpop.f32.mrf.mxu1  ;;  %v7168_v19 = vpop.f32.mrf.mxu0  ;;  %v4337_v26 = vadd.f32 %v4216_v11, %v8804_v7  ;;  %v5369_v29 = vmul.f32 %v8932_v56, %v4865_v44 }
 0x22a   : > { %v6152_v0 = vpack.c.bf16 %v4865_v44, %v4864_v1  ;;  %v5368_v20 = vmul.f32 %v8928_v16, %v4864_v1  ;;  %v5496_v49 = vadd.f32 %v5495_v52, %v5455_v5  ;;  %v5408_v21 = vadd.f32 %v5407_v40, %v5367_v3  ;;  %v8978_v16 = vpop.permute.xlu1 %5285 }
 0x22b   : > { %v4867_v50 = vadd.f32 %v7168_v19, %v4338_v30  ;;  %v4226_v58 = vpop.f32.mrf.mxu1  ;;  %v4745_v36 = vpop.f32.mrf.mxu0  ;;  %v4340_v7 = vadd.f32 %v7106_v31, %v8809_v18  ;;  %v5458_v38 = vmul.f32 %v5369_v29, %v4865_v44 }
 0x22c   : > { %6213 = vst [vmem:[%s8892_s7 + $0x50] sm:$0xff] %v6152_v0   ;;  %v5457_v43 = vmul.f32 %v5368_v20, %v4864_v1  ;;  %v4866_v51 = vadd.f32 %v4745_v36, %v4337_v26  ;;  %v5409_v42 = vadd.f32 %v5408_v21, %v5368_v20  ;;  %v5497_v54 = vadd.f32 %v5496_v49, %v5456_v47  ;;  %v9087_v36 = vld [vmem:[#allocation2_spill] sm:$0xff] }
 0x22d   : > { %v7109_v17 = vpop.f32.mrf.mxu1  ;;  %v7171_v27 = vpop.f32.mrf.mxu0  ;;  %v5371_v56 = vmul.f32 %v8944_v63, %v4867_v50  ;;  %v4339_v35 = vadd.f32 %v4226_v58, %v8812_v34 }
 0x22e   : > { %v6157_v32 = vpack.c.bf16 %v4867_v50, %v4866_v51  ;;  %v5370_v2 = vmul.f32 %v8939_v14, %v4866_v51  ;;  %v5498_v4 = vadd.f32 %v5497_v54, %v5457_v43  ;;  %v5410_v10 = vadd.f32 %v5409_v42, %v5369_v29  ;;  %v5291_v34 = vpop.permute.xlu0 %5290  ;;  %v5296_v11 = vpop.permute.xlu1 %5295 }
 0x22f   : > { %v4869_v6 = vadd.f32 %v7171_v27, %v4340_v7  ;;  %v4236_v22 = vpop.f32.mrf.mxu1  ;;  %v4755_v8 = vpop.f32.mrf.mxu0  ;;  %v4342_v15 = vadd.f32 %v7109_v17, %v8817_v53  ;;  %v5460_v45 = vmul.f32 %v5371_v56, %v4867_v50 }
 0x230   : > { %6214 = vst [vmem:[%s8892_s7 + $0x58] sm:$0xff] %v6157_v32   ;;  %v5459_v37 = vmul.f32 %v5370_v2, %v4866_v51  ;;  %v4868_v18 = vadd.f32 %v4755_v8, %v4339_v35  ;;  %v5411_v48 = vadd.f32 %v5410_v10, %v5370_v2  ;;  %v5499_v60 = vadd.f32 %v5498_v4, %v5458_v38  ;;  %v9089_v8 = vld [vmem:[#allocation4_spill] sm:$0xff] }
 0x231   : > { %v7112_v63 = vpop.f32.mrf.mxu1  ;;  %v7174_v61 = vpop.f32.mrf.mxu0  ;;  %v4341_v14 = vadd.f32 %v4236_v22, %v8822_v25  ;;  %v5373_v33 = vmul.f32 %v8955_v23, %v4869_v6 }
 0x232   : > { %v6162_v3 = vpack.c.bf16 %v4869_v6, %v4868_v18  ;;  %v5372_v62 = vmul.f32 %v8951_v12, %v4868_v18  ;;  %v5500_v39 = vadd.f32 %v5499_v60, %v5459_v37  ;;  %v5412_v57 = vadd.f32 %v5411_v48, %v5371_v56  ;;  %v5301_v29 = vpop.permute.xlu0 %5300  ;;  %v5306_v51 = vpop.permute.xlu1 %5305 }
 0x233   : > { %v4871_v41 = vadd.f32 %v7174_v61, %v4342_v15  ;;  %v4246_v55 = vpop.f32.mrf.mxu1  ;;  %v4765_v44 = vpop.f32.mrf.mxu0  ;;  %v4344_v40 = vadd.f32 %v7112_v63, %v8825_v9  ;;  %v5462_v19 = vmul.f32 %v5373_v33, %v4869_v6 }
 0x234   : > { %6215 = vst [vmem:[%s8892_s7 + $0x60] sm:$0xff] %v6162_v3   ;;  %v5461_v13 = vmul.f32 %v5372_v62, %v4868_v18  ;;  %v4870_v53 = vadd.f32 %v4765_v44, %v4341_v14  ;;  %v5413_v5 = vadd.f32 %v5412_v57, %v5372_v62  ;;  %v5501_v1 = vadd.f32 %v5500_v39, %v5460_v45 }
 0x235   : > { %v7115_v25 = vpop.f32.mrf.mxu1  ;;  %v7177_v52 = vpop.f32.mrf.mxu0  ;;  %v5375_v12 = vmul.f32 %v8967_v28, %v4871_v41  ;;  %v4343_v30 = vadd.f32 %v4246_v55, %v8830_v46 }
 0x236   : > { %v6167_v23 = vpack.c.bf16 %v4871_v41, %v4870_v53  ;;  %v5374_v31 = vmul.f32 %v8962_v59, %v4870_v53  ;;  %v5502_v47 = vadd.f32 %v5501_v1, %v5461_v13  ;;  %v5414_v26 = vadd.f32 %v5413_v5, %v5373_v33  ;;  %v9088_v59 = vld [vmem:[#allocation3_spill] sm:$0xff]  ;;  %v5311_v60 = vpop.permute.xlu0 %5310  ;;  %v5316_v57 = vpop.permute.xlu1 %5315 }
 0x237   : > { %v4873_v0 = vadd.f32 %v7177_v52, %v4344_v40  ;;  %v4256_v20 = vpop.f32.mrf.mxu1  ;;  %v4775_v49 = vpop.f32.mrf.mxu0  ;;  %v4346_v28 = vadd.f32 %v7115_v25, %v9087_v36  ;;  %v5464_v42 = vmul.f32 %v5375_v12, %v4871_v41  ;;  %v9092_v25 = vld [vmem:[#allocation7_spill] sm:$0xff] }
 0x238   : > { %6216 = vst [vmem:[%s8892_s7 + $0x68] sm:$0xff] %v6167_v23   ;;  %v5463_v21 = vmul.f32 %v5374_v31, %v4870_v53  ;;  %v4872_v50 = vadd.f32 %v4775_v49, %v4343_v30  ;;  %v5415_v9 = vadd.f32 %v5414_v26, %v5374_v31  ;;  %v5503_v58 = vadd.f32 %v5502_v47, %v5462_v19  ;;  %v9091_v53 = vld [vmem:[#allocation6_spill] sm:$0xff]  ;;  %v9093_v49 = vld [vmem:[#allocation8_spill] sm:$0xff] }
 0x239   : > { %v7118_v43 = vpop.f32.mrf.mxu1  ;;  %v7180_v46 = vpop.f32.mrf.mxu0  ;;  %v4345_v54 = vadd.f32 %v4256_v20, %v9088_v59  ;;  %v5377_v56 = vmul.f32 %v8978_v16, %v4873_v0 }
 0x23a   : > { %v6172_v7 = vpack.c.bf16 %v4873_v0, %v4872_v50  ;;  %v5376_v17 = vmul.f32 %v8974_v24, %v4872_v50  ;;  %v5504_v27 = vadd.f32 %v5503_v58, %v5463_v21  ;;  %v5416_v35 = vadd.f32 %v5415_v9, %v5375_v12  ;;  %v9090_v24 = vld [vmem:[#allocation5_spill] sm:$0xff] }
 0x23b   : > { %v4875_v32 = vadd.f32 %v7180_v46, %v4346_v28  ;;  %v4266_v2 = vpop.f32.mrf.mxu1  ;;  %v4785_v38 = vpop.f32.mrf.mxu0  ;;  %v4348_v37 = vadd.f32 %v7118_v43, %v9089_v8  ;;  %v5466_v45 = vmul.f32 %v5377_v56, %v4873_v0  ;;  %v9094_v46 = vld [vmem:[#allocation9_spill] sm:$0xff] }
 0x23c   : > { %6217 = vst [vmem:[%s8892_s7 + $0x70] sm:$0xff] %v6172_v7   ;;  %v5465_v4 = vmul.f32 %v5376_v17, %v4872_v50  ;;  %v4874_v10 = vadd.f32 %v4785_v38, %v4345_v54  ;;  %v5417_v6 = vadd.f32 %v5416_v35, %v5376_v17  ;;  %v5505_v22 = vadd.f32 %v5504_v27, %v5464_v42  ;;  %v5321_v0 = vpop.permute.xlu0 %5320  ;;  %v5326_v43 = vpop.permute.xlu1 %5325 }
 0x23d   : > { %v7121_v18 = vpop.f32.mrf.mxu1  ;;  %v7183_v48 = vpop.f32.mrf.mxu0  ;;  %v5379_v15 = vmul.f32 %v5296_v11, %v4875_v32  ;;  %v4347_v63 = vadd.f32 %v4266_v2, %v9090_v24 }
 0x23e   : > { %v6177_v61 = vpack.c.bf16 %v4875_v32, %v4874_v10  ;;  %v5378_v16 = vmul.f32 %v5291_v34, %v4874_v10  ;;  %v5506_v14 = vadd.f32 %v5505_v22, %v5465_v4  ;;  %v5418_v3 = vadd.f32 %v5417_v6, %v5377_v56 }
 0x23f   : > { %v4877_v62 = vadd.f32 %v7183_v48, %v4348_v37  ;;  %v4276_v39 = vpop.f32.mrf.mxu1  ;;  %v4795_v33 = vpop.f32.mrf.mxu0  ;;  %v4350_v5 = vadd.f32 %v7121_v18, %v9091_v53  ;;  %v5468_v40 = vmul.f32 %v5379_v15, %v4875_v32  ;;  %v9096_v48 = vld [vmem:[#allocation11_spill] sm:$0xff] }
 0x240   : > { %6218 = vst [vmem:[%s8892_s7 + $0x78] sm:$0xff] %v6177_v61   ;;  %v5467_v41 = vmul.f32 %v5378_v16, %v4874_v10  ;;  %v4876_v55 = vadd.f32 %v4795_v33, %v4347_v63  ;;  %v5419_v44 = vadd.f32 %v5418_v3, %v5378_v16  ;;  %v5507_v13 = vadd.f32 %v5506_v14, %v5466_v45  ;;  %v9095_v10 = vld [vmem:[#allocation10_spill] sm:$0xff]  ;;  %v5331_v37 = vpop.permute.xlu0 %5330 }
 0x241   : > { %v7124_v11 = vpop.f32.mrf.mxu1  ;;  %v7186_v1 = vpop.f32.mrf.mxu0  ;;  %v4349_v34 = vadd.f32 %v4276_v39, %v9092_v25  ;;  %v5381_v23 = vmul.f32 %v5306_v51, %v4877_v62 }
 0x242   : > { %v6182_v52 = vpack.c.bf16 %v4877_v62, %v4876_v55  ;;  %v5380_v12 = vmul.f32 %v5301_v29, %v4876_v55  ;;  %v5508_v30 = vadd.f32 %v5507_v13, %v5467_v41  ;;  %v5420_v31 = vadd.f32 %v5419_v44, %v5379_v15 }
 0x243   : > { %v4879_v19 = vadd.f32 %v7186_v1, %v4350_v5  ;;  %v4286_v47 = vpop.f32.mrf.mxu1  ;;  %v4805_v26 = vpop.f32.mrf.mxu0  ;;  %v4352_v21 = vadd.f32 %v7124_v11, %v9093_v49  ;;  %v5470_v54 = vmul.f32 %v5381_v23, %v4877_v62  ;;  %v9098_v5 = vld [vmem:[#allocation13_spill] sm:$0xff] }
 0x244   : > { %6219 = vst [vmem:[%s8892_s7 + $0x80] sm:$0xff] %v6182_v52   ;;  %v5469_v20 = vmul.f32 %v5380_v12, %v4876_v55  ;;  %v4878_v50 = vadd.f32 %v4805_v26, %v4349_v34  ;;  %v5421_v9 = vadd.f32 %v5420_v31, %v5380_v12  ;;  %v5509_v58 = vadd.f32 %v5508_v30, %v5468_v40  ;;  %v5336_v62 = vpop.permute.xlu1 %5335  ;;  %v9097_v55 = vld [vmem:[#allocation12_spill] sm:$0xff] }
 0x245   : > { %v7127_v36 = vpop.f32.mrf.mxu1  ;;  %v7189_v28 = vpop.f32.mrf.mxu0  ;;  %v4351_v29 = vadd.f32 %v4286_v47, %v9094_v46  ;;  %v5383_v17 = vmul.f32 %v5316_v57, %v4879_v19 }
 0x246   : > { %v6187_v42 = vpack.c.bf16 %v4879_v19, %v4878_v50  ;;  %v5382_v51 = vmul.f32 %v5311_v60, %v4878_v50  ;;  %v4881_v59 = vadd.f32 %v7189_v28, %v4352_v21  ;;  %v5510_v7 = vadd.f32 %v5509_v58, %v5469_v20 }
 0x247   : > { %v5422_v27 = vadd.f32 %v5421_v9, %v5381_v23  ;;  %v4296_v56 = vpop.f32.mrf.mxu1  ;;  %v4815_v35 = vpop.f32.mrf.mxu0  ;;  %v4354_v6 = vadd.f32 %v7127_v36, %v9095_v10  ;;  %v5472_v63 = vmul.f32 %v5383_v17, %v4879_v19 }
 0x248   : > { %6220 = vst [vmem:[%s8892_s7 + $0x88] sm:$0xff] %v6187_v42   ;;  %v5471_v32 = vmul.f32 %v5382_v51, %v4878_v50  ;;  %v4880_v2 = vadd.f32 %v4815_v35, %v4351_v29  ;;  %v5511_v4 = vadd.f32 %v5510_v7, %v5470_v54  ;;  %v5385_v18 = vmul.f32 %v5326_v43, %v4881_v59  ;;  %v5341_v19 = vpop.permute.xlu0 %5340 }
 0x249   : > { %v5423_v38 = vadd.f32 %v5422_v27, %v5382_v51  ;;  %v7130_v22 = vpop.f32.mrf.mxu1  ;;  %v7192_v8 = vpop.f32.mrf.mxu0  ;;  %v4353_v60 = vadd.f32 %v4296_v56, %v9096_v48 }
 0x24a   : > { %v6192_v15 = vpack.c.bf16 %v4881_v59, %v4880_v2  ;;  %v5384_v24 = vmul.f32 %v5321_v0, %v4880_v2  ;;  %v5512_v61 = vadd.f32 %v5511_v4, %v5471_v32  ;;  %v4883_v45 = vadd.f32 %v7192_v8, %v4354_v6  ;;  %v5346_v0 = vpop.permute.xlu1 %5345 }
 0x24b   : > { %v5424_v16 = vadd.f32 %v5423_v38, %v5383_v17  ;;  %v4306_v14 = vpop.f32.mrf.mxu1  ;;  %v4825_v3 = vpop.f32.mrf.mxu0  ;;  %v4356_v44 = vadd.f32 %v7130_v22, %v9097_v55  ;;  %v5474_v53 = vmul.f32 %v5385_v18, %v4881_v59  ;;  %v5526_v17 = vlaneseq }
 0x24c   : > { %6221 = vst [vmem:[%s8892_s7 + $0x90] sm:$0xff] %v6192_v15   ;;  %v5473_v39 = vmul.f32 %v5384_v24, %v4880_v2  ;;  %v4882_v33 = vadd.f32 %v4825_v3, %v4353_v60  ;;  %v5513_v41 = vadd.f32 %v5512_v61, %v5472_v63  ;;  %v4355_v11 = vadd.f32 %v4306_v14, %v9098_v5 }
 0x24d   : > { %v5425_v57 = vadd.f32 %v5424_v16, %v5384_v24  ;;  %v7195_v13 = vpop.f32.mrf.mxu0  ;;  %v5387_v34 = vmul.f32 %v5336_v62, %v4883_v45  ;;  %v5527_v2 = vshrl.u32 %v5526_v17, 7 }
 0x24e   : > { %v6197_v1 = vpack.c.bf16 %v4883_v45, %v4882_v33  ;;  %v5386_v40 = vmul.f32 %v5331_v37, %v4882_v33  ;;  %v5514_v25 = vadd.f32 %v5513_v41, %v5473_v39  ;;  %v4885_v12 = vadd.f32 %v7195_v13, %v4356_v44 }
 0x24f   : > { %v5426_v52 = vadd.f32 %v5425_v57, %v5385_v18  ;;  %v4835_v30 = vpop.f32.mrf.mxu0  ;;  %v5476_v21 = vmul.f32 %v5387_v34, %v4883_v45  ;;  %vm5529_vm1 = vcmp.eq.s32.totalorder %v5527_v2, 1  ;;  %vm5528_vm2 = vcmp.eq.s32.totalorder %v5527_v2, 0 }
 0x250   : > { %6222 = vst [vmem:[%s8892_s7 + $0x98] sm:$0xff] %v6197_v1   ;;  %v5475_v23 = vmul.f32 %v5386_v40, %v4882_v33  ;;  %v4884_v31 = vadd.f32 %v4835_v30, %v4355_v11  ;;  %v5515_v26 = vadd.f32 %v5514_v25, %v5474_v53  ;;  %v5389_v9 = vmul.f32 %v5346_v0, %v4885_v12 }
 0x251   : > { %v5427_v47 = vadd.f32 %v5426_v52, %v5386_v40 }
 0x252   : > { %v6202_v20 = vpack.c.bf16 %v4885_v12, %v4884_v31  ;;  %v5388_v49 = vmul.f32 %v5341_v19, %v4884_v31  ;;  %v5516_v50 = vadd.f32 %v5515_v26, %v5475_v23  ;;  %v5478_v46 = vmul.f32 %v5389_v9, %v4885_v12 }
 0x253   : > { %v5428_v58 = vadd.f32 %v5427_v47, %v5387_v34 }
 0x254   : > { %6223 = vst [vmem:[%s8892_s7 + $0xa0] sm:$0xff] %v6202_v20   ;;  %v5477_v36 = vmul.f32 %v5388_v49, %v4884_v31  ;;  %v5517_v43 = vadd.f32 %v5516_v50, %v5476_v21 }
 0x255   : > { %v5429_v28 = vadd.f32 %v5428_v58, %v5388_v49 }
 0x256   : > { %v5518_v42 = vadd.f32 %v5517_v43, %v5477_v36 }
 0x257   : > { %v5430_v29 = vadd.f32 %v5429_v28, %v5389_v9 }
 0x258   : > { %v5519_v59 = vadd.f32 %v5518_v42, %v5478_v46 }
 0x259   : > { %v5431_v51 = vrot.slane %v5430_v29, 4 }
 0x25a   : > { %v5520_v7 = vrot.slane %v5519_v59, 4 }
 0x25b   : > { %v5432_v54 = vadd.f32 %v5431_v51, %v5430_v29 }
 0x25c   : > { %v5521_v56 = vadd.f32 %v5520_v7, %v5519_v59 }
 0x25d   : > { %v5433_v27 = vrot.slane %v5432_v54, 2 }
 0x25e   : > { %v5522_v32 = vrot.slane %v5521_v56, 2 }
 0x25f   : > { %v5434_v35 = vadd.f32 %v5433_v27, %v5432_v54 }
 0x260   : > { %v5523_v38 = vadd.f32 %v5522_v32, %v5521_v56 }
 0x261   : > { %v5435_v4 = vrot.slane %v5434_v35, 1 }
 0x262   : > { %v5524_v10 = vrot.slane %v5523_v38, 1 }
 0x263   : > { %v5436_v22 = vadd.f32 %v5435_v4, %v5434_v35 }
 0x264   : > { %v5525_v6 = vadd.f32 %v5524_v10, %v5523_v38 }
 0x266   : > { %v5530_v8 = vsel %vm5529_vm1, %v5525_v6, 0.0 }
 0x267   : > { %v5531_v37 = vsel %vm5528_vm2, %v5436_v22, %v5530_v8 }
 0x268   : > { %5532 = vst [vmem:[%s208_s11] sm:$0xff] %v5531_v37 }
 0x269 PF: > { %s15_s15 = sadd.s32 1, %s7217_s15  }
 0x26a   : > { %p12_p4 = scmp.ge.s32.totalorder %s15_s15, 4  }
 0x26c   :  { %14 = sbr.rel (!%p12_p4) target bundleno = 1 (0x1), region = 82 }

</bundles_post_ra>
